<compile_context>
chip_gen: v5e
topology: v5e:2x2
jax: 0.10.0
libtpu: 0.0.40
codegen_flags: <defaults>
</compile_context>

<pallas_src>
import math
import functools

import jax
import jax.numpy as jnp
import numpy as np
from jax.experimental import pallas as pl
from jax.experimental.pallas import tpu as pltpu

TIME_EMBED_DIM = 128
HALF = TIME_EMBED_DIM // 2
HID = 256
OUT_DIM = 2
OUT_PAD = 128            # lane-dense padded output width
DATA_DIM = 2
NUM_RES_BLOCKS = 3
NUM_STEPS = 1000         # stands in for args.num_steps
MAX_TILE_N = 512         # batch tile size for large N

ONE_OVER_SQRT2 = 1.0 / math.sqrt(2.0)


# ---------------------------------------------------------------------------
# Reference helper: sinusoidal timestep embedding (matches PyTorch exactly).
# Used only by the pure-JAX reference; the kernel computes it internally.
# ---------------------------------------------------------------------------
def timestep_embedding(timesteps, dim, max_period=10000):
    half = dim // 2
    freqs = jnp.exp(
        -math.log(max_period) * jnp.arange(0, half, dtype=jnp.float32) / half
    )
    args = timesteps[:, None].astype(jnp.float32) * freqs[None]
    emb = jnp.concatenate([jnp.cos(args), jnp.sin(args)], axis=-1)
    if dim % 2:
        emb = jnp.concatenate([emb, jnp.zeros_like(emb[:, :1])], axis=-1)
    return emb


# ---------------------------------------------------------------------------
# Pallas kernel: full ToyNet forward for one batch tile.
# ---------------------------------------------------------------------------
def _silu(v):
    return v * jax.nn.sigmoid(v)


def toynet_kernel(
    x_ref,        # [tile, 2]    f32
    t_ref,        # [tile, 1]    f32 (already scaled by num_steps)
    freqs_ref,    # [1, 64]      f32
    wt1_ref, bt1_ref,     # [128,256] bf16, [1,256] f32
    wt2_ref, bt2_ref,     # [256,256] bf16, [1,256] f32
    wm_ref, bm_ref,       # [2,256]   f32 , [1,256] f32
    wres_ref, bres_ref,   # [9,256,256] bf16, [9,1,256] f32
    wo1_ref, bo1_ref,     # [256,256] bf16, [1,256] f32
    wo2_ref, bo2_ref,     # [256,128] bf16 (zero-padded), [1,128] f32
    out_ref,              # [tile, 128] f32
):
    f32 = jnp.float32
    bf16 = jnp.bfloat16

    # ---- sinusoidal timestep embedding, in-kernel (EUP work) ----
    args = t_ref[...] * freqs_ref[...]                       # [tile, 64]
    cos_e = jnp.cos(args)
    sin_e = jnp.sin(args)

    # ---- t_module: Linear(128,256) -> SiLU -> Linear(256,256) ----
    # concat([cos,sin]) @ W1 == cos @ W1[:64] + sin @ W1[64:]
    t = (
        jnp.dot(cos_e.astype(bf16), wt1_ref[0:HALF, :], preferred_element_type=f32)
        + jnp.dot(sin_e.astype(bf16), wt1_ref[HALF:TIME_EMBED_DIM, :],
                  preferred_element_type=f32)
        + bt1_ref[...]
    )
    t = _silu(t)
    t_out = jnp.dot(t.astype(bf16), wt2_ref[...], preferred_element_type=f32) + bt2_ref[...]

    # ---- x_module: ResNet_FC(2, 256, num_res_blocks=3) ----
    # K=2 projection done on the VPU (broadcast mul-add), not the MXU.
    h = (
        x_ref[:, 0:1] * wm_ref[0:1, :]
        + x_ref[:, 1:2] * wm_ref[1:2, :]
        + bm_ref[...]
    )
    for blk in range(NUM_RES_BLOCKS):
        r = h
        for layer in range(3):
            k = blk * 3 + layer
            r = jnp.dot(r.astype(bf16), wres_ref[k], preferred_element_type=f32) + bres_ref[k]
            r = _silu(r)
        h = (h + r) * ONE_OVER_SQRT2

    # ---- out_module: Linear -> SiLU -> Linear (lane-dense 128-wide output) ----
    z = h + t_out
    z = _silu(jnp.dot(z.astype(bf16), wo1_ref[...], preferred_element_type=f32) + bo1_ref[...])
    out_ref[...] = (
        jnp.dot(z.astype(bf16), wo2_ref[...], preferred_element_type=f32) + bo2_ref[...]
    )


# ---------------------------------------------------------------------------
# Parameter construction (deterministic, PyTorch-Linear-style uniform init).
# Weights are round-tripped through bf16 so the in-kernel bf16 weight cast is
# lossless relative to the f32 reference weights.
# ---------------------------------------------------------------------------
def _linear_params(key, fan_in, fan_out):
    kw, kb = jax.random.split(key)
    bound = 1.0 / math.sqrt(fan_in)
    w = jax.random.uniform(kw, (fan_in, fan_out), jnp.float32, -bound, bound)
    w = w.astype(jnp.bfloat16).astype(jnp.float32)
    b = jax.random.uniform(kb, (1, fan_out), jnp.float32, -bound, bound)
    return w, b


def init_params(key):
    keys = jax.random.split(key, 16)
    wt1, bt1 = _linear_params(keys[0], TIME_EMBED_DIM, HID)
    wt2, bt2 = _linear_params(keys[1], HID, HID)
    wm, bm = _linear_params(keys[2], DATA_DIM, HID)
    wres_list, bres_list = [], []
    for i in range(NUM_RES_BLOCKS * 3):
        w, b = _linear_params(keys[3 + i], HID, HID)
        wres_list.append(w)
        bres_list.append(b)
    wres = jnp.stack(wres_list, axis=0)           # [9, 256, 256]
    bres = jnp.stack(bres_list, axis=0)           # [9, 1, 256]
    wo1, bo1 = _linear_params(keys[12], HID, HID)
    wo2, bo2 = _linear_params(keys[13], HID, OUT_DIM)
    return dict(
        wt1=wt1, bt1=bt1, wt2=wt2, bt2=bt2,
        wm=wm, bm=bm, wres=wres, bres=bres,
        wo1=wo1, bo1=bo1, wo2=wo2, bo2=bo2,
    )


# ---------------------------------------------------------------------------
# Wrapper
# ---------------------------------------------------------------------------
def _compute_tile(n):
    if n >= MAX_TILE_N:
        return MAX_TILE_N
    return max(8, ((n + 7) // 8) * 8)


@functools.partial(jax.jit, static_argnames=("num_steps",))
def toynet_forward(params, x, t, num_steps=NUM_STEPS):
    # mirror the PyTorch forward's t handling
    t = jnp.squeeze(t)
    if t.ndim == 0:
        t = jnp.repeat(t, x.shape[0])
    assert t.ndim == 1 and t.shape[0] == x.shape[0]
    t = t.astype(jnp.float32) * num_steps

    n = x.shape[0]
    tile_n = _compute_tile(n)
    n_pad = pl.cdiv(n, tile_n) * tile_n
    grid = (n_pad // tile_n,)

    # pad the batch dim (padded rows are zeros -> finite garbage, sliced away)
    x_p = jnp.zeros((n_pad, DATA_DIM), jnp.float32).at[:n].set(x.astype(jnp.float32))
    t_p = jnp.zeros((n_pad, 1), jnp.float32).at[:n, 0].set(t)

    freqs = jnp.exp(
        -math.log(10000.0) * jnp.arange(0, HALF, dtype=jnp.float32) / HALF
    ).reshape(1, HALF)

    bf16 = jnp.bfloat16
    wt1 = params["wt1"].astype(bf16)
    wt2 = params["wt2"].astype(bf16)
    wres = params["wres"].astype(bf16)
    wo1 = params["wo1"].astype(bf16)
    wo2_pad = jnp.zeros((HID, OUT_PAD), bf16).at[:, :OUT_DIM].set(
        params["wo2"].astype(bf16))
    bo2_pad = jnp.zeros((1, OUT_PAD), jnp.float32).at[:, :OUT_DIM].set(params["bo2"])

    def row_spec(feat):
        return pl.BlockSpec((tile_n, feat), lambda i: (i, 0))

    def const_spec(shape):
        nd = len(shape)
        return pl.BlockSpec(shape, lambda i, _nd=nd: (0,) * _nd)

    inputs = (
        x_p, t_p, freqs,
        wt1, params["bt1"], wt2, params["bt2"],
        params["wm"], params["bm"], wres, params["bres"],
        wo1, params["bo1"], wo2_pad, bo2_pad,
    )
    in_specs = [
        row_spec(DATA_DIM),                                    # x
        row_spec(1),                                           # t
        const_spec((1, HALF)),                                 # freqs
        const_spec((TIME_EMBED_DIM, HID)), const_spec((1, HID)),   # wt1, bt1
        const_spec((HID, HID)), const_spec((1, HID)),              # wt2, bt2
        const_spec((DATA_DIM, HID)), const_spec((1, HID)),         # wm, bm
        const_spec((NUM_RES_BLOCKS * 3, HID, HID)),                # wres
        const_spec((NUM_RES_BLOCKS * 3, 1, HID)),                  # bres
        const_spec((HID, HID)), const_spec((1, HID)),              # wo1, bo1
        const_spec((HID, OUT_PAD)), const_spec((1, OUT_PAD)),      # wo2, bo2
    ]

    flops_per_row = 2 * (
        TIME_EMBED_DIM * HID
        + HID * HID
        + NUM_RES_BLOCKS * 3 * HID * HID
        + HID * HID
        + HID * OUT_PAD
    )
    weight_bytes = sum(int(np.prod(a.shape)) * a.dtype.itemsize for a in inputs[2:])
    cost = pl.CostEstimate(
        flops=int(n_pad) * flops_per_row,
        transcendentals=int(n_pad) * (11 * HID + TIME_EMBED_DIM),
        bytes_accessed=weight_bytes + int(n_pad) * (DATA_DIM + 1 + OUT_PAD) * 4,
    )

    out_pad = pl.pallas_call(
        toynet_kernel,
        out_shape=jax.ShapeDtypeStruct((n_pad, OUT_PAD), jnp.float32),
        grid=grid,
        in_specs=in_specs,
        out_specs=row_spec(OUT_PAD),
        compiler_params=pltpu.CompilerParams(
            dimension_semantics=("parallel",),
        ),
        cost_estimate=cost,
    )(*inputs)

    return out_pad[:n, :OUT_DIM]


# ---------------------------------------------------------------------------
# Pure-JAX reference (f32 throughout) for correctness checking
# ---------------------------------------------------------------------------
def toynet_reference(params, x, t, num_steps=NUM_STEPS):
    t = jnp.squeeze(t)
    if t.ndim == 0:
        t = jnp.repeat(t, x.shape[0])
    t = t.astype(jnp.float32) * num_steps
    temb = timestep_embedding(t, TIME_EMBED_DIM)

    def silu(v):
        return v * jax.nn.sigmoid(v)

    tt = silu(temb @ params["wt1"] + params["bt1"])
    t_out = tt @ params["wt2"] + params["bt2"]

    h = x @ params["wm"] + params["bm"]
    for blk in range(NUM_RES_BLOCKS):
        r = h
        for layer in range(3):
            k = blk * 3 + layer
            r = silu(r @ params["wres"][k] + params["bres"][k])
        h = (h + r) / math.sqrt(2.0)

    z = h + t_out
    z = silu(z @ params["wo1"] + params["bo1"])
    return z @ params["wo2"] + params["bo2"]


if __name__ == "__main__":
    key = jax.random.PRNGKey(0)
    kp, kx, kt, kx2, kt2 = jax.random.split(key, 5)

    params = init_params(kp)

    # small test: single tile
    N = 8
    x = jax.random.normal(kx, (N, DATA_DIM), jnp.float32)
    t = jax.random.uniform(kt, (N,), jnp.float32)   # fractional timesteps in [0,1)

    out = jax.block_until_ready(toynet_forward(params, x, t))
    ref = toynet_reference(params, x, t)
    np.testing.assert_allclose(np.asarray(out), np.asarray(ref), rtol=2e-2, atol=2e-2)
    assert out.shape == (N, OUT_DIM)

    # larger test: exercises the batch grid + ragged last tile padding
    N2 = 600
    x2 = jax.random.normal(kx2, (N2, DATA_DIM), jnp.float32)
    t2 = jax.random.uniform(kt2, (N2,), jnp.float32)
    out2 = jax.block_until_ready(toynet_forward(params, x2, t2))
    ref2 = toynet_reference(params, x2, t2)
    np.testing.assert_allclose(np.asarray(out2), np.asarray(ref2), rtol=2e-2, atol=2e-2)
    assert out2.shape == (N2, OUT_DIM)

    print("KERNEL_OK")
</pallas_src>

<mosaic_0001>
module attributes {stable_mosaic.version = 11 : i64} {
  func.func @toynet_kernel(%arg0: i32, %arg1: memref<8x2xf32, #tpu.memory_space<vmem>>, %arg2: memref<8x1xf32, #tpu.memory_space<vmem>>, %arg3: memref<1x64xf32, #tpu.memory_space<vmem>>, %arg4: memref<128x256xbf16, #tpu.memory_space<vmem>>, %arg5: memref<1x256xf32, #tpu.memory_space<vmem>>, %arg6: memref<256x256xbf16, #tpu.memory_space<vmem>>, %arg7: memref<1x256xf32, #tpu.memory_space<vmem>>, %arg8: memref<2x256xf32, #tpu.memory_space<vmem>>, %arg9: memref<1x256xf32, #tpu.memory_space<vmem>>, %arg10: memref<9x256x256xbf16, #tpu.memory_space<vmem>>, %arg11: memref<9x1x256xf32, #tpu.memory_space<vmem>>, %arg12: memref<256x256xbf16, #tpu.memory_space<vmem>>, %arg13: memref<1x256xf32, #tpu.memory_space<vmem>>, %arg14: memref<256x128xbf16, #tpu.memory_space<vmem>>, %arg15: memref<1x128xf32, #tpu.memory_space<vmem>>, %arg16: memref<8x128xf32, #tpu.memory_space<vmem>>) attributes {dimension_semantics = [#tpu.dimension_semantics<parallel>], iteration_bounds = array<i64: 1>, scalar_prefetch = 0 : i64, scratch_operands = 0 : i64, tpu.core_type = #tpu.core_type<tc>, window_params = [{transform_indices = @transform_0, window_bounds = array<i64: 8, 2>}, {transform_indices = @transform_1, window_bounds = array<i64: 8, 1>}, {pipeline_mode = #tpu.pipeline_mode<synchronous>, transform_indices = @transform_2, window_bounds = array<i64: 1, 64>}, {pipeline_mode = #tpu.pipeline_mode<synchronous>, transform_indices = @transform_3, window_bounds = array<i64: 128, 256>}, {pipeline_mode = #tpu.pipeline_mode<synchronous>, transform_indices = @transform_4, window_bounds = array<i64: 1, 256>}, {pipeline_mode = #tpu.pipeline_mode<synchronous>, transform_indices = @transform_5, window_bounds = array<i64: 256, 256>}, {pipeline_mode = #tpu.pipeline_mode<synchronous>, transform_indices = @transform_6, window_bounds = array<i64: 1, 256>}, {pipeline_mode = #tpu.pipeline_mode<synchronous>, transform_indices = @transform_7, window_bounds = array<i64: 2, 256>}, {pipeline_mode = #tpu.pipeline_mode<synchronous>, transform_indices = @transform_8, window_bounds = array<i64: 1, 256>}, {pipeline_mode = #tpu.pipeline_mode<synchronous>, transform_indices = @transform_9, window_bounds = array<i64: 9, 256, 256>}, {pipeline_mode = #tpu.pipeline_mode<synchronous>, transform_indices = @transform_10, window_bounds = array<i64: 9, 1, 256>}, {pipeline_mode = #tpu.pipeline_mode<synchronous>, transform_indices = @transform_11, window_bounds = array<i64: 256, 256>}, {pipeline_mode = #tpu.pipeline_mode<synchronous>, transform_indices = @transform_12, window_bounds = array<i64: 1, 256>}, {pipeline_mode = #tpu.pipeline_mode<synchronous>, transform_indices = @transform_13, window_bounds = array<i64: 256, 128>}, {pipeline_mode = #tpu.pipeline_mode<synchronous>, transform_indices = @transform_14, window_bounds = array<i64: 1, 128>}, {transform_indices = @transform_15, window_bounds = array<i64: 8, 128>}]} {
    %c0 = arith.constant 0 : index
    %c0_0 = arith.constant 0 : index
    %0 = vector.load %arg2[%c0, %c0_0] : memref<8x1xf32, #tpu.memory_space<vmem>>, vector<8x1xf32>
    %c0_1 = arith.constant 0 : index
    %c0_2 = arith.constant 0 : index
    %1 = vector.load %arg3[%c0_1, %c0_2] : memref<1x64xf32, #tpu.memory_space<vmem>>, vector<1x64xf32>
    %2 = vector.broadcast %0 : vector<8x1xf32> to vector<8x64xf32>
    %3 = vector.broadcast %1 : vector<1x64xf32> to vector<8x64xf32>
    %4 = arith.mulf %2, %3 : vector<8x64xf32>
    %5 = math.cos %4 : vector<8x64xf32>
    %6 = math.sin %4 : vector<8x64xf32>
    %7 = arith.truncf %5 : vector<8x64xf32> to vector<8x64xbf16>
    %c0_3 = arith.constant 0 : index
    %c0_4 = arith.constant 0 : index
    %8 = vector.load %arg4[%c0_3, %c0_4] : memref<128x256xbf16, #tpu.memory_space<vmem>>, vector<64x256xbf16>
    %cst = arith.constant dense<0.000000e+00> : vector<8x256xf32>
    %9 = tpu.matmul %7, %8, %cst {dimension_numbers = #tpu.dot_dimension_numbers<[1], [0], [0], [1], [0, 0, 1, 1], [], []>} : vector<8x64xbf16>, vector<64x256xbf16>, vector<8x256xf32> -> vector<8x256xf32>
    %10 = arith.truncf %6 : vector<8x64xf32> to vector<8x64xbf16>
    %c64 = arith.constant 64 : index
    %c0_5 = arith.constant 0 : index
    %11 = vector.load %arg4[%c64, %c0_5] : memref<128x256xbf16, #tpu.memory_space<vmem>>, vector<64x256xbf16>
    %cst_6 = arith.constant dense<0.000000e+00> : vector<8x256xf32>
    %12 = tpu.matmul %10, %11, %cst_6 {dimension_numbers = #tpu.dot_dimension_numbers<[1], [0], [0], [1], [0, 0, 1, 1], [], []>} : vector<8x64xbf16>, vector<64x256xbf16>, vector<8x256xf32> -> vector<8x256xf32>
    %13 = arith.addf %9, %12 : vector<8x256xf32>
    %c0_7 = arith.constant 0 : index
    %c0_8 = arith.constant 0 : index
    %14 = vector.load %arg5[%c0_7, %c0_8] : memref<1x256xf32, #tpu.memory_space<vmem>>, vector<1x256xf32>
    %15 = vector.broadcast %14 : vector<1x256xf32> to vector<8x256xf32>
    %16 = arith.addf %13, %15 : vector<8x256xf32>
    %17 = arith.negf %16 : vector<8x256xf32>
    %18 = math.exp %17 : vector<8x256xf32>
    %cst_9 = arith.constant 1.000000e+00 : f32
    %19 = vector.broadcast %cst_9 : f32 to vector<8x256xf32>
    %20 = arith.addf %19, %18 : vector<8x256xf32>
    %21 = arith.divf %19, %20 : vector<8x256xf32>
    %22 = arith.mulf %16, %21 : vector<8x256xf32>
    %23 = arith.truncf %22 : vector<8x256xf32> to vector<8x256xbf16>
    %c0_10 = arith.constant 0 : index
    %c0_11 = arith.constant 0 : index
    %24 = vector.load %arg6[%c0_10, %c0_11] : memref<256x256xbf16, #tpu.memory_space<vmem>>, vector<256x256xbf16>
    %cst_12 = arith.constant dense<0.000000e+00> : vector<8x256xf32>
    %25 = tpu.matmul %23, %24, %cst_12 {dimension_numbers = #tpu.dot_dimension_numbers<[1], [0], [0], [1], [0, 0, 1, 1], [], []>} : vector<8x256xbf16>, vector<256x256xbf16>, vector<8x256xf32> -> vector<8x256xf32>
    %c0_13 = arith.constant 0 : index
    %c0_14 = arith.constant 0 : index
    %26 = vector.load %arg7[%c0_13, %c0_14] : memref<1x256xf32, #tpu.memory_space<vmem>>, vector<1x256xf32>
    %27 = vector.broadcast %26 : vector<1x256xf32> to vector<8x256xf32>
    %28 = arith.addf %25, %27 : vector<8x256xf32>
    %c0_15 = arith.constant 0 : index
    %c0_16 = arith.constant 0 : index
    %29 = vector.load %arg1[%c0_15, %c0_16] : memref<8x2xf32, #tpu.memory_space<vmem>>, vector<8x1xf32>
    %c0_17 = arith.constant 0 : index
    %c0_18 = arith.constant 0 : index
    %30 = vector.load %arg8[%c0_17, %c0_18] : memref<2x256xf32, #tpu.memory_space<vmem>>, vector<1x256xf32>
    %31 = vector.broadcast %29 : vector<8x1xf32> to vector<8x256xf32>
    %32 = vector.broadcast %30 : vector<1x256xf32> to vector<8x256xf32>
    %33 = arith.mulf %31, %32 : vector<8x256xf32>
    %c0_19 = arith.constant 0 : index
    %c1 = arith.constant 1 : index
    %34 = vector.load %arg1[%c0_19, %c1] : memref<8x2xf32, #tpu.memory_space<vmem>>, vector<8x1xf32>
    %c1_20 = arith.constant 1 : index
    %c0_21 = arith.constant 0 : index
    %35 = vector.load %arg8[%c1_20, %c0_21] : memref<2x256xf32, #tpu.memory_space<vmem>>, vector<1x256xf32>
    %36 = vector.broadcast %34 : vector<8x1xf32> to vector<8x256xf32>
    %37 = vector.broadcast %35 : vector<1x256xf32> to vector<8x256xf32>
    %38 = arith.mulf %36, %37 : vector<8x256xf32>
    %39 = arith.addf %33, %38 : vector<8x256xf32>
    %c0_22 = arith.constant 0 : index
    %c0_23 = arith.constant 0 : index
    %40 = vector.load %arg9[%c0_22, %c0_23] : memref<1x256xf32, #tpu.memory_space<vmem>>, vector<1x256xf32>
    %41 = vector.broadcast %40 : vector<1x256xf32> to vector<8x256xf32>
    %42 = arith.addf %39, %41 : vector<8x256xf32>
    %43 = arith.truncf %42 : vector<8x256xf32> to vector<8x256xbf16>
    %c0_24 = arith.constant 0 : index
    %c0_25 = arith.constant 0 : index
    %c0_26 = arith.constant 0 : index
    %44 = vector.load %arg10[%c0_24, %c0_25, %c0_26] : memref<9x256x256xbf16, #tpu.memory_space<vmem>>, vector<1x256x256xbf16>
    %45 = vector.shape_cast %44 : vector<1x256x256xbf16> to vector<256x256xbf16>
    %cst_27 = arith.constant dense<0.000000e+00> : vector<8x256xf32>
    %46 = tpu.matmul %43, %45, %cst_27 {dimension_numbers = #tpu.dot_dimension_numbers<[1], [0], [0], [1], [0, 0, 1, 1], [], []>} : vector<8x256xbf16>, vector<256x256xbf16>, vector<8x256xf32> -> vector<8x256xf32>
    %c0_28 = arith.constant 0 : index
    %c0_29 = arith.constant 0 : index
    %c0_30 = arith.constant 0 : index
    %47 = vector.load %arg11[%c0_28, %c0_29, %c0_30] : memref<9x1x256xf32, #tpu.memory_space<vmem>>, vector<1x1x256xf32>
    %48 = vector.shape_cast %47 : vector<1x1x256xf32> to vector<1x256xf32>
    %49 = vector.broadcast %48 : vector<1x256xf32> to vector<8x256xf32>
    %50 = arith.addf %46, %49 : vector<8x256xf32>
    %51 = arith.negf %50 : vector<8x256xf32>
    %52 = math.exp %51 : vector<8x256xf32>
    %cst_31 = arith.constant 1.000000e+00 : f32
    %53 = vector.broadcast %cst_31 : f32 to vector<8x256xf32>
    %54 = arith.addf %53, %52 : vector<8x256xf32>
    %55 = arith.divf %53, %54 : vector<8x256xf32>
    %56 = arith.mulf %50, %55 : vector<8x256xf32>
    %57 = arith.truncf %56 : vector<8x256xf32> to vector<8x256xbf16>
    %c1_32 = arith.constant 1 : index
    %c0_33 = arith.constant 0 : index
    %c0_34 = arith.constant 0 : index
    %58 = vector.load %arg10[%c1_32, %c0_33, %c0_34] : memref<9x256x256xbf16, #tpu.memory_space<vmem>>, vector<1x256x256xbf16>
    %59 = vector.shape_cast %58 : vector<1x256x256xbf16> to vector<256x256xbf16>
    %cst_35 = arith.constant dense<0.000000e+00> : vector<8x256xf32>
    %60 = tpu.matmul %57, %59, %cst_35 {dimension_numbers = #tpu.dot_dimension_numbers<[1], [0], [0], [1], [0, 0, 1, 1], [], []>} : vector<8x256xbf16>, vector<256x256xbf16>, vector<8x256xf32> -> vector<8x256xf32>
    %c1_36 = arith.constant 1 : index
    %c0_37 = arith.constant 0 : index
    %c0_38 = arith.constant 0 : index
    %61 = vector.load %arg11[%c1_36, %c0_37, %c0_38] : memref<9x1x256xf32, #tpu.memory_space<vmem>>, vector<1x1x256xf32>
    %62 = vector.shape_cast %61 : vector<1x1x256xf32> to vector<1x256xf32>
    %63 = vector.broadcast %62 : vector<1x256xf32> to vector<8x256xf32>
    %64 = arith.addf %60, %63 : vector<8x256xf32>
    %65 = arith.negf %64 : vector<8x256xf32>
    %66 = math.exp %65 : vector<8x256xf32>
    %cst_39 = arith.constant 1.000000e+00 : f32
    %67 = vector.broadcast %cst_39 : f32 to vector<8x256xf32>
    %68 = arith.addf %67, %66 : vector<8x256xf32>
    %69 = arith.divf %67, %68 : vector<8x256xf32>
    %70 = arith.mulf %64, %69 : vector<8x256xf32>
    %71 = arith.truncf %70 : vector<8x256xf32> to vector<8x256xbf16>
    %c2 = arith.constant 2 : index
    %c0_40 = arith.constant 0 : index
    %c0_41 = arith.constant 0 : index
    %72 = vector.load %arg10[%c2, %c0_40, %c0_41] : memref<9x256x256xbf16, #tpu.memory_space<vmem>>, vector<1x256x256xbf16>
    %73 = vector.shape_cast %72 : vector<1x256x256xbf16> to vector<256x256xbf16>
    %cst_42 = arith.constant dense<0.000000e+00> : vector<8x256xf32>
    %74 = tpu.matmul %71, %73, %cst_42 {dimension_numbers = #tpu.dot_dimension_numbers<[1], [0], [0], [1], [0, 0, 1, 1], [], []>} : vector<8x256xbf16>, vector<256x256xbf16>, vector<8x256xf32> -> vector<8x256xf32>
    %c2_43 = arith.constant 2 : index
    %c0_44 = arith.constant 0 : index
    %c0_45 = arith.constant 0 : index
    %75 = vector.load %arg11[%c2_43, %c0_44, %c0_45] : memref<9x1x256xf32, #tpu.memory_space<vmem>>, vector<1x1x256xf32>
    %76 = vector.shape_cast %75 : vector<1x1x256xf32> to vector<1x256xf32>
    %77 = vector.broadcast %76 : vector<1x256xf32> to vector<8x256xf32>
    %78 = arith.addf %74, %77 : vector<8x256xf32>
    %79 = arith.negf %78 : vector<8x256xf32>
    %80 = math.exp %79 : vector<8x256xf32>
    %cst_46 = arith.constant 1.000000e+00 : f32
    %81 = vector.broadcast %cst_46 : f32 to vector<8x256xf32>
    %82 = arith.addf %81, %80 : vector<8x256xf32>
    %83 = arith.divf %81, %82 : vector<8x256xf32>
    %84 = arith.mulf %78, %83 : vector<8x256xf32>
    %85 = arith.addf %42, %84 : vector<8x256xf32>
    %cst_47 = arith.constant 0.707106769 : f32
    %86 = vector.broadcast %cst_47 : f32 to vector<8x256xf32>
    %87 = arith.mulf %85, %86 : vector<8x256xf32>
    %88 = arith.truncf %87 : vector<8x256xf32> to vector<8x256xbf16>
    %c3 = arith.constant 3 : index
    %c0_48 = arith.constant 0 : index
    %c0_49 = arith.constant 0 : index
    %89 = vector.load %arg10[%c3, %c0_48, %c0_49] : memref<9x256x256xbf16, #tpu.memory_space<vmem>>, vector<1x256x256xbf16>
    %90 = vector.shape_cast %89 : vector<1x256x256xbf16> to vector<256x256xbf16>
    %cst_50 = arith.constant dense<0.000000e+00> : vector<8x256xf32>
    %91 = tpu.matmul %88, %90, %cst_50 {dimension_numbers = #tpu.dot_dimension_numbers<[1], [0], [0], [1], [0, 0, 1, 1], [], []>} : vector<8x256xbf16>, vector<256x256xbf16>, vector<8x256xf32> -> vector<8x256xf32>
    %c3_51 = arith.constant 3 : index
    %c0_52 = arith.constant 0 : index
    %c0_53 = arith.constant 0 : index
    %92 = vector.load %arg11[%c3_51, %c0_52, %c0_53] : memref<9x1x256xf32, #tpu.memory_space<vmem>>, vector<1x1x256xf32>
    %93 = vector.shape_cast %92 : vector<1x1x256xf32> to vector<1x256xf32>
    %94 = vector.broadcast %93 : vector<1x256xf32> to vector<8x256xf32>
    %95 = arith.addf %91, %94 : vector<8x256xf32>
    %96 = arith.negf %95 : vector<8x256xf32>
    %97 = math.exp %96 : vector<8x256xf32>
    %cst_54 = arith.constant 1.000000e+00 : f32
    %98 = vector.broadcast %cst_54 : f32 to vector<8x256xf32>
    %99 = arith.addf %98, %97 : vector<8x256xf32>
    %100 = arith.divf %98, %99 : vector<8x256xf32>
    %101 = arith.mulf %95, %100 : vector<8x256xf32>
    %102 = arith.truncf %101 : vector<8x256xf32> to vector<8x256xbf16>
    %c4 = arith.constant 4 : index
    %c0_55 = arith.constant 0 : index
    %c0_56 = arith.constant 0 : index
    %103 = vector.load %arg10[%c4, %c0_55, %c0_56] : memref<9x256x256xbf16, #tpu.memory_space<vmem>>, vector<1x256x256xbf16>
    %104 = vector.shape_cast %103 : vector<1x256x256xbf16> to vector<256x256xbf16>
    %cst_57 = arith.constant dense<0.000000e+00> : vector<8x256xf32>
    %105 = tpu.matmul %102, %104, %cst_57 {dimension_numbers = #tpu.dot_dimension_numbers<[1], [0], [0], [1], [0, 0, 1, 1], [], []>} : vector<8x256xbf16>, vector<256x256xbf16>, vector<8x256xf32> -> vector<8x256xf32>
    %c4_58 = arith.constant 4 : index
    %c0_59 = arith.constant 0 : index
    %c0_60 = arith.constant 0 : index
    %106 = vector.load %arg11[%c4_58, %c0_59, %c0_60] : memref<9x1x256xf32, #tpu.memory_space<vmem>>, vector<1x1x256xf32>
    %107 = vector.shape_cast %106 : vector<1x1x256xf32> to vector<1x256xf32>
    %108 = vector.broadcast %107 : vector<1x256xf32> to vector<8x256xf32>
    %109 = arith.addf %105, %108 : vector<8x256xf32>
    %110 = arith.negf %109 : vector<8x256xf32>
    %111 = math.exp %110 : vector<8x256xf32>
    %cst_61 = arith.constant 1.000000e+00 : f32
    %112 = vector.broadcast %cst_61 : f32 to vector<8x256xf32>
    %113 = arith.addf %112, %111 : vector<8x256xf32>
    %114 = arith.divf %112, %113 : vector<8x256xf32>
    %115 = arith.mulf %109, %114 : vector<8x256xf32>
    %116 = arith.truncf %115 : vector<8x256xf32> to vector<8x256xbf16>
    %c5 = arith.constant 5 : index
    %c0_62 = arith.constant 0 : index
    %c0_63 = arith.constant 0 : index
    %117 = vector.load %arg10[%c5, %c0_62, %c0_63] : memref<9x256x256xbf16, #tpu.memory_space<vmem>>, vector<1x256x256xbf16>
    %118 = vector.shape_cast %117 : vector<1x256x256xbf16> to vector<256x256xbf16>
    %cst_64 = arith.constant dense<0.000000e+00> : vector<8x256xf32>
    %119 = tpu.matmul %116, %118, %cst_64 {dimension_numbers = #tpu.dot_dimension_numbers<[1], [0], [0], [1], [0, 0, 1, 1], [], []>} : vector<8x256xbf16>, vector<256x256xbf16>, vector<8x256xf32> -> vector<8x256xf32>
    %c5_65 = arith.constant 5 : index
    %c0_66 = arith.constant 0 : index
    %c0_67 = arith.constant 0 : index
    %120 = vector.load %arg11[%c5_65, %c0_66, %c0_67] : memref<9x1x256xf32, #tpu.memory_space<vmem>>, vector<1x1x256xf32>
    %121 = vector.shape_cast %120 : vector<1x1x256xf32> to vector<1x256xf32>
    %122 = vector.broadcast %121 : vector<1x256xf32> to vector<8x256xf32>
    %123 = arith.addf %119, %122 : vector<8x256xf32>
    %124 = arith.negf %123 : vector<8x256xf32>
    %125 = math.exp %124 : vector<8x256xf32>
    %cst_68 = arith.constant 1.000000e+00 : f32
    %126 = vector.broadcast %cst_68 : f32 to vector<8x256xf32>
    %127 = arith.addf %126, %125 : vector<8x256xf32>
    %128 = arith.divf %126, %127 : vector<8x256xf32>
    %129 = arith.mulf %123, %128 : vector<8x256xf32>
    %130 = arith.addf %87, %129 : vector<8x256xf32>
    %cst_69 = arith.constant 0.707106769 : f32
    %131 = vector.broadcast %cst_69 : f32 to vector<8x256xf32>
    %132 = arith.mulf %130, %131 : vector<8x256xf32>
    %133 = arith.truncf %132 : vector<8x256xf32> to vector<8x256xbf16>
    %c6 = arith.constant 6 : index
    %c0_70 = arith.constant 0 : index
    %c0_71 = arith.constant 0 : index
    %134 = vector.load %arg10[%c6, %c0_70, %c0_71] : memref<9x256x256xbf16, #tpu.memory_space<vmem>>, vector<1x256x256xbf16>
    %135 = vector.shape_cast %134 : vector<1x256x256xbf16> to vector<256x256xbf16>
    %cst_72 = arith.constant dense<0.000000e+00> : vector<8x256xf32>
    %136 = tpu.matmul %133, %135, %cst_72 {dimension_numbers = #tpu.dot_dimension_numbers<[1], [0], [0], [1], [0, 0, 1, 1], [], []>} : vector<8x256xbf16>, vector<256x256xbf16>, vector<8x256xf32> -> vector<8x256xf32>
    %c6_73 = arith.constant 6 : index
    %c0_74 = arith.constant 0 : index
    %c0_75 = arith.constant 0 : index
    %137 = vector.load %arg11[%c6_73, %c0_74, %c0_75] : memref<9x1x256xf32, #tpu.memory_space<vmem>>, vector<1x1x256xf32>
    %138 = vector.shape_cast %137 : vector<1x1x256xf32> to vector<1x256xf32>
    %139 = vector.broadcast %138 : vector<1x256xf32> to vector<8x256xf32>
    %140 = arith.addf %136, %139 : vector<8x256xf32>
    %141 = arith.negf %140 : vector<8x256xf32>
    %142 = math.exp %141 : vector<8x256xf32>
    %cst_76 = arith.constant 1.000000e+00 : f32
    %143 = vector.broadcast %cst_76 : f32 to vector<8x256xf32>
    %144 = arith.addf %143, %142 : vector<8x256xf32>
    %145 = arith.divf %143, %144 : vector<8x256xf32>
    %146 = arith.mulf %140, %145 : vector<8x256xf32>
    %147 = arith.truncf %146 : vector<8x256xf32> to vector<8x256xbf16>
    %c7 = arith.constant 7 : index
    %c0_77 = arith.constant 0 : index
    %c0_78 = arith.constant 0 : index
    %148 = vector.load %arg10[%c7, %c0_77, %c0_78] : memref<9x256x256xbf16, #tpu.memory_space<vmem>>, vector<1x256x256xbf16>
    %149 = vector.shape_cast %148 : vector<1x256x256xbf16> to vector<256x256xbf16>
    %cst_79 = arith.constant dense<0.000000e+00> : vector<8x256xf32>
    %150 = tpu.matmul %147, %149, %cst_79 {dimension_numbers = #tpu.dot_dimension_numbers<[1], [0], [0], [1], [0, 0, 1, 1], [], []>} : vector<8x256xbf16>, vector<256x256xbf16>, vector<8x256xf32> -> vector<8x256xf32>
    %c7_80 = arith.constant 7 : index
    %c0_81 = arith.constant 0 : index
    %c0_82 = arith.constant 0 : index
    %151 = vector.load %arg11[%c7_80, %c0_81, %c0_82] : memref<9x1x256xf32, #tpu.memory_space<vmem>>, vector<1x1x256xf32>
    %152 = vector.shape_cast %151 : vector<1x1x256xf32> to vector<1x256xf32>
    %153 = vector.broadcast %152 : vector<1x256xf32> to vector<8x256xf32>
    %154 = arith.addf %150, %153 : vector<8x256xf32>
    %155 = arith.negf %154 : vector<8x256xf32>
    %156 = math.exp %155 : vector<8x256xf32>
    %cst_83 = arith.constant 1.000000e+00 : f32
    %157 = vector.broadcast %cst_83 : f32 to vector<8x256xf32>
    %158 = arith.addf %157, %156 : vector<8x256xf32>
    %159 = arith.divf %157, %158 : vector<8x256xf32>
    %160 = arith.mulf %154, %159 : vector<8x256xf32>
    %161 = arith.truncf %160 : vector<8x256xf32> to vector<8x256xbf16>
    %c8 = arith.constant 8 : index
    %c0_84 = arith.constant 0 : index
    %c0_85 = arith.constant 0 : index
    %162 = vector.load %arg10[%c8, %c0_84, %c0_85] : memref<9x256x256xbf16, #tpu.memory_space<vmem>>, vector<1x256x256xbf16>
    %163 = vector.shape_cast %162 : vector<1x256x256xbf16> to vector<256x256xbf16>
    %cst_86 = arith.constant dense<0.000000e+00> : vector<8x256xf32>
    %164 = tpu.matmul %161, %163, %cst_86 {dimension_numbers = #tpu.dot_dimension_numbers<[1], [0], [0], [1], [0, 0, 1, 1], [], []>} : vector<8x256xbf16>, vector<256x256xbf16>, vector<8x256xf32> -> vector<8x256xf32>
    %c8_87 = arith.constant 8 : index
    %c0_88 = arith.constant 0 : index
    %c0_89 = arith.constant 0 : index
    %165 = vector.load %arg11[%c8_87, %c0_88, %c0_89] : memref<9x1x256xf32, #tpu.memory_space<vmem>>, vector<1x1x256xf32>
    %166 = vector.shape_cast %165 : vector<1x1x256xf32> to vector<1x256xf32>
    %167 = vector.broadcast %166 : vector<1x256xf32> to vector<8x256xf32>
    %168 = arith.addf %164, %167 : vector<8x256xf32>
    %169 = arith.negf %168 : vector<8x256xf32>
    %170 = math.exp %169 : vector<8x256xf32>
    %cst_90 = arith.constant 1.000000e+00 : f32
    %171 = vector.broadcast %cst_90 : f32 to vector<8x256xf32>
    %172 = arith.addf %171, %170 : vector<8x256xf32>
    %173 = arith.divf %171, %172 : vector<8x256xf32>
    %174 = arith.mulf %168, %173 : vector<8x256xf32>
    %175 = arith.addf %132, %174 : vector<8x256xf32>
    %cst_91 = arith.constant 0.707106769 : f32
    %176 = vector.broadcast %cst_91 : f32 to vector<8x256xf32>
    %177 = arith.mulf %175, %176 : vector<8x256xf32>
    %178 = arith.addf %177, %28 : vector<8x256xf32>
    %179 = arith.truncf %178 : vector<8x256xf32> to vector<8x256xbf16>
    %c0_92 = arith.constant 0 : index
    %c0_93 = arith.constant 0 : index
    %180 = vector.load %arg12[%c0_92, %c0_93] : memref<256x256xbf16, #tpu.memory_space<vmem>>, vector<256x256xbf16>
    %cst_94 = arith.constant dense<0.000000e+00> : vector<8x256xf32>
    %181 = tpu.matmul %179, %180, %cst_94 {dimension_numbers = #tpu.dot_dimension_numbers<[1], [0], [0], [1], [0, 0, 1, 1], [], []>} : vector<8x256xbf16>, vector<256x256xbf16>, vector<8x256xf32> -> vector<8x256xf32>
    %c0_95 = arith.constant 0 : index
    %c0_96 = arith.constant 0 : index
    %182 = vector.load %arg13[%c0_95, %c0_96] : memref<1x256xf32, #tpu.memory_space<vmem>>, vector<1x256xf32>
    %183 = vector.broadcast %182 : vector<1x256xf32> to vector<8x256xf32>
    %184 = arith.addf %181, %183 : vector<8x256xf32>
    %185 = arith.negf %184 : vector<8x256xf32>
    %186 = math.exp %185 : vector<8x256xf32>
    %cst_97 = arith.constant 1.000000e+00 : f32
    %187 = vector.broadcast %cst_97 : f32 to vector<8x256xf32>
    %188 = arith.addf %187, %186 : vector<8x256xf32>
    %189 = arith.divf %187, %188 : vector<8x256xf32>
    %190 = arith.mulf %184, %189 : vector<8x256xf32>
    %191 = arith.truncf %190 : vector<8x256xf32> to vector<8x256xbf16>
    %c0_98 = arith.constant 0 : index
    %c0_99 = arith.constant 0 : index
    %192 = vector.load %arg14[%c0_98, %c0_99] : memref<256x128xbf16, #tpu.memory_space<vmem>>, vector<256x128xbf16>
    %cst_100 = arith.constant dense<0.000000e+00> : vector<8x128xf32>
    %193 = tpu.matmul %191, %192, %cst_100 {dimension_numbers = #tpu.dot_dimension_numbers<[1], [0], [0], [1], [0, 0, 1, 1], [], []>} : vector<8x256xbf16>, vector<256x128xbf16>, vector<8x128xf32> -> vector<8x128xf32>
    %c0_101 = arith.constant 0 : index
    %c0_102 = arith.constant 0 : index
    %194 = vector.load %arg15[%c0_101, %c0_102] : memref<1x128xf32, #tpu.memory_space<vmem>>, vector<1x128xf32>
    %195 = vector.broadcast %194 : vector<1x128xf32> to vector<8x128xf32>
    %196 = arith.addf %193, %195 : vector<8x128xf32>
    %c0_103 = arith.constant 0 : index
    %c0_104 = arith.constant 0 : index
    %197 = vector.load %arg16[%c0_103, %c0_104] : memref<8x128xf32, #tpu.memory_space<vmem>>, vector<8x128xf32>
    tpu.vector_store %arg16[%c0_103, %c0_104], %196 {strides = array<i32>} : memref<8x128xf32, #tpu.memory_space<vmem>>, vector<8x128xf32>,
    return
  }
  func.func @transform_0(%arg0: i32) -> (i32, i32) {
    %c0_i32 = arith.constant 0 : i32
    %c0_i32_0 = arith.constant 0 : i32
    return %arg0, %c0_i32 : i32, i32
  }
  func.func @transform_1(%arg0: i32) -> (i32, i32) {
    %c0_i32 = arith.constant 0 : i32
    %c0_i32_0 = arith.constant 0 : i32
    return %arg0, %c0_i32 : i32, i32
  }
  func.func @transform_2(%arg0: i32) -> (i32, i32) {
    %c0_i32 = arith.constant 0 : i32
    %c0_i32_0 = arith.constant 0 : i32
    %c0_i32_1 = arith.constant 0 : i32
    return %c0_i32, %c0_i32_0 : i32, i32
  }
  func.func @transform_3(%arg0: i32) -> (i32, i32) {
    %c0_i32 = arith.constant 0 : i32
    %c0_i32_0 = arith.constant 0 : i32
    %c0_i32_1 = arith.constant 0 : i32
    return %c0_i32, %c0_i32_0 : i32, i32
  }
  func.func @transform_4(%arg0: i32) -> (i32, i32) {
    %c0_i32 = arith.constant 0 : i32
    %c0_i32_0 = arith.constant 0 : i32
    %c0_i32_1 = arith.constant 0 : i32
    return %c0_i32, %c0_i32_0 : i32, i32
  }
  func.func @transform_5(%arg0: i32) -> (i32, i32) {
    %c0_i32 = arith.constant 0 : i32
    %c0_i32_0 = arith.constant 0 : i32
    %c0_i32_1 = arith.constant 0 : i32
    return %c0_i32, %c0_i32_0 : i32, i32
  }
  func.func @transform_6(%arg0: i32) -> (i32, i32) {
    %c0_i32 = arith.constant 0 : i32
    %c0_i32_0 = arith.constant 0 : i32
    %c0_i32_1 = arith.constant 0 : i32
    return %c0_i32, %c0_i32_0 : i32, i32
  }
  func.func @transform_7(%arg0: i32) -> (i32, i32) {
    %c0_i32 = arith.constant 0 : i32
    %c0_i32_0 = arith.constant 0 : i32
    %c0_i32_1 = arith.constant 0 : i32
    return %c0_i32, %c0_i32_0 : i32, i32
  }
  func.func @transform_8(%arg0: i32) -> (i32, i32) {
    %c0_i32 = arith.constant 0 : i32
    %c0_i32_0 = arith.constant 0 : i32
    %c0_i32_1 = arith.constant 0 : i32
    return %c0_i32, %c0_i32_0 : i32, i32
  }
  func.func @transform_9(%arg0: i32) -> (i32, i32, i32) {
    %c0_i32 = arith.constant 0 : i32
    %c0_i32_0 = arith.constant 0 : i32
    %c0_i32_1 = arith.constant 0 : i32
    %c0_i32_2 = arith.constant 0 : i32
    return %c0_i32, %c0_i32_0, %c0_i32_1 : i32, i32, i32
  }
  func.func @transform_10(%arg0: i32) -> (i32, i32, i32) {
    %c0_i32 = arith.constant 0 : i32
    %c0_i32_0 = arith.constant 0 : i32
    %c0_i32_1 = arith.constant 0 : i32
    %c0_i32_2 = arith.constant 0 : i32
    return %c0_i32, %c0_i32_0, %c0_i32_1 : i32, i32, i32
  }
  func.func @transform_11(%arg0: i32) -> (i32, i32) {
    %c0_i32 = arith.constant 0 : i32
    %c0_i32_0 = arith.constant 0 : i32
    %c0_i32_1 = arith.constant 0 : i32
    return %c0_i32, %c0_i32_0 : i32, i32
  }
  func.func @transform_12(%arg0: i32) -> (i32, i32) {
    %c0_i32 = arith.constant 0 : i32
    %c0_i32_0 = arith.constant 0 : i32
    %c0_i32_1 = arith.constant 0 : i32
    return %c0_i32, %c0_i32_0 : i32, i32
  }
  func.func @transform_13(%arg0: i32) -> (i32, i32) {
    %c0_i32 = arith.constant 0 : i32
    %c0_i32_0 = arith.constant 0 : i32
    %c0_i32_1 = arith.constant 0 : i32
    return %c0_i32, %c0_i32_0 : i32, i32
  }
  func.func @transform_14(%arg0: i32) -> (i32, i32) {
    %c0_i32 = arith.constant 0 : i32
    %c0_i32_0 = arith.constant 0 : i32
    %c0_i32_1 = arith.constant 0 : i32
    return %c0_i32, %c0_i32_0 : i32, i32
  }
  func.func @transform_15(%arg0: i32) -> (i32, i32) {
    %c0_i32 = arith.constant 0 : i32
    %c0_i32_0 = arith.constant 0 : i32
    return %arg0, %c0_i32 : i32, i32
  }
}

</mosaic_0001>

<bundles_post_ra>
// kernel: toynet_forward.1
= control target key start
LH: loop header
LB: loop body
LE: loop exit
PB: predicated region body
PF: predicated region fallthrough
CT: control target
= control target key end

     0   :  { %v6298_v0 = vmov 0   ;;  %v6299_v2 = vmov 1   ;;  %v6300_v42 = vmov 683565275   ;;  %v6301_v44 = vmov 2475754826   ;;  %s8877_s1 = inlined_call_operand.vmem [shape: f32[8,1], index: 1, kind: input, shape index: {}]   ;;  %s8878_s0 = inlined_call_operand.vmem [shape: f32[8,2], index: 0, kind: input, shape index: {}]   ;;  %s8879_s2 = inlined_call_operand.vmem [shape: f32[1,64], index: 2, kind: input, shape index: {}]   ;;  %s8880_s3 = inlined_call_operand.vmem [shape: bf16[128,256], index: 3, kind: input, shape index: {}]   ;;  %s8881_s5 = inlined_call_operand.vmem [shape: bf16[256,256], index: 5, kind: input, shape index: {}]   ;;  %s8882_s9 = inlined_call_operand.vmem [shape: bf16[9,256,256], index: 9, kind: input, shape index: {}]   ;;  %s8883_s4 = inlined_call_operand.vmem [shape: f32[1,256], index: 4, kind: input, shape index: {}]   ;;  %s8884_s7 = inlined_call_operand.vmem [shape: f32[2,256], index: 7, kind: input, shape index: {}]   ;;  %s8885_s8 = inlined_call_operand.vmem [shape: f32[1,256], index: 8, kind: input, shape index: {}]   ;;  %s8886_s6 = inlined_call_operand.vmem [shape: f32[1,256], index: 6, kind: input, shape index: {}]   ;;  %s8887_s10 = inlined_call_operand.vmem [shape: f32[9,1,256], index: 10, kind: input, shape index: {}]   ;;  %s8888_s11 = inlined_call_operand.vmem [shape: bf16[256,256], index: 11, kind: input, shape index: {}]   ;;  %s8889_s14 = inlined_call_operand.vmem [shape: f32[1,128], index: 14, kind: input, shape index: {}]   ;;  %s8890_s13 = inlined_call_operand.vmem [shape: bf16[256,128], index: 13, kind: input, shape index: {}]   ;;  %s8891_s12 = inlined_call_operand.vmem [shape: f32[1,256], index: 12, kind: input, shape index: {}]   ;;  %s8892_s15 = inlined_call_operand.vmem [shape: f32[8,128], index: 15, kind: output, shape index: {}]  }
   0x1   :  { %6205 = vset.pattern.permute.xlu0 %v6298_v0  ;;  %v51_v1 = vld [vmem:[%s8877_s1] sm:$0xff]  ;;  %6206 = vset.pattern.permute.xlu1 %v6299_v2  ;;  %v4012_v7 = vld [vmem:[%s8880_s3 + $0x70] sm:$0xf]  ;;  %v5828_v8 = vld [vmem:[%s8880_s3 + $0x74] sm:$0xf0] }
   0x2   :  { %v828_v3 = vld [vmem:[%s8878_s0] sm:$0xff]  ;;  %55 = vperm.xlu0 %6205, %v51_v1   ;;  %v5827_v9 = vld [vmem:[%s8880_s3 + $0x74] sm:$0xf]  ;;  %v4013_v11 = vor.u32 %v5828_v8, %v4012_v7  ;;  %v4014_v12 = vld [vmem:[%s8880_s3 + $0x78] sm:$0xf0] }
   0x3   :  { %845 = vperm.xlu1 %6206, %v828_v3   ;;  %v6208_v4 = vld [vmem:[%s8879_s2] ss:$0 sm:$0xff]  ;;  %v4017_v13 = vor.u32 %v5827_v9, %v4014_v12  ;;  %v5826_v15 = vld [vmem:[%s8880_s3 + $0x64] sm:$0xf0]  ;;  %v5825_v16 = vld [vmem:[%s8880_s3 + $0x64] sm:$0xf] }
   0x4   :  { %v4004_v14 = vld [vmem:[%s8880_s3 + $0x60] sm:$0xf]  ;;  %437 = vmatpush.bf16.msra.mxu2 %v4013_v11  ;;  %v4006_v19 = vld [vmem:[%s8880_s3 + $0x68] sm:$0xf0]  ;;  %v3996_v21 = vld [vmem:[%s8880_s3 + $0x50] sm:$0xf] }
   0x5   :  { %v4005_v18 = vor.u32 %v5826_v15, %v4004_v14  ;;  %450 = vmatpush.bf16.msra.mxu3 %v4017_v13  ;;  %v4009_v20 = vor.u32 %v5825_v16, %v4006_v19  ;;  %v5824_v22 = vld [vmem:[%s8880_s3 + $0x54] sm:$0xf0]  ;;  %v5823_v24 = vld [vmem:[%s8880_s3 + $0x54] sm:$0xf]  ;;  %v3998_v25 = vld [vmem:[%s8880_s3 + $0x58] sm:$0xf0] }
   0x6   :  { %v3997_v28 = vor.u32 %v5824_v22, %v3996_v21  ;;  %v4001_v29 = vor.u32 %v5823_v24, %v3998_v25  ;;  %v3988_v30 = vld [vmem:[%s8880_s3 + $0x40] sm:$0xf]  ;;  %v5822_v31 = vld [vmem:[%s8880_s3 + $0x44] sm:$0xf0]  ;;  %v5821_v32 = vld [vmem:[%s8880_s3 + $0x44] sm:$0xf] }
   0x7   :  { %v3990_v33 = vld [vmem:[%s8880_s3 + $0x48] sm:$0xf0]  ;;  %v3989_v37 = vor.u32 %v5822_v31, %v3988_v30  ;;  %v6302_v47 = vmov 2131351028   ;;  %v6303_v50 = vmov 2102212464  }
   0x8   :  { %438 = vmatpush.bf16.msra.mxu2 %v4005_v18  ;;  %v3993_v38 = vor.u32 %v5821_v32, %v3990_v33  ;;  %v6304_v53 = vmov 920167782   ;;  %v6305_v56 = vmov 1326507024  }
   0x9   :  { %451 = vmatpush.bf16.msra.mxu3 %v4009_v20 }
   0xa   :  { %832 = vperm.xlu0 %6205, %v828_v3  }
   0xc   :  { %439 = vmatpush.bf16.msra.mxu2 %v3997_v28 }
   0xd   :  { %452 = vmatpush.bf16.msra.mxu3 %v4001_v29 }
  0x10   :  { %440 = vmatpush.bf16.msra.mxu2 %v3989_v37 }
  0x11   :  { %453 = vmatpush.bf16.msra.mxu3 %v3993_v38 }
  0x12   :  { %6207 = vset.pattern.permute.xlu0 %v6299_v2 }
  0x74   :  { %v56_v5 = vpop.permute.xlu0 %55 }
  0x75   :  { %v6396_v6 = vmul.f32 %v6208_v4, %v56_v5 }
  0x77   :  { %v65_v10 = vand.u32 2139095040, %v6396_v6  ;;  %v62_v26 = vand.u32 2147483647, %v6396_v6  ;;  %vm64_vm12 = vcmp.lt.s32.totalorder %v6396_v6, 0 }
  0x79   :  { %v66_v17 = vshrl.u32 %v65_v10, 23  ;;  %v69_v34 = vand.u32 8388607, %v62_v26  ;;  %vm6538_vm13 = vcmp.le.f32.partialorder %v62_v26, 0.7853982 }
  0x7a   :  { %v5814_v26 = vld [vmem:[%s8880_s3 + $0x4] sm:$0xf0] }
  0x7b   :  { %v3980_v23 = vadd.s32 4294967169, %v66_v17  ;;  %v70_v40 = vor.u32 8388608, %v69_v34 }
  0x7d   :  { %v72_v27 = vadd.s32 1, %v3980_v23  ;;  %v6461_v63 = vshll.u32 %v70_v40, 8 }
  0x7f   :  { %vm73_vm0 = vcmp.gt.s32.totalorder %v72_v27, 0  ;;  %v111_v10 = vand.u32 65535, %v6461_v63  ;;  %v112_v11 = vshrl.u32 %v6461_v63, 16 }
  0x80   :  { %v74_v35 = vsel %vm73_vm0, %v72_v27, 0 }
  0x81   :  { %v76_v36 = vand.u32 31, %v74_v35  ;;  %v6452_v41 = vshrl.u32 %v74_v35, 5 }
  0x83   :  { %v6450_v39 = vsub.s32 32, %v76_v36  ;;  %v79_v43 = vshll.u32 %v6300_v42, %v76_v36  ;;  %v82_v45 = vshll.u32 %v6301_v44, %v76_v36  ;;  %v85_v49 = vshll.u32 %v6302_v47, %v76_v36 }
  0x84   :  { %v88_v52 = vshll.u32 %v6303_v50, %v76_v36  ;;  %v91_v55 = vshll.u32 %v6304_v53, %v76_v36  ;;  %vm94_vm1 = vcmp.lt.s32.totalorder %v6452_v41, 1  ;;  %vm97_vm2 = vcmp.lt.s32.totalorder %v6452_v41, 4 }
  0x85   :  { %v80_v46 = vshrl.u32 %v6301_v44, %v6450_v39  ;;  %v83_v48 = vshrl.u32 %v6302_v47, %v6450_v39  ;;  %v86_v51 = vshrl.u32 %v6303_v50, %v6450_v39  ;;  %v89_v54 = vshrl.u32 %v6304_v53, %v6450_v39 }
  0x86   :  { %v92_v57 = vshrl.u32 %v6305_v56, %v6450_v39  ;;  %vm96_vm3 = vcmp.lt.s32.totalorder %v6452_v41, 3  ;;  %vm95_vm4 = vcmp.lt.s32.totalorder %v6452_v41, 2  ;;  %v78_v37 = vshrl.u32 %v6300_v42, %v6450_v39 }
  0x87   :  { %v81_v58 = vor.u32 %v80_v46, %v79_v43  ;;  %v84_v59 = vor.u32 %v83_v48, %v82_v45  ;;  %v87_v60 = vor.u32 %v86_v51, %v85_v49  ;;  %v90_v61 = vor.u32 %v89_v54, %v88_v52 }
  0x88   :  { %v93_v62 = vor.u32 %v92_v57, %v91_v55 }
  0x89   :  { %v102_v1 = vsel %vm94_vm1, %v81_v58, %v84_v59  ;;  %v106_v2 = vsel %vm94_vm1, %v84_v59, %v87_v60  ;;  %v103_v3 = vsel %vm97_vm2, %v90_v61, 920167782  ;;  %v99_v34 = vsel %vm97_vm2, %v87_v60, 2102212464 }
  0x8a   :  { %v107_v4 = vsel %vm97_vm2, %v93_v62, 1326507024  ;;  %v104_v5 = vsel %vm96_vm3, %v87_v60, %v103_v3  ;;  %v98_v46 = vsel %vm94_vm1, %v78_v37, %v81_v58  ;;  %v100_v47 = vsel %vm96_vm3, %v84_v59, %v99_v34 }
  0x8b   :  { %v108_v7 = vsel %vm96_vm3, %v90_v61, %v107_v4  ;;  %v105_v8 = vsel %vm95_vm4, %v102_v1, %v104_v5  ;;  %v101_v39 = vsel %vm95_vm4, %v98_v46, %v100_v47  ;;  %vm205_vm1 = vweird.f32 %v6396_v6 }
  0x8c   :  { %v109_v9 = vsel %vm95_vm4, %v106_v2, %v108_v7  ;;  %v135_v14 = vand.u32 65535, %v105_v8  ;;  %v136_v15 = vshrl.u32 %v105_v8, 16  ;;  %v155_v54 = vmul.u32 %v6461_v63, %v101_v39 }
  0x8d   :  { %v113_v12 = vand.u32 65535, %v109_v9  ;;  %v114_v13 = vshrl.u32 %v109_v9, 16  ;;  %vm429_vm2 = vcmask 523264  }
  0x8e   :  { %v138_v18 = vmul.u32 %v136_v15, %v111_v10  ;;  %v139_v19 = vmul.u32 %v135_v14, %v112_v11  ;;  %v137_v23 = vmul.u32 %v135_v14, %v111_v10  ;;  %v140_v28 = vmul.u32 %v136_v15, %v112_v11  ;;  %v5819_v14 = vld [vmem:[%s8880_s3 + $0x34] sm:$0xf] }
  0x8f   :  { %v116_v16 = vmul.u32 %v114_v13, %v111_v10  ;;  %v117_v17 = vmul.u32 %v113_v12, %v112_v11  ;;  %v115_v20 = vmul.u32 %v113_v12, %v111_v10  ;;  %v118_v22 = vmul.u32 %v114_v13, %v112_v11  ;;  %v4046_v12 = vld [vmem:[%s8880_s3 + $0x30] sm:$0xf]  ;;  %v5820_v13 = vld [vmem:[%s8880_s3 + $0x34] sm:$0xf0] }
  0x90   :  { %v141_v24 = vshll.u32 %v138_v18, 16  ;;  %v143_v30 = vshll.u32 %v139_v19, 16  ;;  %v142_v44 = vshrl.u32 %v138_v18, 16  ;;  %v144_v50 = vshrl.u32 %v139_v19, 16  ;;  %v4048_v18 = vld [vmem:[%s8880_s3 + $0x38] sm:$0xf0] }
  0x91   :  { %v119_v21 = vshll.u32 %v116_v16, 16  ;;  %v121_v25 = vshll.u32 %v117_v17, 16  ;;  %v120_v38 = vshrl.u32 %v116_v16, 16  ;;  %v122_v48 = vshrl.u32 %v117_v17, 16  ;;  %v4038_v19 = vld [vmem:[%s8880_s3 + $0x20] sm:$0xf] }
  0x92   :  { %vm145_vm6 = vc.u32 %v137_v23, %v141_v24  ;;  %v147_v31 = vadd.s32 %v141_v24, %v137_v23  ;;  %v4047_v17 = vor.u32 %v5820_v13, %v4046_v12  ;;  %v4040_v23 = vld [vmem:[%s8880_s3 + $0x28] sm:$0xf0]  ;;  %v5844_v12 = vld [vmem:[%s8881_s5 + $0x74] sm:$0xf0]  ;;  %v4178_v13 = vld [vmem:[%s8881_s5 + $0xf0] sm:$0xf] }
  0x93   :  { %vm123_vm5 = vc.u32 %v115_v20, %v119_v21  ;;  %v125_v27 = vadd.s32 %v119_v21, %v115_v20  ;;  %v146_v33 = vsel %vm145_vm6, 1, %v6298_v0  ;;  %v4051_v20 = vor.u32 %v5819_v14, %v4048_v18  ;;  %v5818_v21 = vld [vmem:[%s8880_s3 + $0x24] sm:$0xf0] }
  0x94   :  { %v124_v29 = vsel %vm123_vm5, 1, %v6298_v0  ;;  %v148_v35 = vadd.s32 %v146_v33, %v140_v28  ;;  %vm149_vm8 = vc.u32 %v147_v31, %v143_v30  ;;  %v151_v53 = vadd.s32 %v147_v31, %v143_v30  ;;  %506 = vmatpush.bf16.msrb.mxu2 %v4047_v17  ;;  %v4030_v28 = vld [vmem:[%s8880_s3 + $0x10] sm:$0xf]  ;;  %v5815_v31 = vld [vmem:[%s8880_s3 + $0x14] sm:$0xf] }
  0x95   :  { %v126_v32 = vadd.s32 %v124_v29, %v118_v22  ;;  %vm127_vm7 = vc.u32 %v125_v27, %v121_v25  ;;  %v150_v43 = vsel %vm149_vm8, 1, %v6298_v0  ;;  %v5817_v22 = vld [vmem:[%s8880_s3 + $0x24] sm:$0xf]  ;;  %v4039_v25 = vor.u32 %v5818_v21, %v4038_v19  ;;  %519 = vmatpush.bf16.msrb.mxu3 %v4051_v20  ;;  %v5816_v29 = vld [vmem:[%s8880_s3 + $0x14] sm:$0xf0] }
  0x96   :  { %v128_v36 = vsel %vm127_vm7, 1, %v6298_v0  ;;  %v152_v45 = vadd.s32 %v150_v43, %v148_v35  ;;  %v4043_v27 = vor.u32 %v5817_v22, %v4040_v23  ;;  %v4031_v35 = vor.u32 %v5816_v29, %v4030_v28  ;;  %v4116_v17 = vld [vmem:[%s8881_s5 + $0x78] sm:$0xf0]  ;;  %v5859_v20 = vld [vmem:[%s8881_s5 + $0xf4] sm:$0xf] }
  0x97   :  { %v130_v40 = vadd.s32 %v128_v36, %v126_v32  ;;  %v4032_v32 = vld [vmem:[%s8880_s3 + $0x18] sm:$0xf0]  ;;  %v4106_v22 = vld [vmem:[%s8881_s5 + $0x60] sm:$0xf] }
  0x98   :  { %v153_v51 = vadd.s32 %v152_v45, %v142_v44  ;;  %507 = vmatpush.bf16.msrb.mxu2 %v4039_v25  ;;  %v5813_v44 = vld [vmem:[%s8880_s3 + $0x4] sm:$0xf]  ;;  %v4024_v45 = vld [vmem:[%s8880_s3 + $0x8] sm:$0xf0]  ;;  %v4180_v21 = vld [vmem:[%s8881_s5 + $0xf8] sm:$0xf0] }
  0x99   :  { %v131_v49 = vadd.s32 %v130_v40, %v120_v38  ;;  %520 = vmatpush.bf16.msrb.mxu3 %v4043_v27  ;;  %v4035_v38 = vor.u32 %v5815_v31, %v4032_v32  ;;  %v4022_v40 = vld [vmem:[%s8880_s3] sm:$0xf]  ;;  %v4183_v23 = vor.u32 %v5859_v20, %v4180_v21  ;;  %v5858_v27 = vld [vmem:[%s8881_s5 + $0xe4] sm:$0xf0]  ;;  %v4108_v31 = vld [vmem:[%s8881_s5 + $0x68] sm:$0xf0] }
  0x9a   :  { %v154_v42 = vadd.s32 %v153_v51, %v144_v50  ;;  %v4027_v50 = vor.u32 %v5813_v44, %v4024_v45  ;;  %v4170_v25 = vld [vmem:[%s8881_s5 + $0xe0] sm:$0xf]  ;;  %v5857_v32 = vld [vmem:[%s8881_s5 + $0xe4] sm:$0xf]  ;;  %v5839_v44 = vld [vmem:[%s8881_s5 + $0x54] sm:$0xf] }
  0x9b   :  { %v132_v52 = vadd.s32 %v131_v49, %v122_v48  ;;  %v4023_v48 = vor.u32 %v5814_v26, %v4022_v40  ;;  %v4171_v29 = vor.u32 %v5858_v27, %v4170_v25  ;;  %v4162_v40 = vld [vmem:[%s8881_s5 + $0xd0] sm:$0xf]  ;;  %v5856_v26 = vld [vmem:[%s8881_s5 + $0xd4] sm:$0xf0]  ;;  %v4100_v45 = vld [vmem:[%s8881_s5 + $0x58] sm:$0xf0] }
  0x9c   :  { %v158_v0 = vadd.s32 1, %v154_v42  ;;  %508 = vmatpush.bf16.msrb.mxu2 %v4031_v35  ;;  %v4066_v21 = vld [vmem:[%s8881_s5 + $0x10] sm:$0xf]  ;;  %v5848_v25 = vld [vmem:[%s8881_s5 + $0x94] sm:$0xf0] }
  0x9d   :  { %vm157_vm9 = vc.u32 %v132_v52, %v151_v53  ;;  %v156_v41 = vadd.s32 %v151_v53, %v132_v52  ;;  %521 = vmatpush.bf16.msrb.mxu3 %v4035_v38  ;;  %v5831_v27 = vld [vmem:[%s8881_s5 + $0x14] sm:$0xf] }
  0x9e   :  { %v159_v55 = vsel %vm157_vm9, %v158_v0, %v154_v42 }
  0x9f   :  { %v160_v56 = vadd.s32 %v159_v55, %v155_v54 }
  0xa0   :  { %509 = vmatpush.bf16.msrb.mxu2 %v4023_v48  ;;  %v4164_v48 = vld [vmem:[%s8881_s5 + $0xd8] sm:$0xf0] }
  0xa1   :  { %v161_v57 = vadd.s32 536870912, %v160_v56  ;;  %522 = vmatpush.bf16.msrb.mxu3 %v4027_v50  ;;  %v4090_v50 = vld [vmem:[%s8881_s5 + $0x40] sm:$0xf] }
  0xa3   :  { %v162_v58 = vshrl.u32 %v161_v57, 30 }
  0xa5   :  { %v163_v60 = vshll.u32 %v162_v58, 30  ;;  %v186_v36 = vsub.s32 4, %v162_v58 }
  0xa7   :  { %v164_v59 = vsub.s32 %v160_v56, %v163_v60  ;;  %v187_v49 = vsel %vm64_vm12, %v186_v36, %v162_v58  ;;  %v4098_v36 = vld [vmem:[%s8881_s5 + $0x50] sm:$0xf] }
  0xa8   :  { %v189_v53 = vsel %vm6538_vm13, 0, %v187_v49 }
  0xa9   :  { %vm165_vm10 = vcmp.lt.s32.totalorder %v164_v59, 0  ;;  %v166_v61 = vsub.s32 0, %v164_v59  ;;  %v360_v55 = vadd.s32 3, %v189_v53 }
  0xab   :  { %v167_v62 = vsel %vm165_vm10, %v166_v61, %v164_v59  ;;  %v361_v61 = vand.u32 3, %v360_v55 }
  0xac   :  { %v168_v1 = vclz %v167_v62 }
  0xad   :  { %vm363_vm14 = vcmp.eq.s32.totalorder %v361_v61, 0  ;;  %vm366_vm15 = vcmp.eq.s32.totalorder %v361_v61, 2  ;;  %vm362_vm0 = vcmp.lt.s32.totalorder %v361_v61, 2  ;;  %v5836_v61 = vld [vmem:[%s8881_s5 + $0x34] sm:$0xf0] }
  0xae   :  { %v3981_v2 = vadd.s32 4294967294, %v168_v1 }
  0xb0   :  { %vm3982_vm11 = vcmp.lt.s32.totalorder %v3981_v2, 0 }
  0xb1   :  { %v171_v3 = vsel %vm3982_vm11, 0, %v3981_v2 }
  0xb2   :  { %v172_v4 = vsub.s32 32, %v171_v3  ;;  %v176_v5 = vsub.s32 4294967266, %v171_v3  ;;  %v173_v7 = vshll.u32 %v164_v59, %v171_v3 }
  0xb4   :  { %v174_v8 = vshrl.u32 %v156_v41, %v172_v4  ;;  %v177_v9 = vadd.s32 127, %v176_v5 }
  0xb6   :  { %v175_v63 = vor.u32 %v174_v8, %v173_v7  ;;  %v178_v10 = vshll.u32 %v177_v9, 23  ;;  %v206_v7 = vand.u32 3, %v189_v53 }
  0xb8   :  { %v179_v11 = vor.u32 4788187, %v178_v10  ;;  %v182_v16 = vcvt.s32.f32 %v175_v63  ;;  %vm208_vm3 = vcmp.eq.s32.totalorder %v206_v7, 0  ;;  %vm211_vm4 = vcmp.eq.s32.totalorder %v206_v7, 2 }
  0xb9   :  { %vm207_vm5 = vcmp.lt.s32.totalorder %v206_v7, 2  ;;  %v4148_v7 = vld [vmem:[%s8881_s5 + $0xb8] sm:$0xf0] }
  0xba   :  { %v180_v15 = vand.u32 2147483647, %v179_v11 }
  0xbc   :  { %v183_v24 = vmul.f32 %v182_v16, %v180_v15  ;;  %v5860_v15 = vld [vmem:[%s8881_s5 + $0xf4] sm:$0xf0]  ;;  %v5843_v16 = vld [vmem:[%s8881_s5 + $0x74] sm:$0xf] }
  0xbd   :  { %v4179_v18 = vor.u32 %v5860_v15, %v4178_v13  ;;  %v4119_v19 = vor.u32 %v5843_v16, %v4116_v17  ;;  %v4076_v13 = vld [vmem:[%s8881_s5 + $0x28] sm:$0xf0]  ;;  %v5849_v16 = vld [vmem:[%s8881_s5 + $0xa4] sm:$0xf] }
  0xbe   :  { %v184_v30 = vxor.u32 2147483648, %v183_v24  ;;  %v4140_v17 = vld [vmem:[%s8881_s5 + $0xa8] sm:$0xf0] }
  0xbf   :  { %789 = vmatpush.bf16.msra.mxu1 %v4179_v18  ;;  %v4143_v20 = vor.u32 %v5849_v16, %v4140_v17  ;;  %v4293_v17 = vld [vmem:[%s8882_s9 + $0xd8] sm:$0xf0] }
  0xc0   :  { %v185_v34 = vsel %vm64_vm12, %v184_v30, %v183_v24  ;;  %v5842_v24 = vld [vmem:[%s8881_s5 + $0x64] sm:$0xf0]  ;;  %v5841_v30 = vld [vmem:[%s8881_s5 + $0x64] sm:$0xf] }
  0xc1   :  { %v188_v37 = vsel %vm6538_vm13, %v6396_v6, %v185_v34  ;;  %v4114_v6 = vld [vmem:[%s8881_s5 + $0x70] sm:$0xf]  ;;  %v4107_v28 = vor.u32 %v5842_v24, %v4106_v22  ;;  %v4111_v33 = vor.u32 %v5841_v30, %v4108_v31  ;;  %v4172_v34 = vld [vmem:[%s8881_s5 + $0xe8] sm:$0xf0]  ;;  %v5832_v22 = vld [vmem:[%s8881_s5 + $0x14] sm:$0xf0] }
  0xc2   :  { %v190_v43 = vmul.f32 %v188_v37, %v188_v37  ;;  %v4115_v14 = vor.u32 %v5844_v12, %v4114_v6  ;;  %v4175_v35 = vor.u32 %v5857_v32, %v4172_v34  ;;  %v5850_v6 = vld [vmem:[%s8881_s5 + $0xa4] sm:$0xf0]  ;;  %v5833_v12 = vld [vmem:[%s8881_s5 + $0x24] sm:$0xf]  ;;  %v4067_v24 = vor.u32 %v5832_v22, %v4066_v21  ;;  %v5847_v31 = vld [vmem:[%s8881_s5 + $0x94] sm:$0xf] }
  0xc3   :  { %790 = vmatpush.bf16.msra.mxu1 %v4171_v29  ;;  %v4079_v15 = vor.u32 %v5833_v12, %v4076_v13  ;;  %v4132_v32 = vld [vmem:[%s8881_s5 + $0x98] sm:$0xf0]  ;;  %v5871_v13 = vld [vmem:[%s8882_s9 + $0x54] sm:$0xf]  ;;  %v5870_v21 = vld [vmem:[%s8882_s9 + $0x44] sm:$0xf0] }
  0xc4   :  { %v191_v46 = vmul.f32 -0.001358992, %v190_v43  ;;  %v198_v47 = vmul.f32 -0.00019511016, %v190_v43  ;;  %776 = vmatpush.bf16.msra.mxu0 %v4115_v14  ;;  %v4135_v34 = vor.u32 %v5847_v31, %v4132_v32  ;;  %v5869_v31 = vld [vmem:[%s8882_s9 + $0x44] sm:$0xf] }
  0xc5   :  { %v4221_v32 = vld [vmem:[%s8882_s9 + $0x48] sm:$0xf0] }
  0xc6   :  { %v192_v51 = vadd.f32 0.041655596, %v191_v46  ;;  %v199_v52 = vadd.f32 0.008332121, %v198_v47  ;;  %v5855_v46 = vld [vmem:[%s8881_s5 + $0xd4] sm:$0xf]  ;;  %v4103_v47 = vor.u32 %v5839_v44, %v4100_v45 }
  0xc7   :  { %v4167_v49 = vor.u32 %v5855_v46, %v4164_v48  ;;  %v5845_v44 = vld [vmem:[%s8881_s5 + $0x84] sm:$0xf]  ;;  %v4124_v46 = vld [vmem:[%s8881_s5 + $0x88] sm:$0xf0]  ;;  %v5876_v48 = vld [vmem:[%s8882_s9 + $0x74] sm:$0xf0] }
  0xc8   :  { %v193_v39 = vmul.f32 %v192_v51, %v190_v43  ;;  %v200_v42 = vmul.f32 %v199_v52, %v190_v43  ;;  %777 = vmatpush.bf16.msra.mxu0 %v4107_v28  ;;  %v5838_v51 = vld [vmem:[%s8881_s5 + $0x44] sm:$0xf0]  ;;  %v4154_v52 = vld [vmem:[%s8881_s5 + $0xc0] sm:$0xf]  ;;  %v4068_v28 = vld [vmem:[%s8881_s5 + $0x18] sm:$0xf0] }
  0xc9   :  { %v4091_v53 = vor.u32 %v5838_v51, %v4090_v50  ;;  %v4071_v30 = vor.u32 %v5831_v27, %v4068_v28  ;;  %v4307_v51 = vld [vmem:[%s8882_s9 + $0xf0] sm:$0xf]  ;;  %v5886_v27 = vld [vmem:[%s8882_s9 + $0xc4] sm:$0xf0] }
  0xca   :  { %v194_v0 = vadd.f32 -0.4999988, %v193_v39  ;;  %v201_v54 = vadd.f32 -0.16666654, %v200_v42  ;;  %v5854_v39 = vld [vmem:[%s8881_s5 + $0xc4] sm:$0xf0] }
  0xcb   :  { %v5837_v42 = vld [vmem:[%s8881_s5 + $0x44] sm:$0xf] }
  0xcc   :  { %v195_v56 = vmul.f32 %v194_v0, %v190_v43  ;;  %v202_v57 = vmul.f32 %v201_v54, %v190_v43  ;;  %v4163_v43 = vor.u32 %v5856_v26, %v4162_v40  ;;  %v4092_v0 = vld [vmem:[%s8881_s5 + $0x48] sm:$0xf0]  ;;  %v4155_v54 = vor.u32 %v5854_v39, %v4154_v52  ;;  %v5829_v26 = vld [vmem:[%s8881_s5 + $0x4] sm:$0xf]  ;;  %v5892_v52 = vld [vmem:[%s8882_s9 + $0xf4] sm:$0xf0] }
  0xcd   :  { %v4095_v55 = vor.u32 %v5837_v42, %v4092_v0  ;;  %v4308_v0 = vor.u32 %v5892_v52, %v4307_v51  ;;  %v4213_v51 = vld [vmem:[%s8882_s9 + $0x38] sm:$0xf0] }
  0xce   :  { %v196_v60 = vadd.f32 1.0, %v195_v56  ;;  %v203_v59 = vadd.f32 1.0, %v202_v57  ;;  %791 = vmatpush.bf16.msra.mxu1 %v4163_v43  ;;  %v5853_v56 = vld [vmem:[%s8881_s5 + $0xc4] sm:$0xf]  ;;  %v4156_v57 = vld [vmem:[%s8881_s5 + $0xc8] sm:$0xf0] }
  0xcf   :  { %v4060_v43 = vld [vmem:[%s8881_s5 + $0x8] sm:$0xf0] }
  0xd0   :  { %v204_v58 = vmul.f32 %v203_v59, %v188_v37  ;;  %v212_v62 = vxor.u32 2147483648, %v196_v60  ;;  %v5840_v37 = vld [vmem:[%s8881_s5 + $0x54] sm:$0xf0]  ;;  %v4082_v59 = vld [vmem:[%s8881_s5 + $0x30] sm:$0xf]  ;;  %v4063_v45 = vor.u32 %v5829_v26, %v4060_v43 }
  0xd1   :  { %v4099_v38 = vor.u32 %v5840_v37, %v4098_v36  ;;  %v4122_v36 = vld [vmem:[%s8881_s5 + $0x80] sm:$0xf]  ;;  %v5846_v37 = vld [vmem:[%s8881_s5 + $0x84] sm:$0xf0] }
  0xd2   :  { %v209_v1 = vxor.u32 2147483648, %v204_v58  ;;  %v368_v3 = vsel %vm366_vm15, %v212_v62, %v204_v58  ;;  %v213_v9 = vsel %vm211_vm4, %v212_v62, %v204_v58  ;;  %792 = vmatpush.bf16.msra.mxu1 %v4155_v54  ;;  %v4146_v58 = vld [vmem:[%s8881_s5 + $0xb0] sm:$0xf]  ;;  %v4083_v62 = vor.u32 %v5836_v61, %v4082_v59  ;;  %v4245_v54 = vld [vmem:[%s8882_s9 + $0x78] sm:$0xf0] }
  0xd3   :  { %778 = vmatpush.bf16.msra.mxu0 %v4099_v38  ;;  %v4123_v40 = vor.u32 %v5846_v37, %v4122_v36  ;;  %v4235_v59 = vld [vmem:[%s8882_s9 + $0x60] sm:$0xf]  ;;  %v5874_v61 = vld [vmem:[%s8882_s9 + $0x64] sm:$0xf0]  ;;  %v5885_v36 = vld [vmem:[%s8882_s9 + $0xc4] sm:$0xf] }
  0xd4   :  { %v365_v2 = vsel %vm363_vm14, %v196_v60, %v209_v1  ;;  %v210_v8 = vsel %vm208_vm3, %v196_v60, %v209_v1  ;;  %v4159_v60 = vor.u32 %v5853_v56, %v4156_v57  ;;  %v5852_v1 = vld [vmem:[%s8881_s5 + $0xb4] sm:$0xf0]  ;;  %v4309_v56 = vld [vmem:[%s8882_s9 + $0xf8] sm:$0xf0]  ;;  %v4285_v37 = vld [vmem:[%s8882_s9 + $0xc8] sm:$0xf0] }
  0xd5   :  { %v369_v41 = vsel %vm362_vm0, %v365_v2, %v368_v3  ;;  %v214_v63 = vsel %vm207_vm5, %v210_v8, %v213_v9  ;;  %v5835_v2 = vld [vmem:[%s8881_s5 + $0x34] sm:$0xf]  ;;  %v4084_v3 = vld [vmem:[%s8881_s5 + $0x38] sm:$0xf0]  ;;  %v4074_v9 = vld [vmem:[%s8881_s5 + $0x20] sm:$0xf] }
  0xd6   :  { %v370_v4 = vsel %vm205_vm1, nan, %v369_v41  ;;  %v215_v10 = vsel %vm205_vm1, nan, %v214_v63  ;;  %v4147_v41 = vor.u32 %v5852_v1, %v4146_v58  ;;  %v5834_v63 = vld [vmem:[%s8881_s5 + $0x24] sm:$0xf0]  ;;  %v4299_v58 = vld [vmem:[%s8882_s9 + $0xe0] sm:$0xf]  ;;  %v4236_v1 = vor.u32 %v5874_v61, %v4235_v59 }
  0xd7   :  { %v380_v5 = vpack.c.bf16 %v370_v4, %v370_v4  ;;  %v371_v11 = vpack.c.bf16 %v215_v10, %v215_v10  ;;  %779 = vmatpush.bf16.msra.mxu0 %v4091_v53  ;;  %v4087_v4 = vor.u32 %v5835_v2, %v4084_v3  ;;  %v4138_v10 = vld [vmem:[%s8881_s5 + $0xa0] sm:$0xf]  ;;  %v5875_v53 = vld [vmem:[%s8882_s9 + $0x74] sm:$0xf]  ;;  %v5890_v2 = vld [vmem:[%s8882_s9 + $0xe4] sm:$0xf0] }
  0xd8   :  { %793 = vmatpush.bf16.msra.mxu1 %v4147_v41  ;;  %v4139_v14 = vor.u32 %v5850_v6, %v4138_v10  ;;  %v4248_v57 = vor.u32 %v5875_v53, %v4245_v54  ;;  %v5873_v3 = vld [vmem:[%s8882_s9 + $0x64] sm:$0xf]  ;;  %v4237_v41 = vld [vmem:[%s8882_s9 + $0x68] sm:$0xf0]  ;;  %v5872_v10 = vld [vmem:[%s8882_s9 + $0x54] sm:$0xf0] }
  0xd9   :  { %4018 = vmatmul.msk.bf16.vlgmr.msra.gmra.mxu2 %vm429_vm2, %v380_v5  ;;  %4019 = vmatmul.msk.bf16.vlgmr.msra.gmra.mxu3 %vm429_vm2, %v380_v5  ;;  %v5851_v5 = vld [vmem:[%s8881_s5 + $0xb4] sm:$0xf]  ;;  %v5888_v6 = vld [vmem:[%s8882_s9 + $0xd4] sm:$0xf0]  ;;  %v4277_v54 = vld [vmem:[%s8882_s9 + $0xb8] sm:$0xf0] }
  0xda   :  { %802 = vmatpush.bf16.msra.mxu2 %v4119_v19  ;;  %815 = vmatpush.bf16.msra.mxu3 %v4183_v23  ;;  %v4151_v8 = vor.u32 %v5851_v5, %v4148_v7  ;;  %v4130_v23 = vld [vmem:[%s8881_s5 + $0x90] sm:$0xf]  ;;  %v4240_v5 = vor.u32 %v5873_v3, %v4237_v41  ;;  %v5889_v7 = vld [vmem:[%s8882_s9 + $0xe4] sm:$0xf]  ;;  %v5882_v59 = vld [vmem:[%s8882_s9 + $0xa4] sm:$0xf0] }
  0xdb   :  { %780 = vmatpush.bf16.msra.mxu0 %v4083_v62  ;;  %v4131_v29 = vor.u32 %v5848_v25, %v4130_v23  ;;  %v528_v62 = vld [vmem:[%s8883_s4] sm:$0x3]  ;;  %v4269_v41 = vld [vmem:[%s8882_s9 + $0xa8] sm:$0xf0] }
  0xdc   :  { %794 = vmatpush.bf16.msra.mxu1 %v4139_v14  ;;  %v4229_v14 = vld [vmem:[%s8882_s9 + $0x58] sm:$0xf0]  ;;  %v530_v22 = vperm.slane %v528_v62, 0  ;;  %v531_v23 = vperm.slane %v528_v62, 1  ;;  %v4283_v25 = vld [vmem:[%s8882_s9 + $0xc0] sm:$0xf] }
  0xdd   :  { %v5865_v62 = vld [vmem:[%s8882_s9 + $0x24] sm:$0xf] }
  0xde   :  { %803 = vmatpush.bf16.msra.mxu2 %v4111_v33  ;;  %816 = vmatpush.bf16.msra.mxu3 %v4175_v35  ;;  %v4058_v33 = vld [vmem:[%s8881_s5] sm:$0xf]  ;;  %v5830_v35 = vld [vmem:[%s8881_s5 + $0x4] sm:$0xf0] }
  0xdf   :  { %v4059_v38 = vor.u32 %v5830_v35, %v4058_v33 }
  0xe0   :  { %795 = vmatpush.bf16.msra.mxu1 %v4131_v29 }
  0xe2   :  { %804 = vmatpush.bf16.msra.mxu2 %v4103_v47  ;;  %817 = vmatpush.bf16.msra.mxu3 %v4167_v49  ;;  %v4243_v47 = vld [vmem:[%s8882_s9 + $0x70] sm:$0xf]  ;;  %v4127_v49 = vor.u32 %v5845_v44, %v4124_v46  ;;  %v5868_v46 = vld [vmem:[%s8882_s9 + $0x34] sm:$0xf0] }
  0xe3   :  { %v4244_v50 = vor.u32 %v5876_v48, %v4243_v47  ;;  %v4275_v47 = vld [vmem:[%s8882_s9 + $0xb0] sm:$0xf] }
  0xe4   :  { %796 = vmatpush.bf16.msra.mxu1 %v4123_v40 }
  0xe6   :  { %805 = vmatpush.bf16.msra.mxu2 %v4095_v55  ;;  %818 = vmatpush.bf16.msra.mxu3 %v4159_v60  ;;  %v5891_v55 = vld [vmem:[%s8882_s9 + $0xf4] sm:$0xf] }
  0xe7   :  { %v4312_v60 = vor.u32 %v5891_v55, %v4309_v56  ;;  %v4203_v55 = vld [vmem:[%s8882_s9 + $0x20] sm:$0xf] }
  0xe8   :  { %1078 = vmatpush.bf16.msrb.mxu1 %v4308_v0  ;;  %v5883_v0 = vld [vmem:[%s8882_s9 + $0xb4] sm:$0xf] }
  0xe9   :  { %4052 = vmatmul.msk.bf16.vlgmr.msrb.gmra.mxu2 %vm429_vm2, %v371_v11  ;;  %4053 = vmatmul.msk.bf16.vlgmr.msrb.gmra.mxu3 %vm429_vm2, %v371_v11  ;;  %v4075_v11 = vor.u32 %v5834_v63, %v4074_v9  ;;  %v4227_v9 = vld [vmem:[%s8882_s9 + $0x50] sm:$0xf]  ;;  %v4280_v56 = vor.u32 %v5883_v0, %v4277_v54 }
  0xea   :  { %806 = vmatpush.bf16.msra.mxu2 %v4087_v4  ;;  %819 = vmatpush.bf16.msra.mxu3 %v4151_v8  ;;  %v4300_v4 = vor.u32 %v5890_v2, %v4299_v58  ;;  %v4301_v8 = vld [vmem:[%s8882_s9 + $0xe8] sm:$0xf0]  ;;  %v4228_v12 = vor.u32 %v5872_v10, %v4227_v9  ;;  %v5881_v2 = vld [vmem:[%s8882_s9 + $0xa4] sm:$0xf]  ;;  %v5880_v9 = vld [vmem:[%s8882_s9 + $0x94] sm:$0xf0] }
  0xeb   :  { %781 = vmatpush.bf16.msra.mxu0 %v4075_v11  ;;  %v4304_v63 = vor.u32 %v5889_v7, %v4301_v8  ;;  %v4291_v11 = vld [vmem:[%s8882_s9 + $0xd0] sm:$0xf]  ;;  %v4272_v7 = vor.u32 %v5881_v2, %v4269_v41  ;;  %v833_v2 = vpop.permute.xlu0 %832 }
  0xec   :  { %1079 = vmatpush.bf16.msrb.mxu1 %v4300_v4  ;;  %v4292_v16 = vor.u32 %v5888_v6, %v4291_v11  ;;  %v4195_v4 = vld [vmem:[%s8882_s9 + $0x10] sm:$0xf]  ;;  %v4197_v6 = vld [vmem:[%s8882_s9 + $0x18] sm:$0xf0] }
  0xed   :  { %v4259_v8 = vld [vmem:[%s8882_s9 + $0x90] sm:$0xf] }
  0xee   :  { %807 = vmatpush.bf16.msra.mxu2 %v4079_v15  ;;  %820 = vmatpush.bf16.msra.mxu3 %v4143_v20  ;;  %v5887_v15 = vld [vmem:[%s8882_s9 + $0xd4] sm:$0xf]  ;;  %v4219_v20 = vld [vmem:[%s8882_s9 + $0x40] sm:$0xf] }
  0xef   :  { %782 = vmatpush.bf16.msra.mxu0 %v4067_v24  ;;  %v4232_v24 = vor.u32 %v5871_v13, %v4229_v14  ;;  %v4220_v35 = vor.u32 %v5870_v21, %v4219_v20  ;;  %v4261_v13 = vld [vmem:[%s8882_s9 + $0x98] sm:$0xf0]  ;;  %v5862_v20 = vld [vmem:[%s8882_s9 + $0x4] sm:$0xf0] }
  0xf0   :  { %1080 = vmatpush.bf16.msrb.mxu1 %v4292_v16  ;;  %v4260_v16 = vor.u32 %v5880_v9, %v4259_v8 }
  0xf2   :  { %808 = vmatpush.bf16.msra.mxu2 %v4071_v30  ;;  %821 = vmatpush.bf16.msra.mxu3 %v4135_v34  ;;  %v4296_v30 = vor.u32 %v5887_v15, %v4293_v17  ;;  %v4187_v17 = vld [vmem:[%s8882_s9] sm:$0xf] }
  0xf3   :  { %783 = vmatpush.bf16.msra.mxu0 %v4059_v38  ;;  %v4284_v38 = vor.u32 %v5886_v27, %v4283_v25  ;;  %v5861_v27 = vld [vmem:[%s8882_s9 + $0x4] sm:$0xf] }
  0xf5   :  { %1081 = vmatpush.bf16.msrb.mxu1 %v4284_v38 }
  0xf6   :  { %809 = vmatpush.bf16.msra.mxu2 %v4063_v45  ;;  %822 = vmatpush.bf16.msra.mxu3 %v4127_v49  ;;  %v4211_v45 = vld [vmem:[%s8882_s9 + $0x30] sm:$0xf]  ;;  %v5884_v49 = vld [vmem:[%s8882_s9 + $0xb4] sm:$0xf0] }
  0xf7   :  { %1065 = vmatpush.bf16.msrb.mxu0 %v4244_v50  ;;  %v4212_v48 = vor.u32 %v5868_v46, %v4211_v45  ;;  %v5867_v50 = vld [vmem:[%s8882_s9 + $0x34] sm:$0xf] }
  0xfa   :  { %1091 = vmatpush.bf16.msrb.mxu2 %v4248_v57  ;;  %1104 = vmatpush.bf16.msrb.mxu3 %v4312_v60  ;;  %v5866_v57 = vld [vmem:[%s8882_s9 + $0x24] sm:$0xf0]  ;;  %v4267_v60 = vld [vmem:[%s8882_s9 + $0xa0] sm:$0xf] }
  0xfb   :  { %1066 = vmatpush.bf16.msrb.mxu0 %v4236_v1  ;;  %v4204_v61 = vor.u32 %v5866_v57, %v4203_v55  ;;  %v4268_v58 = vor.u32 %v5882_v59, %v4267_v60  ;;  %v4205_v1 = vld [vmem:[%s8882_s9 + $0x28] sm:$0xf0] }
  0xfc   :  { %v4208_v3 = vor.u32 %v5865_v62, %v4205_v1  ;;  %v846_v62 = vpop.permute.xlu1 %845 }
  0xfe   :  { %1092 = vmatpush.bf16.msrb.mxu2 %v4240_v5  ;;  %1105 = vmatpush.bf16.msrb.mxu3 %v4304_v63  ;;  %v5864_v5 = vld [vmem:[%s8882_s9 + $0x14] sm:$0xf0]  ;;  %v5863_v63 = vld [vmem:[%s8882_s9 + $0x14] sm:$0xf] }
  0xff   :  { %1067 = vmatpush.bf16.msrb.mxu0 %v4228_v12  ;;  %v4196_v11 = vor.u32 %v5864_v5, %v4195_v4  ;;  %v5879_v12 = vld [vmem:[%s8882_s9 + $0x94] sm:$0xf] }
 0x100   :  { %v4264_v25 = vor.u32 %v5879_v12, %v4261_v13  ;;  %v4406_v13 = vld [vmem:[%s8882_s9 + $0x170] sm:$0xf] }
 0x102   :  { %1093 = vmatpush.bf16.msrb.mxu2 %v4232_v24  ;;  %1106 = vmatpush.bf16.msrb.mxu3 %v4296_v30  ;;  %v5878_v24 = vld [vmem:[%s8882_s9 + $0x84] sm:$0xf0] }
 0x103   :  { %1068 = vmatpush.bf16.msrb.mxu0 %v4220_v35 }
 0x107   :  { %1069 = vmatpush.bf16.msrb.mxu0 %v4212_v48 }
 0x10b   :  { %1070 = vmatpush.bf16.msrb.mxu0 %v4204_v61 }
 0x10f   :  { %1071 = vmatpush.bf16.msrb.mxu0 %v4196_v11 }
 0x15c   :  { %v6708_v18 = vpop.f32.mrf.mxu2  ;;  %v6710_v19 = vpop.f32.mrf.mxu3 }
 0x164   :  { %v444_v39 = vpop.f32.mrf.mxu2  ;;  %v457_v42 = vpop.f32.mrf.mxu3 }
 0x165   :  { %v4276_v39 = vor.u32 %v5884_v49, %v4275_v47  ;;  %v4216_v42 = vor.u32 %v5867_v50, %v4213_v51 }
 0x167   :  { %1082 = vmatpush.bf16.msrb.mxu1 %v4276_v39 }
 0x16b   :  { %1083 = vmatpush.bf16.msrb.mxu1 %v4268_v58 }
 0x16c   :  { %v511_v28 = vpop.f32.mrf.mxu2  ;;  %v524_v29 = vpop.f32.mrf.mxu3 }
 0x16d   :  { %v512_v33 = vadd.f32 %v511_v28, %v6708_v18  ;;  %v525_v34 = vadd.f32 %v524_v29, %v6710_v19  ;;  %v4224_v18 = vor.u32 %v5869_v31, %v4221_v32  ;;  %v4288_v19 = vor.u32 %v5885_v36, %v4285_v37  ;;  %v4189_v29 = vld [vmem:[%s8882_s9 + $0x8] sm:$0xf0]  ;;  %v5877_v31 = vld [vmem:[%s8882_s9 + $0x84] sm:$0xf] }
 0x16e   :  { %v4188_v28 = vor.u32 %v5862_v20, %v4187_v17  ;;  %v4253_v32 = vld [vmem:[%s8882_s9 + $0x88] sm:$0xf0]  ;;  %v4408_v17 = vld [vmem:[%s8882_s9 + $0x178] sm:$0xf0] }
 0x16f   :  { %v6861_v40 = vadd.f32 %v530_v22, %v512_v33  ;;  %v6863_v26 = vadd.f32 %v531_v23, %v525_v34  ;;  %1094 = vmatpush.bf16.msrb.mxu2 %v4224_v18  ;;  %1107 = vmatpush.bf16.msrb.mxu3 %v4288_v19  ;;  %v4200_v22 = vor.u32 %v5863_v63, %v4197_v6  ;;  %v4251_v23 = vld [vmem:[%s8882_s9 + $0x80] sm:$0xf] }
 0x170   :  { %1084 = vmatpush.bf16.msrb.mxu1 %v4260_v16  ;;  %v4252_v30 = vor.u32 %v5878_v24, %v4251_v23  ;;  %v4192_v33 = vor.u32 %v5861_v27, %v4189_v29  ;;  %v4256_v34 = vor.u32 %v5877_v31, %v4253_v32  ;;  %1072 = vmatpush.bf16.msrb.mxu0 %v4188_v28  ;;  %v5906_v23 = vld [vmem:[%s8882_s9 + $0x164] sm:$0xf0]  ;;  %v5905_v24 = vld [vmem:[%s8882_s9 + $0x164] sm:$0xf]  ;;  %v4400_v27 = vld [vmem:[%s8882_s9 + $0x168] sm:$0xf0] }
 0x171   :  { %v4054_v43 = vmul.f32 -1.442695, %v6861_v40  ;;  %v4055_v44 = vmul.f32 -1.442695, %v6863_v26  ;;  %v4403_v28 = vor.u32 %v5905_v24, %v4400_v27  ;;  %v4470_v29 = vld [vmem:[%s8882_s9 + $0x1f0] sm:$0xf] }
 0x172   :  { %v5923_v31 = vld [vmem:[%s8882_s9 + $0x1f4] sm:$0xf] }
 0x173   :  { %6210 = vpow2.f32 %v4054_v43  ;;  %1095 = vmatpush.bf16.msrb.mxu2 %v4216_v42  ;;  %1108 = vmatpush.bf16.msrb.mxu3 %v4280_v56  ;;  %v829_v42 = vld [vmem:[%s8884_s7] ss:$2 sm:$0x3] }
 0x174   :  { %6212 = vpow2.f32 %v4055_v44  ;;  %v513_v52 = vpop.f32.mrf.mxu2  ;;  %v526_v53 = vpop.f32.mrf.mxu3  ;;  %1085 = vmatpush.bf16.msrb.mxu1 %v4252_v30  ;;  %v836_v59 = vperm.slane %v829_v42, 0  ;;  %v837_v1 = vperm.slane %v829_v42, 1  ;;  %v5924_v30 = vld [vmem:[%s8882_s9 + $0x1f4] sm:$0xf0]  ;;  %v5901_v42 = vld [vmem:[%s8882_s9 + $0x144] sm:$0xf] }
 0x175   :  { %v4184_v52 = vld [vmem:[%s8884_s7 + $0x1] ss:$2 sm:$0x3] }
 0x176   :  { %v849_v60 = vperm.slane %v4184_v52, 0  ;;  %v850_v58 = vperm.slane %v4184_v52, 1  ;;  %v840_v4 = vmul.f32 %v836_v59, %v833_v2  ;;  %v5920_v59 = vld [vmem:[%s8882_s9 + $0x1d4] sm:$0xf0] }
 0x177   :  { %1096 = vmatpush.bf16.msrb.mxu2 %v4208_v3  ;;  %1109 = vmatpush.bf16.msrb.mxu3 %v4272_v7 }
 0x178   :  { %v853_v41 = vmul.f32 %v849_v60, %v846_v62  ;;  %v854_v5 = vmul.f32 %v850_v58, %v846_v62  ;;  %v4454_v60 = vld [vmem:[%s8882_s9 + $0x1d0] sm:$0xf]  ;;  %v4456_v62 = vld [vmem:[%s8882_s9 + $0x1d8] sm:$0xf0] }
 0x179   :  { %v6211_v10 = vpop.eup %6210  ;;  %v4455_v58 = vor.u32 %v5920_v59, %v4454_v60  ;;  %v4352_v60 = vld [vmem:[%s8882_s9 + $0x108] sm:$0xf0] }
 0x17a   :  { %v6213_v14 = vpop.eup %6212  ;;  %v542_v15 = vadd.f32 1.0, %v6211_v10  ;;  %v855_v8 = vadd.f32 %v853_v41, %v840_v4  ;;  %v5900_v41 = vld [vmem:[%s8882_s9 + $0x134] sm:$0xf0]  ;;  %v5899_v4 = vld [vmem:[%s8882_s9 + $0x134] sm:$0xf] }
 0x17b   :  { %v543_v21 = vadd.f32 1.0, %v6213_v14  ;;  %1097 = vmatpush.bf16.msrb.mxu2 %v4200_v22  ;;  %1110 = vmatpush.bf16.msrb.mxu3 %v4264_v25  ;;  %v5908_v14 = vld [vmem:[%s8882_s9 + $0x174] sm:$0xf0]  ;;  %v4398_v22 = vld [vmem:[%s8882_s9 + $0x160] sm:$0xf] }
 0x17c   :  { %6214 = vrcp.f32 %v542_v15  ;;  %v555_v19 = vand.u32 2147483648, %v542_v15  ;;  %v553_v45 = vand.u32 2147483647, %v542_v15  ;;  %vm549_vm8 = vweird.f32 %v542_v15 }
 0x17d   :  { %6216 = vrcp.f32 %v543_v21  ;;  %v570_v46 = vand.u32 2147483648, %v543_v21  ;;  %v568_v48 = vand.u32 2147483647, %v543_v21  ;;  %vm564_vm10 = vweird.f32 %v543_v21 }
 0x17e   :  { %v556_v50 = vor.u32 1.1754944e-38, %v555_v19  ;;  %vm554_vm11 = vcmp.eq.f32.partialorder %v553_v45, 8.507059e+37  ;;  %v4407_v16 = vor.u32 %v5908_v14, %v4406_v13  ;;  %v4399_v25 = vor.u32 %v5906_v23, %v4398_v22  ;;  %v4392_v19 = vld [vmem:[%s8882_s9 + $0x158] sm:$0xf0]  ;;  %v4462_v45 = vld [vmem:[%s8882_s9 + $0x1e0] sm:$0xf] }
 0x17f   :  { %1098 = vmatpush.bf16.msrb.mxu2 %v4192_v33  ;;  %1111 = vmatpush.bf16.msrb.mxu3 %v4256_v34  ;;  %v571_v39 = vor.u32 1.1754944e-38, %v570_v46  ;;  %vm569_vm13 = vcmp.eq.f32.partialorder %v568_v48, 8.507059e+37  ;;  %v4471_v33 = vor.u32 %v5924_v30, %v4470_v29  ;;  %v4472_v34 = vld [vmem:[%s8882_s9 + $0x1f8] sm:$0xf0]  ;;  %v5922_v46 = vld [vmem:[%s8882_s9 + $0x1e4] sm:$0xf0] }
 0x180   :  { %v5898_v22 = vld [vmem:[%s8882_s9 + $0x124] sm:$0xf0]  ;;  %v5897_v23 = vld [vmem:[%s8882_s9 + $0x124] sm:$0xf]  ;;  %v5916_v29 = vld [vmem:[%s8882_s9 + $0x1b4] sm:$0xf0] }
 0x181   :  { %v5915_v30 = vld [vmem:[%s8882_s9 + $0x1b4] sm:$0xf] }
 0x182   :  { %v6215_v35 = vpop.eup %6214 }
 0x183   :  { %v6217_v36 = vpop.eup %6216  ;;  %v545_v37 = vmul.f32 %v6215_v35, %v542_v15  ;;  %vm550_vm6 = vweird.f32 %v6215_v35  ;;  %v5907_v15 = vld [vmem:[%s8882_s9 + $0x174] sm:$0xf] }
 0x184   :  { %v560_v38 = vmul.f32 %v6217_v36, %v543_v21  ;;  %vm565_vm7 = vweird.f32 %v6217_v36  ;;  %vm551_vm9 = vmor %vm549_vm8, %vm550_vm6  ;;  %v4411_v20 = vor.u32 %v5907_v15, %v4408_v17  ;;  %v610_v21 = vld [vmem:[%s8886_s6] sm:$0x3]  ;;  %v4448_v17 = vld [vmem:[%s8882_s9 + $0x1c8] sm:$0xf0] }
 0x185   :  { %v546_v18 = vsub.f32 1.0, %v545_v37  ;;  %vm566_vm12 = vmor %vm564_vm10, %vm565_vm7  ;;  %v612_v32 = vperm.slane %v610_v21, 0  ;;  %v5904_v37 = vld [vmem:[%s8882_s9 + $0x154] sm:$0xf0]  ;;  %v7097_v15 = vld [vmem:[%s8887_s10] sm:$0x3] }
 0x186   :  { %v561_v43 = vsub.f32 1.0, %v560_v38  ;;  %v5903_v38 = vld [vmem:[%s8882_s9 + $0x154] sm:$0xf] }
 0x187   :  { %v547_v44 = vmul.f32 %v6215_v35, %v546_v18 }
 0x188   :  { %v562_v47 = vmul.f32 %v6217_v36, %v561_v43 }
 0x189   :  { %v548_v49 = vadd.f32 %v6215_v35, %v547_v44  ;;  %v4395_v44 = vor.u32 %v5903_v38, %v4392_v19  ;;  %v5895_v38 = vld [vmem:[%s8882_s9 + $0x114] sm:$0xf] }
 0x18a   :  { %v563_v51 = vadd.f32 %v6217_v36, %v562_v47  ;;  %v5921_v47 = vld [vmem:[%s8882_s9 + $0x1e4] sm:$0xf] }
 0x18b   :  { %v552_v53 = vsel %vm551_vm9, %v6215_v35, %v548_v49  ;;  %v4475_v35 = vor.u32 %v5923_v31, %v4472_v34  ;;  %v901_v31 = vperm.slane %v7097_v15, 0 }
 0x18c   :  { %v557_v0 = vsel %vm554_vm11, %v556_v50, %v552_v53  ;;  %v567_v54 = vsel %vm566_vm12, %v6217_v36, %v563_v51  ;;  %v4390_v36 = vld [vmem:[%s8882_s9 + $0x150] sm:$0xf]  ;;  %v4463_v50 = vor.u32 %v5922_v46, %v4462_v45  ;;  %v4464_v51 = vld [vmem:[%s8882_s9 + $0x1e8] sm:$0xf0]  ;;  %v4382_v53 = vld [vmem:[%s8882_s9 + $0x140] sm:$0xf] }
 0x18d   :  { %v574_v55 = vmul.f32 %v557_v0, %v6861_v40  ;;  %v572_v56 = vsel %vm569_vm13, %v571_v39, %v567_v54  ;;  %v857_v40 = vld [vmem:[%s8885_s8] sm:$0x3]  ;;  %v4391_v18 = vor.u32 %v5904_v37, %v4390_v36  ;;  %v4467_v52 = vor.u32 %v5921_v47, %v4464_v51  ;;  %v5902_v39 = vld [vmem:[%s8882_s9 + $0x144] sm:$0xf0]  ;;  %v4358_v36 = vld [vmem:[%s8882_s9 + $0x110] sm:$0xf] }
 0x18e   :  { %v575_v57 = vmul.f32 %v572_v56, %v6863_v26  ;;  %v841_v26 = vmul.f32 %v837_v1, %v833_v2  ;;  %v859_v7 = vperm.slane %v857_v40, 0  ;;  %v860_v9 = vperm.slane %v857_v40, 1  ;;  %v4384_v56 = vld [vmem:[%s8882_s9 + $0x148] sm:$0xf0]  ;;  %v5896_v37 = vld [vmem:[%s8882_s9 + $0x114] sm:$0xf0] }
 0x18f   :  { %v576_v61 = vpack.c.bf16 %v574_v55, %v574_v55  ;;  %v613_v54 = vperm.slane %v610_v21, 1  ;;  %v4383_v55 = vor.u32 %v5902_v39, %v4382_v53  ;;  %v4366_v21 = vld [vmem:[%s8882_s9 + $0x120] sm:$0xf]  ;;  %v4359_v19 = vor.u32 %v5896_v37, %v4358_v36  ;;  %v5914_v47 = vld [vmem:[%s8882_s9 + $0x1a4] sm:$0xf0] }
 0x190   :  { %v577_v3 = vpack.c.bf16 %v575_v57, %v575_v57  ;;  %v856_v63 = vadd.f32 %v854_v5, %v841_v26  ;;  %v6974_v10 = vadd.f32 %v859_v7, %v855_v8  ;;  %v4387_v57 = vor.u32 %v5901_v42, %v4384_v56  ;;  %v4376_v7 = vld [vmem:[%s8882_s9 + $0x138] sm:$0xf0]  ;;  %v4430_v46 = vld [vmem:[%s8882_s9 + $0x1a0] sm:$0xf]  ;;  %v5894_v42 = vld [vmem:[%s8882_s9 + $0x104] sm:$0xf0] }
 0x191   :  { %784 = vmatmul.bf16.vlgmr.msra.gmra.mxu0 %v576_v61  ;;  %810 = vmatmul.bf16.vlgmr.msra.gmra.mxu2 %v576_v61  ;;  %v5919_v61 = vld [vmem:[%s8882_s9 + $0x1d4] sm:$0xf]  ;;  %v4367_v24 = vor.u32 %v5898_v22, %v4366_v21  ;;  %v4431_v51 = vor.u32 %v5914_v47, %v4430_v46  ;;  %v4350_v39 = vld [vmem:[%s8882_s9 + $0x100] sm:$0xf]  ;;  %v902_v56 = vperm.slane %v7097_v15, 1 }
 0x192   :  { %797 = vmatmul.bf16.vlgmr.msra.gmra.mxu1 %v577_v3  ;;  %823 = vmatmul.bf16.vlgmr.msra.gmra.mxu3 %v577_v3  ;;  %v6976_v11 = vadd.f32 %v860_v9, %v856_v63  ;;  %v865_v6 = vpack.c.bf16 %v6974_v10, %v6974_v10  ;;  %v4459_v2 = vor.u32 %v5919_v61, %v4456_v62  ;;  %v4374_v3 = vld [vmem:[%s8882_s9 + $0x130] sm:$0xf]  ;;  %v4446_v63 = vld [vmem:[%s8882_s9 + $0x1c0] sm:$0xf]  ;;  %v5911_v62 = vld [vmem:[%s8882_s9 + $0x194] sm:$0xf] }
 0x193   :  { %1359 = vmatpush.bf16.msra.mxu0 %v4407_v16  ;;  %1385 = vmatpush.bf16.msra.mxu2 %v4411_v20  ;;  %v4375_v26 = vor.u32 %v5900_v41, %v4374_v3  ;;  %v4379_v9 = vor.u32 %v5899_v4, %v4376_v7  ;;  %v4422_v61 = vld [vmem:[%s8882_s9 + $0x190] sm:$0xf]  ;;  %v4424_v3 = vld [vmem:[%s8882_s9 + $0x198] sm:$0xf0]  ;;  %v4414_v7 = vld [vmem:[%s8882_s9 + $0x180] sm:$0xf] }
 0x194   :  { %v866_v12 = vpack.c.bf16 %v6976_v11, %v6976_v11  ;;  %1372 = vmatpush.bf16.msra.mxu1 %v4471_v33  ;;  %1398 = vmatpush.bf16.msra.mxu3 %v4475_v35  ;;  %v4440_v33 = vld [vmem:[%s8882_s9 + $0x1b8] sm:$0xf0]  ;;  %v4427_v4 = vor.u32 %v5911_v62, %v4424_v3  ;;  %v4633_v62 = vld [vmem:[%s8882_s9 + $0x2f0] sm:$0xf] }
 0x195   :  { %v4443_v35 = vor.u32 %v5915_v30, %v4440_v33 }
 0x197   :  { %1360 = vmatpush.bf16.msra.mxu0 %v4399_v25  ;;  %1386 = vmatpush.bf16.msra.mxu2 %v4403_v28  ;;  %v4368_v25 = vld [vmem:[%s8882_s9 + $0x128] sm:$0xf0]  ;;  %v4438_v28 = vld [vmem:[%s8882_s9 + $0x1b0] sm:$0xf] }
 0x198   :  { %1373 = vmatpush.bf16.msra.mxu1 %v4463_v50  ;;  %1399 = vmatpush.bf16.msra.mxu3 %v4467_v52  ;;  %v4371_v27 = vor.u32 %v5897_v23, %v4368_v25  ;;  %v4432_v52 = vld [vmem:[%s8882_s9 + $0x1a8] sm:$0xf0] }
 0x19b   :  { %1361 = vmatpush.bf16.msra.mxu0 %v4391_v18  ;;  %1387 = vmatpush.bf16.msra.mxu2 %v4395_v44 }
 0x19c   :  { %1374 = vmatpush.bf16.msra.mxu1 %v4455_v58  ;;  %1400 = vmatpush.bf16.msra.mxu3 %v4459_v2  ;;  %v5912_v58 = vld [vmem:[%s8882_s9 + $0x194] sm:$0xf0] }
 0x19d   :  { %v4423_v2 = vor.u32 %v5912_v58, %v4422_v61  ;;  %v4563_v61 = vld [vmem:[%s8882_s9 + $0x268] sm:$0xf0] }
 0x19f   :  { %1362 = vmatpush.bf16.msra.mxu0 %v4383_v55  ;;  %1388 = vmatpush.bf16.msra.mxu2 %v4387_v57  ;;  %v4351_v57 = vor.u32 %v5894_v42, %v4350_v39  ;;  %v5939_v39 = vld [vmem:[%s8882_s9 + $0x274] sm:$0xf] }
 0x1a1   :  { %1073 = vmatmul.bf16.vlgmr.msrb.gmra.mxu0 %v865_v6  ;;  %1099 = vmatmul.bf16.vlgmr.msrb.gmra.mxu2 %v865_v6  ;;  %v5918_v6 = vld [vmem:[%s8882_s9 + $0x1c4] sm:$0xf0] }
 0x1a2   :  { %1086 = vmatmul.bf16.vlgmr.msrb.gmra.mxu1 %v866_v12  ;;  %1112 = vmatmul.bf16.vlgmr.msrb.gmra.mxu3 %v866_v12  ;;  %v5917_v12 = vld [vmem:[%s8882_s9 + $0x1c4] sm:$0xf]  ;;  %v4447_v16 = vor.u32 %v5918_v6, %v4446_v63 }
 0x1a3   :  { %1363 = vmatpush.bf16.msra.mxu0 %v4375_v26  ;;  %1389 = vmatpush.bf16.msra.mxu2 %v4379_v9  ;;  %v4451_v20 = vor.u32 %v5917_v12, %v4448_v17  ;;  %v5909_v9 = vld [vmem:[%s8882_s9 + $0x184] sm:$0xf] }
 0x1a4   :  { %1375 = vmatpush.bf16.msra.mxu1 %v4447_v16 }
 0x1a5   :  { %1401 = vmatpush.bf16.msra.mxu3 %v4451_v20 }
 0x1a7   :  { %1364 = vmatpush.bf16.msra.mxu0 %v4367_v24  ;;  %1390 = vmatpush.bf16.msra.mxu2 %v4371_v27 }
 0x1a9   :  { %1402 = vmatpush.bf16.msra.mxu3 %v4443_v35 }
 0x1ab   :  { %1365 = vmatpush.bf16.msra.mxu0 %v4359_v19 }
 0x1af   :  { %1366 = vmatpush.bf16.msra.mxu0 %v4351_v57  ;;  %v5938_v57 = vld [vmem:[%s8882_s9 + $0x264] sm:$0xf0] }
 0x20e   :  { %v785_v43 = vpop.f32.mrf.mxu0 }
 0x20f   :  { %v786_v48 = vadd.f32 %v785_v43, %v612_v32  ;;  %v798_v49 = vpop.f32.mrf.mxu1  ;;  %v4439_v32 = vor.u32 %v5916_v29, %v4438_v28  ;;  %v4360_v43 = vld [vmem:[%s8882_s9 + $0x118] sm:$0xf0] }
 0x210   :  { %v4363_v45 = vor.u32 %v5895_v38, %v4360_v43 }
 0x211   :  { %v7054_v0 = vadd.f32 %v798_v49, %v786_v48  ;;  %1376 = vmatpush.bf16.msra.mxu1 %v4439_v32  ;;  %v5913_v48 = vld [vmem:[%s8882_s9 + $0x1a4] sm:$0xf] }
 0x212   :  { %1391 = vmatpush.bf16.msra.mxu2 %v4363_v45  ;;  %v4435_v53 = vor.u32 %v5913_v48, %v4432_v52  ;;  %v4569_v52 = vld [vmem:[%s8882_s9 + $0x270] sm:$0xf] }
 0x214   :  { %v811_v1 = vpop.f32.mrf.mxu2  ;;  %1403 = vmatpush.bf16.msra.mxu3 %v4435_v53  ;;  %v5940_v53 = vld [vmem:[%s8882_s9 + $0x274] sm:$0xf0] }
 0x215   :  { %v812_v5 = vadd.f32 %v811_v1, %v613_v54  ;;  %v824_v40 = vpop.f32.mrf.mxu3  ;;  %v5893_v54 = vld [vmem:[%s8882_s9 + $0x104] sm:$0xf]  ;;  %1377 = vmatpush.bf16.msra.mxu1 %v4431_v51  ;;  %v4570_v42 = vor.u32 %v5940_v53, %v4569_v52 }
 0x216   :  { %v787_v8 = vpop.f32.mrf.mxu0  ;;  %v4355_v59 = vor.u32 %v5893_v54, %v4352_v60  ;;  %v4571_v54 = vld [vmem:[%s8882_s9 + $0x278] sm:$0xf0]  ;;  %v5937_v60 = vld [vmem:[%s8882_s9 + $0x264] sm:$0xf] }
 0x217   :  { %v7092_v13 = vadd.f32 %v824_v40, %v812_v5  ;;  %v800_v14 = vpop.f32.mrf.mxu1  ;;  %v5910_v8 = vld [vmem:[%s8882_s9 + $0x184] sm:$0xf0]  ;;  %1653 = vmatpush.bf16.msrb.mxu0 %v4570_v42  ;;  %v4566_v58 = vor.u32 %v5937_v60, %v4563_v61  ;;  %v5948_v42 = vld [vmem:[%s8882_s9 + $0x2b4] sm:$0xf0] }
 0x218   :  { %1392 = vmatpush.bf16.msra.mxu2 %v4355_v59  ;;  %1404 = vmatpush.bf16.msra.mxu3 %v4427_v4  ;;  %v4415_v12 = vor.u32 %v5910_v8, %v4414_v7  ;;  %v4416_v14 = vld [vmem:[%s8882_s9 + $0x188] sm:$0xf0]  ;;  %v4555_v8 = vld [vmem:[%s8882_s9 + $0x258] sm:$0xf0]  ;;  %v5928_v61 = vld [vmem:[%s8882_s9 + $0x214] sm:$0xf0] }
 0x219   :  { %1378 = vmatpush.bf16.msra.mxu1 %v4423_v2  ;;  %v4419_v15 = vor.u32 %v5909_v9, %v4416_v14  ;;  %v5955_v2 = vld [vmem:[%s8882_s9 + $0x2f4] sm:$0xf] }
 0x21c   :  { %v813_v34 = vpop.f32.mrf.mxu2  ;;  %1405 = vmatpush.bf16.msra.mxu3 %v4419_v15  ;;  %v4627_v15 = vld [vmem:[%s8882_s9 + $0x2e8] sm:$0xf0] }
 0x21d   :  { %v826_v18 = vpop.f32.mrf.mxu3  ;;  %1379 = vmatpush.bf16.msra.mxu1 %v4415_v12  ;;  %v5953_v12 = vld [vmem:[%s8882_s9 + $0x2e4] sm:$0xf] }
 0x21e   :  { %v1074_v44 = vpop.f32.mrf.mxu0 }
 0x21f   :  { %v1075_v49 = vadd.f32 %v1074_v44, %v901_v31  ;;  %v1087_v50 = vpop.f32.mrf.mxu1 }
 0x221   :  { %v1088_v55 = vadd.f32 %v1087_v50, %v1075_v49 }
 0x223   :  { %v4313_v1 = vmul.f32 -1.442695, %v1088_v55 }
 0x224   :  { %v1100_v41 = vpop.f32.mrf.mxu2 }
 0x225   :  { %6218 = vpow2.f32 %v4313_v1  ;;  %v1101_v5 = vadd.f32 %v1100_v41, %v902_v56  ;;  %v1113_v40 = vpop.f32.mrf.mxu3  ;;  %v4561_v56 = vld [vmem:[%s8882_s9 + $0x260] sm:$0xf]  ;;  %v5956_v1 = vld [vmem:[%s8882_s9 + $0x2f4] sm:$0xf0]  ;;  %v4635_v41 = vld [vmem:[%s8882_s9 + $0x2f8] sm:$0xf0] }
 0x226   :  { %v1076_v26 = vpop.f32.mrf.mxu0  ;;  %v4562_v59 = vor.u32 %v5938_v57, %v4561_v56  ;;  %v4634_v3 = vor.u32 %v5956_v1, %v4633_v62  ;;  %v4638_v4 = vor.u32 %v5955_v2, %v4635_v41  ;;  %v4603_v57 = vld [vmem:[%s8882_s9 + $0x2b8] sm:$0xf0]  ;;  %v5946_v41 = vld [vmem:[%s8882_s9 + $0x2a4] sm:$0xf0] }
 0x227   :  { %v1114_v63 = vadd.f32 %v1113_v40, %v1101_v5  ;;  %v1089_v6 = vpop.f32.mrf.mxu1  ;;  %v4553_v5 = vld [vmem:[%s8882_s9 + $0x250] sm:$0xf]  ;;  %v5936_v40 = vld [vmem:[%s8882_s9 + $0x254] sm:$0xf0]  ;;  %v5935_v26 = vld [vmem:[%s8882_s9 + $0x254] sm:$0xf] }
 0x228   :  { %1654 = vmatpush.bf16.msrb.mxu0 %v4562_v59  ;;  %1666 = vmatpush.bf16.msrb.mxu1 %v4634_v3  ;;  %v4554_v7 = vor.u32 %v5936_v40, %v4553_v5  ;;  %v4558_v9 = vor.u32 %v5935_v26, %v4555_v8  ;;  %v5954_v6 = vld [vmem:[%s8882_s9 + $0x2e4] sm:$0xf0]  ;;  %v4521_v59 = vld [vmem:[%s8882_s9 + $0x210] sm:$0xf]  ;;  %v4523_v1 = vld [vmem:[%s8882_s9 + $0x218] sm:$0xf0] }
 0x229   :  { %v4314_v16 = vmul.f32 -1.442695, %v1114_v63  ;;  %1692 = vmatpush.bf16.msrb.mxu3 %v4638_v4  ;;  %v4522_v62 = vor.u32 %v5928_v61, %v4521_v59  ;;  %v4593_v3 = vld [vmem:[%s8882_s9 + $0x2a0] sm:$0xf]  ;;  %v5945_v4 = vld [vmem:[%s8882_s9 + $0x2a4] sm:$0xf] }
 0x22a   :  { %v4594_v40 = vor.u32 %v5946_v41, %v4593_v3  ;;  %v4595_v26 = vld [vmem:[%s8882_s9 + $0x2a8] sm:$0xf0] }
 0x22b   :  { %v6219_v17 = vpop.eup %6218  ;;  %6220 = vpow2.f32 %v4314_v16  ;;  %v4630_v16 = vor.u32 %v5953_v12, %v4627_v15  ;;  %v5925_v12 = vld [vmem:[%s8882_s9 + $0x204] sm:$0xf] }
 0x22c   :  { %v1123_v20 = vadd.f32 1.0, %v6219_v17  ;;  %v1102_v21 = vpop.f32.mrf.mxu2  ;;  %1655 = vmatpush.bf16.msrb.mxu0 %v4554_v7  ;;  %v4545_v17 = vld [vmem:[%s8882_s9 + $0x240] sm:$0xf] }
 0x22d   :  { %v1115_v22 = vpop.f32.mrf.mxu3  ;;  %v5933_v21 = vld [vmem:[%s8882_s9 + $0x244] sm:$0xf]  ;;  %1693 = vmatpush.bf16.msrb.mxu3 %v4630_v16 }
 0x22e   :  { %6222 = vrcp.f32 %v1123_v20  ;;  %v1136_v29 = vand.u32 2147483648, %v1123_v20  ;;  %v1134_v31 = vand.u32 2147483647, %v1123_v20  ;;  %vm1130_vm15 = vweird.f32 %v1123_v20 }
 0x230   :  { %v1137_v35 = vor.u32 1.1754944e-38, %v1136_v29  ;;  %vm1135_vm1 = vcmp.eq.f32.partialorder %v1134_v31, 8.507059e+37 }
 0x231   :  { %v6221_v23 = vpop.eup %6220 }
 0x232   :  { %v1124_v24 = vadd.f32 1.0, %v6221_v23  ;;  %v4547_v23 = vld [vmem:[%s8882_s9 + $0x248] sm:$0xf0] }
 0x234   :  { %v6223_v25 = vpop.eup %6222  ;;  %6224 = vrcp.f32 %v1124_v24  ;;  %v1151_v18 = vand.u32 2147483648, %v1124_v24  ;;  %v1149_v44 = vand.u32 2147483647, %v1124_v24  ;;  %vm1145_vm3 = vweird.f32 %v1124_v24 }
 0x235   :  { %v1126_v27 = vmul.f32 %v6223_v25, %v1123_v20  ;;  %vm1131_vm14 = vweird.f32 %v6223_v25  ;;  %v5934_v20 = vld [vmem:[%s8882_s9 + $0x244] sm:$0xf0] }
 0x236   :  { %vm1132_vm0 = vmor %vm1130_vm15, %vm1131_vm14  ;;  %v1152_v47 = vor.u32 1.1754944e-38, %v1151_v18  ;;  %vm1150_vm5 = vcmp.eq.f32.partialorder %v1149_v44, 8.507059e+37  ;;  %v4546_v22 = vor.u32 %v5934_v20, %v4545_v17  ;;  %v5950_v18 = vld [vmem:[%s8882_s9 + $0x2c4] sm:$0xf0]  ;;  %v4515_v17 = vld [vmem:[%s8882_s9 + $0x208] sm:$0xf0] }
 0x237   :  { %v1127_v28 = vsub.f32 1.0, %v1126_v27  ;;  %v5952_v27 = vld [vmem:[%s8882_s9 + $0x2d4] sm:$0xf0] }
 0x238   :  { %1656 = vmatpush.bf16.msrb.mxu0 %v4546_v22  ;;  %v4585_v22 = vld [vmem:[%s8882_s9 + $0x290] sm:$0xf] }
 0x239   :  { %v1128_v30 = vmul.f32 %v6223_v25, %v1127_v28  ;;  %v5951_v28 = vld [vmem:[%s8882_s9 + $0x2d4] sm:$0xf] }
 0x23a   :  { %v6225_v32 = vpop.eup %6224 }
 0x23b   :  { %v1129_v33 = vadd.f32 %v6223_v25, %v1128_v30  ;;  %v1141_v34 = vmul.f32 %v6225_v32, %v1124_v24  ;;  %vm1146_vm2 = vweird.f32 %v6225_v32  ;;  %v4550_v24 = vor.u32 %v5933_v21, %v4547_v23  ;;  %v4619_v30 = vld [vmem:[%s8882_s9 + $0x2d8] sm:$0xf0]  ;;  %v5944_v23 = vld [vmem:[%s8882_s9 + $0x294] sm:$0xf0] }
 0x23c   :  { %vm1147_vm4 = vmor %vm1145_vm3, %vm1146_vm2  ;;  %v4622_v31 = vor.u32 %v5951_v28, %v4619_v30  ;;  %v4518_v21 = vor.u32 %v5925_v12, %v4515_v17  ;;  %v4587_v28 = vld [vmem:[%s8882_s9 + $0x298] sm:$0xf0] }
 0x23d   :  { %v1133_v36 = vsel %vm1132_vm0, %v6223_v25, %v1129_v33  ;;  %v1142_v37 = vsub.f32 1.0, %v1141_v34  ;;  %v4617_v25 = vld [vmem:[%s8882_s9 + $0x2d0] sm:$0xf]  ;;  %v5932_v33 = vld [vmem:[%s8882_s9 + $0x234] sm:$0xf0] }
 0x23e   :  { %v1138_v38 = vsel %vm1135_vm1, %v1137_v35, %v1133_v36  ;;  %v4618_v29 = vor.u32 %v5952_v27, %v4617_v25  ;;  %v5931_v34 = vld [vmem:[%s8882_s9 + $0x234] sm:$0xf]  ;;  %v4539_v36 = vld [vmem:[%s8882_s9 + $0x238] sm:$0xf0]  ;;  %1694 = vmatpush.bf16.msrb.mxu3 %v4622_v31  ;;  %v4586_v27 = vor.u32 %v5944_v23, %v4585_v22  ;;  %v4796_v22 = vld [vmem:[%s8882_s9 + $0x3f0] sm:$0xf] }
 0x23f   :  { %v1155_v19 = vmul.f32 %v1138_v38, %v1088_v55  ;;  %v1143_v43 = vmul.f32 %v6225_v32, %v1142_v37  ;;  %v4574_v55 = vor.u32 %v5939_v39, %v4571_v54  ;;  %v4542_v37 = vor.u32 %v5931_v34, %v4539_v36  ;;  %v4609_v38 = vld [vmem:[%s8882_s9 + $0x2c0] sm:$0xf]  ;;  %v4601_v39 = vld [vmem:[%s8882_s9 + $0x2b0] sm:$0xf]  ;;  %v5947_v54 = vld [vmem:[%s8882_s9 + $0x2b4] sm:$0xf] }
 0x240   :  { %v4610_v44 = vor.u32 %v5950_v18, %v4609_v38  ;;  %v4602_v56 = vor.u32 %v5948_v42, %v4601_v39  ;;  %v4606_v60 = vor.u32 %v5947_v54, %v4603_v57  ;;  %v5941_v34 = vld [vmem:[%s8882_s9 + $0x284] sm:$0xf]  ;;  %v5988_v23 = vld [vmem:[%s8882_s9 + $0x3f4] sm:$0xf0] }
 0x241   :  { %v1157_v45 = vpack.c.bf16 %v1155_v19, %v1155_v19  ;;  %v1144_v46 = vadd.f32 %v6225_v32, %v1143_v43  ;;  %1679 = vmatpush.bf16.msrb.mxu2 %v4574_v55  ;;  %v5949_v19 = vld [vmem:[%s8882_s9 + $0x2c4] sm:$0xf]  ;;  %v7296_v43 = vld [vmem:[%s8887_s10 + $0x2] sm:$0x3] }
 0x242   :  { %v1195_v55 = vperm.slane %v7296_v43, 0  ;;  %v1196_v15 = vperm.slane %v7296_v43, 1 }
 0x243   :  { %v1148_v48 = vsel %vm1147_vm4, %v6225_v32, %v1144_v46  ;;  %1367 = vmatmul.bf16.vlgmr.msra.gmra.mxu0 %v1157_v45  ;;  %1393 = vmatmul.bf16.vlgmr.msra.gmra.mxu2 %v1157_v45  ;;  %v4537_v32 = vld [vmem:[%s8882_s9 + $0x230] sm:$0xf]  ;;  %v4611_v45 = vld [vmem:[%s8882_s9 + $0x2c8] sm:$0xf0] }
 0x244   :  { %v1153_v49 = vsel %vm1150_vm5, %v1152_v47, %v1148_v48  ;;  %v4538_v35 = vor.u32 %v5932_v33, %v4537_v32  ;;  %v4614_v46 = vor.u32 %v5949_v19, %v4611_v45  ;;  %v4529_v47 = vld [vmem:[%s8882_s9 + $0x220] sm:$0xf]  ;;  %v5930_v48 = vld [vmem:[%s8882_s9 + $0x224] sm:$0xf0] }
 0x245   :  { %v1156_v50 = vmul.f32 %v1153_v49, %v1114_v63  ;;  %1680 = vmatpush.bf16.msrb.mxu2 %v4566_v58  ;;  %v4625_v63 = vld [vmem:[%s8882_s9 + $0x2e0] sm:$0xf]  ;;  %v5929_v49 = vld [vmem:[%s8882_s9 + $0x224] sm:$0xf]  ;;  %v5927_v58 = vld [vmem:[%s8882_s9 + $0x214] sm:$0xf] }
 0x246   :  { %v4626_v14 = vor.u32 %v5954_v6, %v4625_v63  ;;  %1657 = vmatpush.bf16.msrb.mxu0 %v4538_v35  ;;  %1695 = vmatpush.bf16.msrb.mxu3 %v4614_v46  ;;  %v4526_v2 = vor.u32 %v5927_v58, %v4523_v1  ;;  %v4513_v63 = vld [vmem:[%s8882_s9 + $0x200] sm:$0xf]  ;;  %v5926_v6 = vld [vmem:[%s8882_s9 + $0x204] sm:$0xf0] }
 0x247   :  { %v1158_v51 = vpack.c.bf16 %v1156_v50, %v1156_v50  ;;  %v4530_v50 = vor.u32 %v5930_v48, %v4529_v47  ;;  %v4514_v16 = vor.u32 %v5926_v6, %v4513_v63  ;;  %v4577_v32 = vld [vmem:[%s8882_s9 + $0x280] sm:$0xf]  ;;  %v5942_v33 = vld [vmem:[%s8882_s9 + $0x284] sm:$0xf0]  ;;  %v4734_v6 = vld [vmem:[%s8882_s9 + $0x378] sm:$0xf0] }
 0x248   :  { %1667 = vmatpush.bf16.msrb.mxu1 %v4626_v14  ;;  %v4578_v36 = vor.u32 %v5942_v33, %v4577_v32  ;;  %v4718_v33 = vld [vmem:[%s8882_s9 + $0x358] sm:$0xf0] }
 0x249   :  { %1380 = vmatmul.bf16.vlgmr.msra.gmra.mxu1 %v1158_v51  ;;  %1406 = vmatmul.bf16.vlgmr.msra.gmra.mxu3 %v1158_v51  ;;  %v4531_v51 = vld [vmem:[%s8882_s9 + $0x228] sm:$0xf0] }
 0x24a   :  { %1681 = vmatpush.bf16.msrb.mxu2 %v4558_v9  ;;  %v4534_v53 = vor.u32 %v5929_v49, %v4531_v51  ;;  %1658 = vmatpush.bf16.msrb.mxu0 %v4530_v50  ;;  %v4598_v9 = vor.u32 %v5945_v4, %v4595_v26 }
 0x24b   :  { %1696 = vmatpush.bf16.msrb.mxu3 %v4606_v60 }
 0x24c   :  { %1668 = vmatpush.bf16.msrb.mxu1 %v4618_v29 }
 0x24e   :  { %1682 = vmatpush.bf16.msrb.mxu2 %v4550_v24  ;;  %1659 = vmatpush.bf16.msrb.mxu0 %v4522_v62  ;;  %v5943_v24 = vld [vmem:[%s8882_s9 + $0x294] sm:$0xf] }
 0x24f   :  { %1697 = vmatpush.bf16.msrb.mxu3 %v4598_v9  ;;  %v4590_v29 = vor.u32 %v5943_v24, %v4587_v28  ;;  %v5971_v9 = vld [vmem:[%s8882_s9 + $0x374] sm:$0xf] }
 0x250   :  { %1669 = vmatpush.bf16.msrb.mxu1 %v4610_v44  ;;  %v4737_v12 = vor.u32 %v5971_v9, %v4734_v6  ;;  %v5987_v24 = vld [vmem:[%s8882_s9 + $0x3f4] sm:$0xf]  ;;  %v5980_v6 = vld [vmem:[%s8882_s9 + $0x3b4] sm:$0xf0] }
 0x252   :  { %1683 = vmatpush.bf16.msrb.mxu2 %v4542_v37  ;;  %1660 = vmatpush.bf16.msrb.mxu0 %v4514_v16  ;;  %v4579_v37 = vld [vmem:[%s8882_s9 + $0x288] sm:$0xf0]  ;;  %v5969_v16 = vld [vmem:[%s8882_s9 + $0x364] sm:$0xf] }
 0x253   :  { %1698 = vmatpush.bf16.msrb.mxu3 %v4590_v29  ;;  %v4582_v19 = vor.u32 %v5941_v34, %v4579_v37  ;;  %v4716_v29 = vld [vmem:[%s8882_s9 + $0x350] sm:$0xf]  ;;  %v5985_v37 = vld [vmem:[%s8882_s9 + $0x3e4] sm:$0xf] }
 0x254   :  { %1670 = vmatpush.bf16.msrb.mxu1 %v4602_v56 }
 0x256   :  { %1684 = vmatpush.bf16.msrb.mxu2 %v4534_v53 }
 0x257   :  { %1699 = vmatpush.bf16.msrb.mxu3 %v4582_v19 }
 0x258   :  { %1671 = vmatpush.bf16.msrb.mxu1 %v4594_v40 }
 0x25a   :  { %1685 = vmatpush.bf16.msrb.mxu2 %v4526_v2 }
 0x25c   :  { %1672 = vmatpush.bf16.msrb.mxu1 %v4586_v27  ;;  %v4798_v27 = vld [vmem:[%s8882_s9 + $0x3f8] sm:$0xf0] }
 0x25d   :  { %v4801_v28 = vor.u32 %v5987_v24, %v4798_v27  ;;  %v5959_v24 = vld [vmem:[%s8882_s9 + $0x314] sm:$0xf] }
 0x25e   :  { %1686 = vmatpush.bf16.msrb.mxu2 %v4518_v21 }
 0x25f   :  { %1990 = vmatpush.bf16.msra.mxu3 %v4801_v28 }
 0x260   :  { %1673 = vmatpush.bf16.msrb.mxu1 %v4578_v36  ;;  %v5986_v36 = vld [vmem:[%s8882_s9 + $0x3e4] sm:$0xf0] }
 0x262   :  { %1977 = vmatpush.bf16.msra.mxu2 %v4737_v12  ;;  %v5979_v12 = vld [vmem:[%s8882_s9 + $0x3b4] sm:$0xf] }
 0x2c0   :  { %v1368_v52 = vpop.f32.mrf.mxu0 }
 0x2c1   :  { %v1369_v5 = vadd.f32 %v1368_v52, %v1195_v55 }
 0x2c6   :  { %v1381_v7 = vpop.f32.mrf.mxu1  ;;  %v1394_v8 = vpop.f32.mrf.mxu2 }
 0x2c7   :  { %v1382_v14 = vadd.f32 %v1381_v7, %v1369_v5  ;;  %v1395_v30 = vadd.f32 %v1394_v8, %v1196_v15  ;;  %v4732_v7 = vld [vmem:[%s8882_s9 + $0x370] sm:$0xf]  ;;  %v5972_v8 = vld [vmem:[%s8882_s9 + $0x374] sm:$0xf0]  ;;  %v5970_v15 = vld [vmem:[%s8882_s9 + $0x364] sm:$0xf0] }
 0x2c8   :  { %v1370_v20 = vpop.f32.mrf.mxu0  ;;  %v4733_v63 = vor.u32 %v5972_v8, %v4732_v7  ;;  %v4694_v8 = vld [vmem:[%s8882_s9 + $0x328] sm:$0xf0] }
 0x2c9   :  { %v4476_v25 = vmul.f32 -1.442695, %v1382_v14  ;;  %v4726_v20 = vld [vmem:[%s8882_s9 + $0x368] sm:$0xf0] }
 0x2ca   :  { %1951 = vmatpush.bf16.msra.mxu0 %v4733_v63  ;;  %v4729_v21 = vor.u32 %v5969_v16, %v4726_v20  ;;  %v4764_v63 = vld [vmem:[%s8882_s9 + $0x3b0] sm:$0xf]  ;;  %v4766_v16 = vld [vmem:[%s8882_s9 + $0x3b8] sm:$0xf0] }
 0x2cb   :  { %6226 = vpow2.f32 %v4476_v25  ;;  %v4797_v25 = vor.u32 %v5988_v23, %v4796_v22  ;;  %v4684_v22 = vld [vmem:[%s8882_s9 + $0x310] sm:$0xf]  ;;  %v5960_v23 = vld [vmem:[%s8882_s9 + $0x314] sm:$0xf0] }
 0x2cc   :  { %v1407_v31 = vpop.f32.mrf.mxu3  ;;  %1978 = vmatpush.bf16.msra.mxu2 %v4729_v21  ;;  %v4769_v21 = vor.u32 %v5979_v12, %v4766_v16  ;;  %v4685_v28 = vor.u32 %v5960_v23, %v4684_v22 }
 0x2cd   :  { %v1408_v35 = vadd.f32 %v1407_v31, %v1395_v30  ;;  %v5968_v30 = vld [vmem:[%s8882_s9 + $0x354] sm:$0xf0]  ;;  %v5967_v31 = vld [vmem:[%s8882_s9 + $0x354] sm:$0xf]  ;;  %1964 = vmatpush.bf16.msra.mxu1 %v4797_v25 }
 0x2ce   :  { %v1383_v38 = vpop.f32.mrf.mxu1  ;;  %v1396_v18 = vpop.f32.mrf.mxu2  ;;  %v4717_v32 = vor.u32 %v5968_v30, %v4716_v29  ;;  %v4721_v34 = vor.u32 %v5967_v31, %v4718_v33  ;;  %v4686_v29 = vld [vmem:[%s8882_s9 + $0x318] sm:$0xf0]  ;;  %v5978_v33 = vld [vmem:[%s8882_s9 + $0x3a4] sm:$0xf0] }
 0x2cf   :  { %v4477_v43 = vmul.f32 -1.442695, %v1408_v35  ;;  %v4790_v18 = vld [vmem:[%s8882_s9 + $0x3e8] sm:$0xf0]  ;;  %v4689_v31 = vor.u32 %v5959_v24, %v4686_v29 }
 0x2d0   :  { %1979 = vmatpush.bf16.msra.mxu2 %v4721_v34  ;;  %v4793_v19 = vor.u32 %v5985_v37, %v4790_v18  ;;  %v5977_v34 = vld [vmem:[%s8882_s9 + $0x3a4] sm:$0xf]  ;;  %v4758_v37 = vld [vmem:[%s8882_s9 + $0x3a8] sm:$0xf0]  ;;  %v4676_v18 = vld [vmem:[%s8882_s9 + $0x300] sm:$0xf] }
 0x2d1   :  { %v6227_v44 = vpop.eup %6226  ;;  %6228 = vpow2.f32 %v4477_v43  ;;  %v4708_v43 = vld [vmem:[%s8882_s9 + $0x340] sm:$0xf] }
 0x2d2   :  { %v1417_v45 = vadd.f32 1.0, %v6227_v44  ;;  %v5966_v44 = vld [vmem:[%s8882_s9 + $0x344] sm:$0xf0]  ;;  %1991 = vmatpush.bf16.msra.mxu3 %v4793_v19 }
 0x2d3   :  { %v5958_v19 = vld [vmem:[%s8882_s9 + $0x304] sm:$0xf0] }
 0x2d4   :  { %6230 = vrcp.f32 %v1417_v45  ;;  %v1409_v46 = vpop.f32.mrf.mxu3  ;;  %v1430_v52 = vand.u32 2147483648, %v1417_v45  ;;  %v1428_v39 = vand.u32 2147483647, %v1417_v45  ;;  %vm1424_vm7 = vweird.f32 %v1417_v45 }
 0x2d5   :  { %v4709_v46 = vor.u32 %v5966_v44, %v4708_v43  ;;  %v5957_v43 = vld [vmem:[%s8882_s9 + $0x304] sm:$0xf] }
 0x2d6   :  { %v1431_v56 = vor.u32 1.1754944e-38, %v1430_v52  ;;  %vm1429_vm9 = vcmp.eq.f32.partialorder %v1428_v39, 8.507059e+37  ;;  %v7471_v52 = vld [vmem:[%s8887_s10 + $0x4] sm:$0x3]  ;;  %v4782_v39 = vld [vmem:[%s8882_s9 + $0x3d8] sm:$0xf0] }
 0x2d7   :  { %v6229_v47 = vpop.eup %6228  ;;  %v1490_v27 = vperm.slane %v7471_v52, 1 }
 0x2d8   :  { %v1418_v48 = vadd.f32 1.0, %v6229_v47  ;;  %v4710_v47 = vld [vmem:[%s8882_s9 + $0x348] sm:$0xf0] }
 0x2da   :  { %v6231_v49 = vpop.eup %6230  ;;  %6232 = vrcp.f32 %v1418_v48  ;;  %v1445_v61 = vand.u32 2147483648, %v1418_v48  ;;  %v1443_v1 = vand.u32 2147483647, %v1418_v48  ;;  %vm1439_vm11 = vweird.f32 %v1418_v48 }
 0x2db   :  { %v1420_v50 = vmul.f32 %v6231_v49, %v1417_v45  ;;  %vm1425_vm6 = vweird.f32 %v6231_v49  ;;  %v5965_v45 = vld [vmem:[%s8882_s9 + $0x344] sm:$0xf] }
 0x2dc   :  { %vm1426_vm8 = vmor %vm1424_vm7, %vm1425_vm6  ;;  %v1446_v41 = vor.u32 1.1754944e-38, %v1445_v61  ;;  %vm1444_vm13 = vcmp.eq.f32.partialorder %v1443_v1, 8.507059e+37  ;;  %v5981_v1 = vld [vmem:[%s8882_s9 + $0x3c4] sm:$0xf] }
 0x2dd   :  { %v1421_v51 = vsub.f32 1.0, %v1420_v50  ;;  %v5984_v50 = vld [vmem:[%s8882_s9 + $0x3d4] sm:$0xf0] }
 0x2df   :  { %v1422_v53 = vmul.f32 %v6231_v49, %v1421_v51  ;;  %v5983_v51 = vld [vmem:[%s8882_s9 + $0x3d4] sm:$0xf] }
 0x2e0   :  { %v6233_v42 = vpop.eup %6232 }
 0x2e1   :  { %v1423_v54 = vadd.f32 %v6231_v49, %v1422_v53  ;;  %v1435_v55 = vmul.f32 %v6233_v42, %v1418_v48  ;;  %vm1440_vm10 = vweird.f32 %v6233_v42  ;;  %v4713_v48 = vor.u32 %v5965_v45, %v4710_v47 }
 0x2e2   :  { %vm1441_vm12 = vmor %vm1439_vm11, %vm1440_vm10  ;;  %v4677_v45 = vor.u32 %v5958_v19, %v4676_v18  ;;  %v4887_v19 = vld [vmem:[%s8882_s9 + $0x460] sm:$0xf] }
 0x2e3   :  { %v1427_v57 = vsel %vm1426_vm8, %v6231_v49, %v1423_v54  ;;  %v1436_v60 = vsub.f32 1.0, %v1435_v55  ;;  %v4780_v49 = vld [vmem:[%s8882_s9 + $0x3d0] sm:$0xf]  ;;  %1980 = vmatpush.bf16.msra.mxu2 %v4713_v48  ;;  %v5964_v55 = vld [vmem:[%s8882_s9 + $0x334] sm:$0xf0] }
 0x2e4   :  { %v1432_v59 = vsel %vm1429_vm9, %v1431_v56, %v1427_v57  ;;  %v4781_v53 = vor.u32 %v5984_v50, %v4780_v49  ;;  %v4700_v54 = vld [vmem:[%s8882_s9 + $0x330] sm:$0xf]  ;;  %v5963_v56 = vld [vmem:[%s8882_s9 + $0x334] sm:$0xf]  ;;  %v5976_v50 = vld [vmem:[%s8882_s9 + $0x394] sm:$0xf0] }
 0x2e5   :  { %v1449_v58 = vmul.f32 %v1432_v59, %v1382_v14  ;;  %v1437_v62 = vmul.f32 %v6233_v42, %v1436_v60  ;;  %v4724_v14 = vld [vmem:[%s8882_s9 + $0x360] sm:$0xf]  ;;  %v4701_v57 = vor.u32 %v5964_v55, %v4700_v54  ;;  %v4702_v60 = vld [vmem:[%s8882_s9 + $0x338] sm:$0xf0]  ;;  %v4748_v49 = vld [vmem:[%s8882_s9 + $0x390] sm:$0xf] }
 0x2e6   :  { %v4725_v17 = vor.u32 %v5970_v15, %v4724_v14  ;;  %v4705_v61 = vor.u32 %v5963_v56, %v4702_v60  ;;  %v4765_v15 = vor.u32 %v5980_v6, %v4764_v63  ;;  %v5974_v60 = vld [vmem:[%s8882_s9 + $0x384] sm:$0xf0] }
 0x2e7   :  { %v1451_v2 = vpack.c.bf16 %v1449_v58, %v1449_v58  ;;  %v1438_v3 = vadd.f32 %v6233_v42, %v1437_v62  ;;  %v4772_v58 = vld [vmem:[%s8882_s9 + $0x3c0] sm:$0xf]  ;;  %v5982_v62 = vld [vmem:[%s8882_s9 + $0x3c4] sm:$0xf0] }
 0x2e8   :  { %1952 = vmatpush.bf16.msra.mxu0 %v4725_v17  ;;  %1981 = vmatpush.bf16.msra.mxu2 %v4705_v61 }
 0x2e9   :  { %v1442_v4 = vsel %vm1441_vm12, %v6233_v42, %v1438_v3  ;;  %1661 = vmatmul.bf16.vlgmr.msrb.gmra.mxu0 %v1451_v2  ;;  %1687 = vmatmul.bf16.vlgmr.msrb.gmra.mxu2 %v1451_v2  ;;  %v4785_v42 = vor.u32 %v5983_v51, %v4782_v39  ;;  %v1489_v2 = vperm.slane %v7471_v52, 0  ;;  %v4773_v3 = vor.u32 %v5982_v62, %v4772_v58  ;;  %v5975_v51 = vld [vmem:[%s8882_s9 + $0x394] sm:$0xf]  ;;  %v4750_v39 = vld [vmem:[%s8882_s9 + $0x398] sm:$0xf0] }
 0x2ea   :  { %v1447_v5 = vsel %vm1444_vm13, %v1446_v41, %v1442_v4  ;;  %v4774_v41 = vld [vmem:[%s8882_s9 + $0x3c8] sm:$0xf0]  ;;  %v4753_v55 = vor.u32 %v5975_v51, %v4750_v39  ;;  %v4879_v39 = vld [vmem:[%s8882_s9 + $0x450] sm:$0xf] }
 0x2eb   :  { %v1450_v40 = vmul.f32 %v1447_v5, %v1408_v35  ;;  %v4788_v35 = vld [vmem:[%s8882_s9 + $0x3e0] sm:$0xf]  ;;  %1992 = vmatpush.bf16.msra.mxu3 %v4785_v42  ;;  %v4777_v4 = vor.u32 %v5981_v1, %v4774_v41  ;;  %v4742_v62 = vld [vmem:[%s8882_s9 + $0x388] sm:$0xf0] }
 0x2ec   :  { %1953 = vmatpush.bf16.msra.mxu0 %v4717_v32  ;;  %v4789_v38 = vor.u32 %v5986_v36, %v4788_v35  ;;  %v4692_v5 = vld [vmem:[%s8882_s9 + $0x320] sm:$0xf] }
 0x2ed   :  { %v1452_v26 = vpack.c.bf16 %v1450_v40, %v1450_v40  ;;  %v5962_v40 = vld [vmem:[%s8882_s9 + $0x324] sm:$0xf0]  ;;  %v4756_v32 = vld [vmem:[%s8882_s9 + $0x3a0] sm:$0xf] }
 0x2ee   :  { %1965 = vmatpush.bf16.msra.mxu1 %v4789_v38  ;;  %v4693_v7 = vor.u32 %v5962_v40, %v4692_v5  ;;  %v4757_v36 = vor.u32 %v5978_v33, %v4756_v32  ;;  %v4761_v38 = vor.u32 %v5977_v34, %v4758_v37 }
 0x2ef   :  { %1674 = vmatmul.bf16.vlgmr.msrb.gmra.mxu1 %v1452_v26  ;;  %1700 = vmatmul.bf16.vlgmr.msrb.gmra.mxu3 %v1452_v26  ;;  %v5961_v26 = vld [vmem:[%s8882_s9 + $0x324] sm:$0xf] }
 0x2f0   :  { %1954 = vmatpush.bf16.msra.mxu0 %v4709_v46  ;;  %1993 = vmatpush.bf16.msra.mxu3 %v4777_v4  ;;  %v4697_v9 = vor.u32 %v5961_v26, %v4694_v8  ;;  %v4678_v46 = vld [vmem:[%s8882_s9 + $0x308] sm:$0xf0] }
 0x2f1   :  { %v4681_v48 = vor.u32 %v5957_v43, %v4678_v46  ;;  %v6002_v43 = vld [vmem:[%s8882_s9 + $0x464] sm:$0xf0]  ;;  %v4889_v46 = vld [vmem:[%s8882_s9 + $0x468] sm:$0xf0] }
 0x2f2   :  { %1966 = vmatpush.bf16.msra.mxu1 %v4781_v53  ;;  %1982 = vmatpush.bf16.msra.mxu2 %v4697_v9  ;;  %v4749_v53 = vor.u32 %v5976_v50, %v4748_v49  ;;  %v6020_v49 = vld [vmem:[%s8882_s9 + $0x4f4] sm:$0xf0]  ;;  %v6019_v50 = vld [vmem:[%s8882_s9 + $0x4f4] sm:$0xf] }
 0x2f4   :  { %1955 = vmatpush.bf16.msra.mxu0 %v4701_v57  ;;  %1994 = vmatpush.bf16.msra.mxu3 %v4769_v21  ;;  %v4740_v57 = vld [vmem:[%s8882_s9 + $0x380] sm:$0xf] }
 0x2f5   :  { %v4741_v58 = vor.u32 %v5974_v60, %v4740_v57  ;;  %v4951_v60 = vld [vmem:[%s8882_s9 + $0x4e0] sm:$0xf] }
 0x2f6   :  { %1967 = vmatpush.bf16.msra.mxu1 %v4773_v3  ;;  %1983 = vmatpush.bf16.msra.mxu2 %v4689_v31 }
 0x2f8   :  { %1956 = vmatpush.bf16.msra.mxu0 %v4693_v7  ;;  %1995 = vmatpush.bf16.msra.mxu3 %v4761_v38  ;;  %v4897_v38 = vld [vmem:[%s8882_s9 + $0x478] sm:$0xf0] }
 0x2fa   :  { %1968 = vmatpush.bf16.msra.mxu1 %v4765_v15  ;;  %1984 = vmatpush.bf16.msra.mxu2 %v4681_v48  ;;  %v4959_v48 = vld [vmem:[%s8882_s9 + $0x4f0] sm:$0xf] }
 0x2fb   :  { %v4960_v51 = vor.u32 %v6020_v49, %v4959_v48  ;;  %v4849_v49 = vld [vmem:[%s8882_s9 + $0x418] sm:$0xf0] }
 0x2fc   :  { %1957 = vmatpush.bf16.msra.mxu0 %v4685_v28  ;;  %1996 = vmatpush.bf16.msra.mxu3 %v4753_v55 }
 0x2fe   :  { %1969 = vmatpush.bf16.msra.mxu1 %v4757_v36  ;;  %v6004_v36 = vld [vmem:[%s8882_s9 + $0x474] sm:$0xf0] }
 0x300   :  { %1958 = vmatpush.bf16.msra.mxu0 %v4677_v45  ;;  %v4888_v45 = vor.u32 %v6002_v43, %v4887_v19  ;;  %v4929_v43 = vld [vmem:[%s8882_s9 + $0x4b8] sm:$0xf0] }
 0x302   :  { %1970 = vmatpush.bf16.msra.mxu1 %v4749_v53 }
 0x306   :  { %1971 = vmatpush.bf16.msra.mxu1 %v4741_v58 }
 0x30a   :  { %2258 = vmatpush.bf16.msrb.mxu1 %v4960_v51  ;;  %v4919_v51 = vld [vmem:[%s8882_s9 + $0x4a0] sm:$0xf] }
 0x366   :  { %v1662_v59 = vpop.f32.mrf.mxu0 }
 0x367   :  { %v1663_v14 = vadd.f32 %v1662_v59, %v1489_v2  ;;  %v5973_v59 = vld [vmem:[%s8882_s9 + $0x384] sm:$0xf] }
 0x368   :  { %v4745_v2 = vor.u32 %v5973_v59, %v4742_v62  ;;  %v6018_v59 = vld [vmem:[%s8882_s9 + $0x4e4] sm:$0xf0]  ;;  %v4953_v62 = vld [vmem:[%s8882_s9 + $0x4e8] sm:$0xf0] }
 0x369   :  { %v4952_v58 = vor.u32 %v6018_v59, %v4951_v60  ;;  %v4839_v60 = vld [vmem:[%s8882_s9 + $0x400] sm:$0xf]  ;;  %v5990_v59 = vld [vmem:[%s8882_s9 + $0x404] sm:$0xf0] }
 0x36a   :  { %1997 = vmatpush.bf16.msra.mxu3 %v4745_v2  ;;  %v4871_v2 = vld [vmem:[%s8882_s9 + $0x440] sm:$0xf] }
 0x36b   :  { %2259 = vmatpush.bf16.msrb.mxu1 %v4952_v58 }
 0x36c   :  { %v1675_v17 = vpop.f32.mrf.mxu1  ;;  %v1688_v20 = vpop.f32.mrf.mxu2 }
 0x36d   :  { %v7534_v25 = vadd.f32 %v1675_v17, %v1663_v14  ;;  %v1689_v44 = vadd.f32 %v1688_v20, %v1490_v27 }
 0x36e   :  { %v1664_v30 = vpop.f32.mrf.mxu0 }
 0x36f   :  { %v4639_v35 = vmul.f32 -1.442695, %v7534_v25 }
 0x371   :  { %6234 = vpow2.f32 %v4639_v35  ;;  %v4895_v35 = vld [vmem:[%s8882_s9 + $0x470] sm:$0xf] }
 0x372   :  { %v1701_v47 = vpop.f32.mrf.mxu3  ;;  %v4896_v37 = vor.u32 %v6004_v36, %v4895_v35 }
 0x373   :  { %v1702_v52 = vadd.f32 %v1701_v47, %v1689_v44  ;;  %v6001_v44 = vld [vmem:[%s8882_s9 + $0x464] sm:$0xf] }
 0x374   :  { %v1677_v42 = vpop.f32.mrf.mxu1  ;;  %v1690_v54 = vpop.f32.mrf.mxu2  ;;  %2245 = vmatpush.bf16.msrb.mxu0 %v4896_v37  ;;  %v4892_v47 = vor.u32 %v6001_v44, %v4889_v46  ;;  %v6012_v37 = vld [vmem:[%s8882_s9 + $0x4b4] sm:$0xf0] }
 0x375   :  { %v4640_v56 = vmul.f32 -1.442695, %v1702_v52  ;;  %v6000_v42 = vld [vmem:[%s8882_s9 + $0x454] sm:$0xf0]  ;;  %v5999_v54 = vld [vmem:[%s8882_s9 + $0x454] sm:$0xf] }
 0x376   :  { %v4880_v55 = vor.u32 %v6000_v42, %v4879_v39  ;;  %v5992_v46 = vld [vmem:[%s8882_s9 + $0x414] sm:$0xf0] }
 0x377   :  { %v6235_v61 = vpop.eup %6234  ;;  %6236 = vpow2.f32 %v4640_v56  ;;  %v4881_v56 = vld [vmem:[%s8882_s9 + $0x458] sm:$0xf0] }
 0x378   :  { %v1711_v1 = vadd.f32 1.0, %v6235_v61  ;;  %2246 = vmatpush.bf16.msrb.mxu0 %v4888_v45  ;;  %v4884_v57 = vor.u32 %v5999_v54, %v4881_v56  ;;  %v6017_v61 = vld [vmem:[%s8882_s9 + $0x4e4] sm:$0xf]  ;;  %v4847_v45 = vld [vmem:[%s8882_s9 + $0x410] sm:$0xf] }
 0x379   :  { %v4848_v48 = vor.u32 %v5992_v46, %v4847_v45  ;;  %v4921_v54 = vld [vmem:[%s8882_s9 + $0x4a8] sm:$0xf0] }
 0x37a   :  { %6238 = vrcp.f32 %v1711_v1  ;;  %v1703_v3 = vpop.f32.mrf.mxu3  ;;  %v1724_v7 = vand.u32 2147483648, %v1711_v1  ;;  %v1722_v9 = vand.u32 2147483647, %v1711_v1  ;;  %vm1718_vm15 = vweird.f32 %v1711_v1 }
 0x37b   :  { %v5998_v3 = vld [vmem:[%s8882_s9 + $0x444] sm:$0xf0] }
 0x37c   :  { %v1725_v14 = vor.u32 1.1754944e-38, %v1724_v7  ;;  %vm1723_vm1 = vcmp.eq.f32.partialorder %v1722_v9, 8.507059e+37  ;;  %2247 = vmatpush.bf16.msrb.mxu0 %v4880_v55  ;;  %v6016_v7 = vld [vmem:[%s8882_s9 + $0x4d4] sm:$0xf0] }
 0x37d   :  { %v6237_v41 = vpop.eup %6236 }
 0x37e   :  { %v1712_v4 = vadd.f32 1.0, %v6237_v41  ;;  %v5997_v41 = vld [vmem:[%s8882_s9 + $0x444] sm:$0xf] }
 0x380   :  { %v6239_v5 = vpop.eup %6238  ;;  %6240 = vrcp.f32 %v1712_v4  ;;  %v1739_v20 = vand.u32 2147483648, %v1712_v4  ;;  %v1737_v23 = vand.u32 2147483647, %v1712_v4  ;;  %vm1733_vm3 = vweird.f32 %v1712_v4 }
 0x381   :  { %v1714_v40 = vmul.f32 %v6239_v5, %v1711_v1  ;;  %vm1719_vm14 = vweird.f32 %v6239_v5  ;;  %v4956_v1 = vor.u32 %v6017_v61, %v4953_v62  ;;  %v5989_v61 = vld [vmem:[%s8882_s9 + $0x404] sm:$0xf] }
 0x382   :  { %vm1720_vm0 = vmor %vm1718_vm15, %vm1719_vm14  ;;  %v1740_v28 = vor.u32 1.1754944e-38, %v1739_v20  ;;  %vm1738_vm5 = vcmp.eq.f32.partialorder %v1737_v23, 8.507059e+37  ;;  %v6013_v23 = vld [vmem:[%s8882_s9 + $0x4c4] sm:$0xf] }
 0x383   :  { %v1715_v26 = vsub.f32 1.0, %v1714_v40 }
 0x385   :  { %v1716_v8 = vmul.f32 %v6239_v5, %v1715_v26  ;;  %v4943_v26 = vld [vmem:[%s8882_s9 + $0x4d0] sm:$0xf] }
 0x386   :  { %v6241_v63 = vpop.eup %6240  ;;  %v4944_v9 = vor.u32 %v6016_v7, %v4943_v26 }
 0x387   :  { %v1717_v6 = vadd.f32 %v6239_v5, %v1716_v8  ;;  %v1729_v12 = vmul.f32 %v6241_v63, %v1712_v4  ;;  %vm1734_vm2 = vweird.f32 %v6241_v63  ;;  %v4872_v4 = vor.u32 %v5998_v3, %v4871_v2  ;;  %v6015_v8 = vld [vmem:[%s8882_s9 + $0x4d4] sm:$0xf]  ;;  %v4841_v2 = vld [vmem:[%s8882_s9 + $0x408] sm:$0xf0] }
 0x388   :  { %vm1735_vm4 = vmor %vm1733_vm3, %vm1734_vm2  ;;  %2260 = vmatpush.bf16.msrb.mxu1 %v4944_v9 }
 0x389   :  { %v1721_v15 = vsel %vm1720_vm0, %v6239_v5, %v1717_v6  ;;  %v1730_v16 = vsub.f32 1.0, %v1729_v12  ;;  %v4873_v5 = vld [vmem:[%s8882_s9 + $0x448] sm:$0xf0]  ;;  %2248 = vmatpush.bf16.msrb.mxu0 %v4872_v4  ;;  %v4863_v12 = vld [vmem:[%s8882_s9 + $0x430] sm:$0xf] }
 0x38a   :  { %v1726_v17 = vsel %vm1723_vm1, %v1725_v14, %v1721_v15  ;;  %v4876_v40 = vor.u32 %v5997_v41, %v4873_v5  ;;  %v5996_v14 = vld [vmem:[%s8882_s9 + $0x434] sm:$0xf0]  ;;  %v5995_v15 = vld [vmem:[%s8882_s9 + $0x434] sm:$0xf]  ;;  %v4844_v41 = vor.u32 %v5989_v61, %v4841_v2  ;;  %v4911_v4 = vld [vmem:[%s8882_s9 + $0x490] sm:$0xf] }
 0x38b   :  { %v1743_v21 = vmul.f32 %v1726_v17, %v7534_v25  ;;  %v1731_v22 = vmul.f32 %v6241_v63, %v1730_v16  ;;  %v4864_v16 = vor.u32 %v5996_v14, %v4863_v12  ;;  %v4865_v17 = vld [vmem:[%s8882_s9 + $0x438] sm:$0xf0]  ;;  %v6008_v5 = vld [vmem:[%s8882_s9 + $0x494] sm:$0xf0]  ;;  %v4903_v12 = vld [vmem:[%s8882_s9 + $0x480] sm:$0xf] }
 0x38c   :  { %v4868_v20 = vor.u32 %v5995_v15, %v4865_v17  ;;  %v4912_v7 = vor.u32 %v6008_v5, %v4911_v4  ;;  %v6006_v14 = vld [vmem:[%s8882_s9 + $0x484] sm:$0xf0]  ;;  %v6005_v15 = vld [vmem:[%s8882_s9 + $0x484] sm:$0xf]  ;;  %v5122_v4 = vld [vmem:[%s8882_s9 + $0x5f0] sm:$0xf] }
 0x38d   :  { %v1745_v24 = vadd.f32 %v1743_v21, %v6974_v10  ;;  %v1732_v27 = vadd.f32 %v6241_v63, %v1731_v22  ;;  %v4935_v21 = vld [vmem:[%s8882_s9 + $0x4c0] sm:$0xf]  ;;  %v6014_v22 = vld [vmem:[%s8882_s9 + $0x4c4] sm:$0xf0]  ;;  %2249 = vmatpush.bf16.msrb.mxu0 %v4864_v16  ;;  %v4904_v17 = vor.u32 %v6006_v14, %v4903_v12  ;;  %v6052_v5 = vld [vmem:[%s8882_s9 + $0x5f4] sm:$0xf0] }
 0x38e   :  { %v5044_v14 = vld [vmem:[%s8882_s9 + $0x558] sm:$0xf0] }
 0x38f   :  { %v7591_v29 = vmul.f32 0.70710677, %v1745_v24  ;;  %v1736_v30 = vsel %vm1735_vm4, %v6241_v63, %v1732_v27  ;;  %v4945_v63 = vld [vmem:[%s8882_s9 + $0x4d8] sm:$0xf0]  ;;  %v7708_v24 = vld [vmem:[%s8887_s10 + $0x6] sm:$0x3]  ;;  %v4936_v27 = vor.u32 %v6014_v22, %v4935_v21 }
 0x390   :  { %v1741_v31 = vsel %vm1738_vm5, %v1740_v28, %v1736_v30  ;;  %v4948_v6 = vor.u32 %v6015_v8, %v4945_v63  ;;  %v4937_v28 = vld [vmem:[%s8882_s9 + $0x4c8] sm:$0xf0]  ;;  %v1788_v62 = vperm.slane %v7708_v24, 1  ;;  %v4913_v8 = vld [vmem:[%s8882_s9 + $0x498] sm:$0xf0] }
 0x391   :  { %v1749_v32 = vpack.c.bf16 %v7591_v29, %v7591_v29  ;;  %v1744_v33 = vmul.f32 %v1741_v31, %v1702_v52  ;;  %v4961_v52 = vld [vmem:[%s8882_s9 + $0x4f8] sm:$0xf0]  ;;  %v4940_v30 = vor.u32 %v6013_v23, %v4937_v28  ;;  %v4855_v31 = vld [vmem:[%s8882_s9 + $0x420] sm:$0xf]  ;;  %2261 = vmatpush.bf16.msrb.mxu1 %v4936_v27 }
 0x392   :  { %v4964_v53 = vor.u32 %v6019_v50, %v4961_v52  ;;  %v6010_v52 = vld [vmem:[%s8882_s9 + $0x4a4] sm:$0xf0] }
 0x393   :  { %v1746_v25 = vadd.f32 %v1744_v33, %v6976_v11  ;;  %1959 = vmatmul.bf16.vlgmr.msra.gmra.mxu0 %v1749_v32  ;;  %1985 = vmatmul.bf16.vlgmr.msra.gmra.mxu2 %v1749_v32  ;;  %v6003_v11 = vld [vmem:[%s8882_s9 + $0x474] sm:$0xf]  ;;  %v5994_v32 = vld [vmem:[%s8882_s9 + $0x424] sm:$0xf0]  ;;  %v5993_v33 = vld [vmem:[%s8882_s9 + $0x424] sm:$0xf]  ;;  %v4920_v42 = vor.u32 %v6010_v52, %v4919_v51 }
 0x394   :  { %v4900_v18 = vor.u32 %v6003_v11, %v4897_v38  ;;  %2284 = vmatpush.bf16.msrb.mxu3 %v4964_v53  ;;  %v4927_v11 = vld [vmem:[%s8882_s9 + $0x4b0] sm:$0xf]  ;;  %v6011_v38 = vld [vmem:[%s8882_s9 + $0x4b4] sm:$0xf]  ;;  %v6009_v53 = vld [vmem:[%s8882_s9 + $0x4a4] sm:$0xf] }
 0x395   :  { %v7596_v34 = vmul.f32 0.70710677, %v1746_v25  ;;  %v4856_v25 = vor.u32 %v5994_v32, %v4855_v31  ;;  %v4928_v19 = vor.u32 %v6012_v37, %v4927_v11  ;;  %v4932_v44 = vor.u32 %v6011_v38, %v4929_v43 }
 0x396   :  { %2271 = vmatpush.bf16.msrb.mxu2 %v4900_v18  ;;  %v1787_v18 = vperm.slane %v7708_v24, 0 }
 0x397   :  { %v1750_v10 = vpack.c.bf16 %v7596_v34, %v7596_v34  ;;  %2250 = vmatpush.bf16.msrb.mxu0 %v4856_v25  ;;  %2262 = vmatpush.bf16.msrb.mxu1 %v4928_v19 }
 0x398   :  { %2285 = vmatpush.bf16.msrb.mxu3 %v4956_v1  ;;  %v4840_v1 = vor.u32 %v5990_v59, %v4839_v60  ;;  %v5060_v59 = vld [vmem:[%s8882_s9 + $0x578] sm:$0xf0] }
 0x399   :  { %1972 = vmatmul.bf16.vlgmr.msra.gmra.mxu1 %v1750_v10  ;;  %1998 = vmatmul.bf16.vlgmr.msra.gmra.mxu3 %v1750_v10  ;;  %v4857_v10 = vld [vmem:[%s8882_s9 + $0x428] sm:$0xf0] }
 0x39a   :  { %2272 = vmatpush.bf16.msrb.mxu2 %v4892_v47  ;;  %v4860_v36 = vor.u32 %v5993_v33, %v4857_v10  ;;  %v5991_v47 = vld [vmem:[%s8882_s9 + $0x414] sm:$0xf] }
 0x39b   :  { %v4852_v50 = vor.u32 %v5991_v47, %v4849_v49  ;;  %2251 = vmatpush.bf16.msrb.mxu0 %v4848_v48  ;;  %2263 = vmatpush.bf16.msrb.mxu1 %v4920_v42 }
 0x39c   :  { %2286 = vmatpush.bf16.msrb.mxu3 %v4948_v6 }
 0x39e   :  { %2273 = vmatpush.bf16.msrb.mxu2 %v4884_v57  ;;  %v4924_v57 = vor.u32 %v6009_v53, %v4921_v54 }
 0x39f   :  { %2252 = vmatpush.bf16.msrb.mxu0 %v4840_v1  ;;  %2264 = vmatpush.bf16.msrb.mxu1 %v4912_v7  ;;  %v6033_v1 = vld [vmem:[%s8882_s9 + $0x564] sm:$0xf]  ;;  %v5124_v7 = vld [vmem:[%s8882_s9 + $0x5f8] sm:$0xf0] }
 0x3a0   :  { %2287 = vmatpush.bf16.msrb.mxu3 %v4940_v30 }
 0x3a2   :  { %2274 = vmatpush.bf16.msrb.mxu2 %v4876_v40  ;;  %v6007_v40 = vld [vmem:[%s8882_s9 + $0x494] sm:$0xf] }
 0x3a3   :  { %v4916_v9 = vor.u32 %v6007_v40, %v4913_v8  ;;  %2265 = vmatpush.bf16.msrb.mxu1 %v4904_v17  ;;  %v6051_v40 = vld [vmem:[%s8882_s9 + $0x5f4] sm:$0xf]  ;;  %v6050_v17 = vld [vmem:[%s8882_s9 + $0x5e4] sm:$0xf0] }
 0x3a4   :  { %2288 = vmatpush.bf16.msrb.mxu3 %v4932_v44  ;;  %v5127_v8 = vor.u32 %v6051_v40, %v5124_v7  ;;  %v6042_v7 = vld [vmem:[%s8882_s9 + $0x5a4] sm:$0xf0] }
 0x3a6   :  { %2275 = vmatpush.bf16.msrb.mxu2 %v4868_v20  ;;  %v4905_v20 = vld [vmem:[%s8882_s9 + $0x488] sm:$0xf0] }
 0x3a7   :  { %v4908_v23 = vor.u32 %v6005_v15, %v4905_v20  ;;  %v6049_v20 = vld [vmem:[%s8882_s9 + $0x5e4] sm:$0xf] }
 0x3a8   :  { %2289 = vmatpush.bf16.msrb.mxu3 %v4924_v57  ;;  %v6035_v57 = vld [vmem:[%s8882_s9 + $0x574] sm:$0xf] }
 0x3a9   :  { %v5063_v61 = vor.u32 %v6035_v57, %v5060_v59  ;;  %v5090_v57 = vld [vmem:[%s8882_s9 + $0x5b0] sm:$0xf]  ;;  %v6043_v59 = vld [vmem:[%s8882_s9 + $0x5b4] sm:$0xf] }
 0x3aa   :  { %2276 = vmatpush.bf16.msrb.mxu2 %v4860_v36 }
 0x3ac   :  { %2290 = vmatpush.bf16.msrb.mxu3 %v4916_v9  ;;  %v5042_v9 = vld [vmem:[%s8882_s9 + $0x550] sm:$0xf] }
 0x3ae   :  { %2277 = vmatpush.bf16.msrb.mxu2 %v4852_v50 }
 0x3b0   :  { %2291 = vmatpush.bf16.msrb.mxu3 %v4908_v23 }
 0x3b2   :  { %2278 = vmatpush.bf16.msrb.mxu2 %v4844_v41 }
 0x3b4   :  { %2578 = vmatpush.bf16.msra.mxu3 %v5127_v8  ;;  %v6041_v8 = vld [vmem:[%s8882_s9 + $0x5a4] sm:$0xf] }
 0x3b6   :  { %2565 = vmatpush.bf16.msra.mxu2 %v5063_v61 }
 0x410   :  { %v1960_v35 = vpop.f32.mrf.mxu0 }
 0x411   :  { %v1961_v39 = vadd.f32 %v1960_v35, %v1787_v18 }
 0x416   :  { %v1973_v55 = vpop.f32.mrf.mxu1  ;;  %v1986_v56 = vpop.f32.mrf.mxu2 }
 0x417   :  { %v1974_v58 = vadd.f32 %v1973_v55, %v1961_v39  ;;  %v1987_v63 = vadd.f32 %v1986_v56, %v1788_v62  ;;  %v5058_v55 = vld [vmem:[%s8882_s9 + $0x570] sm:$0xf]  ;;  %v6036_v56 = vld [vmem:[%s8882_s9 + $0x574] sm:$0xf0]  ;;  %v6034_v62 = vld [vmem:[%s8882_s9 + $0x564] sm:$0xf0] }
 0x418   :  { %v1962_v3 = vpop.f32.mrf.mxu0  ;;  %v5059_v60 = vor.u32 %v6036_v56, %v5058_v55 }
 0x419   :  { %v4802_v26 = vmul.f32 -1.442695, %v1974_v58  ;;  %v5052_v3 = vld [vmem:[%s8882_s9 + $0x568] sm:$0xf0] }
 0x41a   :  { %2539 = vmatpush.bf16.msra.mxu0 %v5059_v60  ;;  %v5055_v41 = vor.u32 %v6033_v1, %v5052_v3  ;;  %v6044_v60 = vld [vmem:[%s8882_s9 + $0x5b4] sm:$0xf0] }
 0x41b   :  { %6242 = vpow2.f32 %v4802_v26  ;;  %v5123_v26 = vor.u32 %v6052_v5, %v5122_v4  ;;  %v6024_v3 = vld [vmem:[%s8882_s9 + $0x514] sm:$0xf0]  ;;  %v5012_v5 = vld [vmem:[%s8882_s9 + $0x518] sm:$0xf0] }
 0x41c   :  { %v1999_v6 = vpop.f32.mrf.mxu3  ;;  %2566 = vmatpush.bf16.msra.mxu2 %v5055_v41  ;;  %v6023_v41 = vld [vmem:[%s8882_s9 + $0x514] sm:$0xf] }
 0x41d   :  { %v2000_v16 = vadd.f32 %v1999_v6, %v1987_v63  ;;  %v6032_v63 = vld [vmem:[%s8882_s9 + $0x554] sm:$0xf0]  ;;  %v6031_v6 = vld [vmem:[%s8882_s9 + $0x554] sm:$0xf]  ;;  %2552 = vmatpush.bf16.msra.mxu1 %v5123_v26  ;;  %v5015_v40 = vor.u32 %v6023_v41, %v5012_v5  ;;  %v5082_v26 = vld [vmem:[%s8882_s9 + $0x5a0] sm:$0xf] }
 0x41e   :  { %v1975_v21 = vpop.f32.mrf.mxu1  ;;  %v1988_v22 = vpop.f32.mrf.mxu2  ;;  %v5043_v12 = vor.u32 %v6032_v63, %v5042_v9  ;;  %v5047_v15 = vor.u32 %v6031_v6, %v5044_v14  ;;  %v5083_v63 = vor.u32 %v6042_v7, %v5082_v26  ;;  %v5084_v6 = vld [vmem:[%s8882_s9 + $0x5a8] sm:$0xf0] }
 0x41f   :  { %v4803_v24 = vmul.f32 -1.442695, %v2000_v16  ;;  %v5116_v22 = vld [vmem:[%s8882_s9 + $0x5e8] sm:$0xf0] }
 0x420   :  { %2567 = vmatpush.bf16.msra.mxu2 %v5047_v15  ;;  %v5119_v23 = vor.u32 %v6049_v20, %v5116_v22  ;;  %v5087_v15 = vor.u32 %v6041_v8, %v5084_v6  ;;  %v6021_v20 = vld [vmem:[%s8882_s9 + $0x504] sm:$0xf] }
 0x421   :  { %v6243_v27 = vpop.eup %6242  ;;  %6244 = vpow2.f32 %v4803_v24  ;;  %v5034_v24 = vld [vmem:[%s8882_s9 + $0x540] sm:$0xf] }
 0x422   :  { %v2009_v28 = vadd.f32 1.0, %v6243_v27  ;;  %v6030_v27 = vld [vmem:[%s8882_s9 + $0x544] sm:$0xf0]  ;;  %2579 = vmatpush.bf16.msra.mxu3 %v5119_v23 }
 0x424   :  { %6246 = vrcp.f32 %v2009_v28  ;;  %v2001_v30 = vpop.f32.mrf.mxu3  ;;  %v2022_v35 = vand.u32 2147483648, %v2009_v28  ;;  %v2020_v11 = vand.u32 2147483647, %v2009_v28  ;;  %vm2016_vm7 = vweird.f32 %v2009_v28 }
 0x425   :  { %v5035_v30 = vor.u32 %v6030_v27, %v5034_v24  ;;  %v5004_v24 = vld [vmem:[%s8882_s9 + $0x508] sm:$0xf0] }
 0x426   :  { %v2023_v19 = vor.u32 1.1754944e-38, %v2022_v35  ;;  %vm2021_vm9 = vcmp.eq.f32.partialorder %v2020_v11, 8.507059e+37 }
 0x427   :  { %v6245_v31 = vpop.eup %6244 }
 0x428   :  { %v2010_v32 = vadd.f32 1.0, %v6245_v31  ;;  %v5036_v31 = vld [vmem:[%s8882_s9 + $0x548] sm:$0xf0] }
 0x42a   :  { %v6247_v33 = vpop.eup %6246  ;;  %6248 = vrcp.f32 %v2010_v32  ;;  %v2037_v46 = vand.u32 2147483648, %v2010_v32  ;;  %v2035_v49 = vand.u32 2147483647, %v2010_v32  ;;  %vm2031_vm11 = vweird.f32 %v2010_v32 }
 0x42b   :  { %v2012_v25 = vmul.f32 %v6247_v33, %v2009_v28  ;;  %vm2017_vm6 = vweird.f32 %v6247_v33  ;;  %v6029_v28 = vld [vmem:[%s8882_s9 + $0x544] sm:$0xf] }
 0x42c   :  { %vm2018_vm8 = vmor %vm2016_vm7, %vm2017_vm6  ;;  %v2038_v52 = vor.u32 1.1754944e-38, %v2037_v46  ;;  %vm2036_vm13 = vcmp.eq.f32.partialorder %v2035_v49, 8.507059e+37  ;;  %v6046_v46 = vld [vmem:[%s8882_s9 + $0x5c4] sm:$0xf0] }
 0x42d   :  { %v2013_v10 = vsub.f32 1.0, %v2012_v25  ;;  %v6048_v25 = vld [vmem:[%s8882_s9 + $0x5d4] sm:$0xf0] }
 0x42f   :  { %v2014_v36 = vmul.f32 %v6247_v33, %v2013_v10  ;;  %v6047_v10 = vld [vmem:[%s8882_s9 + $0x5d4] sm:$0xf] }
 0x430   :  { %v6249_v37 = vpop.eup %6248 }
 0x431   :  { %v2015_v38 = vadd.f32 %v6247_v33, %v2014_v36  ;;  %v2027_v18 = vmul.f32 %v6249_v37, %v2010_v32  ;;  %vm2032_vm10 = vweird.f32 %v6249_v37  ;;  %v5039_v32 = vor.u32 %v6029_v28, %v5036_v31  ;;  %v5108_v36 = vld [vmem:[%s8882_s9 + $0x5d8] sm:$0xf0]  ;;  %v6040_v31 = vld [vmem:[%s8882_s9 + $0x594] sm:$0xf0] }
 0x432   :  { %vm2033_vm12 = vmor %vm2031_vm11, %vm2032_vm10  ;;  %v5111_v11 = vor.u32 %v6047_v10, %v5108_v36  ;;  %v5007_v28 = vor.u32 %v6021_v20, %v5004_v24  ;;  %v5076_v10 = vld [vmem:[%s8882_s9 + $0x598] sm:$0xf0] }
 0x433   :  { %v2019_v43 = vsel %vm2018_vm8, %v6247_v33, %v2015_v38  ;;  %v2028_v44 = vsub.f32 1.0, %v2027_v18  ;;  %v5106_v33 = vld [vmem:[%s8882_s9 + $0x5d0] sm:$0xf]  ;;  %2568 = vmatpush.bf16.msra.mxu2 %v5039_v32  ;;  %v6028_v38 = vld [vmem:[%s8882_s9 + $0x534] sm:$0xf0] }
 0x434   :  { %v2024_v45 = vsel %vm2021_vm9, %v2023_v19, %v2019_v43  ;;  %v5107_v35 = vor.u32 %v6048_v25, %v5106_v33  ;;  %v6027_v18 = vld [vmem:[%s8882_s9 + $0x534] sm:$0xf]  ;;  %v5028_v43 = vld [vmem:[%s8882_s9 + $0x538] sm:$0xf0]  ;;  %2580 = vmatpush.bf16.msra.mxu3 %v5111_v11 }
 0x435   :  { %v2041_v47 = vmul.f32 %v2024_v45, %v1974_v58  ;;  %v2029_v48 = vmul.f32 %v6249_v37, %v2028_v44  ;;  %v5050_v58 = vld [vmem:[%s8882_s9 + $0x560] sm:$0xf]  ;;  %v5031_v44 = vor.u32 %v6027_v18, %v5028_v43  ;;  %v6039_v32 = vld [vmem:[%s8882_s9 + $0x594] sm:$0xf]  ;;  %v6037_v18 = vld [vmem:[%s8882_s9 + $0x584] sm:$0xf] }
 0x436   :  { %v5051_v2 = vor.u32 %v6034_v62, %v5050_v58  ;;  %v5098_v45 = vld [vmem:[%s8882_s9 + $0x5c0] sm:$0xf]  ;;  %v5091_v58 = vor.u32 %v6044_v60, %v5090_v57  ;;  %v5092_v62 = vld [vmem:[%s8882_s9 + $0x5b8] sm:$0xf0] }
 0x437   :  { %v2043_v50 = vpack.c.bf16 %v2041_v47, %v2041_v47  ;;  %v2030_v51 = vadd.f32 %v6249_v37, %v2029_v48  ;;  %v6045_v47 = vld [vmem:[%s8882_s9 + $0x5c4] sm:$0xf]  ;;  %v7907_v48 = vld [vmem:[%s8887_s10 + $0x8] sm:$0x3]  ;;  %v5099_v49 = vor.u32 %v6046_v46, %v5098_v45  ;;  %2569 = vmatpush.bf16.msra.mxu2 %v5031_v44  ;;  %v5095_v1 = vor.u32 %v6043_v59, %v5092_v62  ;;  %v5068_v44 = vld [vmem:[%s8882_s9 + $0x588] sm:$0xf0] }
 0x438   :  { %2540 = vmatpush.bf16.msra.mxu0 %v5051_v2  ;;  %v2081_v61 = vperm.slane %v7907_v48, 0  ;;  %v5010_v2 = vld [vmem:[%s8882_s9 + $0x510] sm:$0xf]  ;;  %v2082_v22 = vperm.slane %v7907_v48, 1 }
 0x439   :  { %v2034_v53 = vsel %vm2033_vm12, %v6249_v37, %v2030_v51  ;;  %2253 = vmatmul.bf16.vlgmr.msrb.gmra.mxu0 %v2043_v50  ;;  %2279 = vmatmul.bf16.vlgmr.msrb.gmra.mxu2 %v2043_v50  ;;  %v5026_v37 = vld [vmem:[%s8882_s9 + $0x530] sm:$0xf]  ;;  %v5100_v50 = vld [vmem:[%s8882_s9 + $0x5c8] sm:$0xf0]  ;;  %v5011_v4 = vor.u32 %v6024_v3, %v5010_v2 }
 0x43a   :  { %v2039_v39 = vsel %vm2036_vm13, %v2038_v52, %v2034_v53  ;;  %v5027_v19 = vor.u32 %v6028_v38, %v5026_v37  ;;  %v5103_v51 = vor.u32 %v6045_v47, %v5100_v50  ;;  %v5018_v52 = vld [vmem:[%s8882_s9 + $0x520] sm:$0xf]  ;;  %v6026_v53 = vld [vmem:[%s8882_s9 + $0x524] sm:$0xf0]  ;;  %v5071_v47 = vor.u32 %v6037_v18, %v5068_v44  ;;  %v6081_v44 = vld [vmem:[%s8882_s9 + $0x6e4] sm:$0xf] }
 0x43b   :  { %v2042_v42 = vmul.f32 %v2039_v39, %v2000_v16  ;;  %v5114_v16 = vld [vmem:[%s8882_s9 + $0x5e0] sm:$0xf]  ;;  %v6025_v39 = vld [vmem:[%s8882_s9 + $0x524] sm:$0xf]  ;;  %v6038_v38 = vld [vmem:[%s8882_s9 + $0x584] sm:$0xf0] }
 0x43c   :  { %2541 = vmatpush.bf16.msra.mxu0 %v5043_v12  ;;  %v5115_v21 = vor.u32 %v6050_v17, %v5114_v16  ;;  %2581 = vmatpush.bf16.msra.mxu3 %v5103_v51  ;;  %v5002_v16 = vld [vmem:[%s8882_s9 + $0x500] sm:$0xf]  ;;  %v6022_v17 = vld [vmem:[%s8882_s9 + $0x504] sm:$0xf0] }
 0x43d   :  { %v2044_v54 = vpack.c.bf16 %v2042_v42, %v2042_v42  ;;  %v5019_v42 = vor.u32 %v6026_v53, %v5018_v52  ;;  %v5003_v23 = vor.u32 %v6022_v17, %v5002_v16  ;;  %v5066_v37 = vld [vmem:[%s8882_s9 + $0x580] sm:$0xf]  ;;  %v5223_v17 = vld [vmem:[%s8882_s9 + $0x678] sm:$0xf0] }
 0x43e   :  { %2553 = vmatpush.bf16.msra.mxu1 %v5115_v21  ;;  %v5067_v43 = vor.u32 %v6038_v38, %v5066_v37  ;;  %v5207_v38 = vld [vmem:[%s8882_s9 + $0x658] sm:$0xf0] }
 0x43f   :  { %2266 = vmatmul.bf16.vlgmr.msrb.gmra.mxu1 %v2044_v54  ;;  %2292 = vmatmul.bf16.vlgmr.msrb.gmra.mxu3 %v2044_v54  ;;  %v5020_v54 = vld [vmem:[%s8882_s9 + $0x528] sm:$0xf0] }
 0x440   :  { %2542 = vmatpush.bf16.msra.mxu0 %v5035_v30  ;;  %v5023_v56 = vor.u32 %v6025_v39, %v5020_v54  ;;  %2582 = vmatpush.bf16.msra.mxu3 %v5095_v1  ;;  %v5074_v30 = vld [vmem:[%s8882_s9 + $0x590] sm:$0xf] }
 0x441   :  { %v5075_v25 = vor.u32 %v6040_v31, %v5074_v30  ;;  %v5285_v30 = vld [vmem:[%s8882_s9 + $0x6f0] sm:$0xf]  ;;  %v6084_v31 = vld [vmem:[%s8882_s9 + $0x6f4] sm:$0xf0] }
 0x442   :  { %2554 = vmatpush.bf16.msra.mxu1 %v5107_v35  ;;  %2570 = vmatpush.bf16.msra.mxu2 %v5023_v56  ;;  %v5079_v35 = vor.u32 %v6039_v32, %v5076_v10  ;;  %v6083_v32 = vld [vmem:[%s8882_s9 + $0x6f4] sm:$0xf] }
 0x444   :  { %2543 = vmatpush.bf16.msra.mxu0 %v5027_v19  ;;  %2583 = vmatpush.bf16.msra.mxu3 %v5087_v15  ;;  %v6067_v15 = vld [vmem:[%s8882_s9 + $0x674] sm:$0xf] }
 0x445   :  { %v5226_v20 = vor.u32 %v6067_v15, %v5223_v17  ;;  %v6076_v17 = vld [vmem:[%s8882_s9 + $0x6b4] sm:$0xf0] }
 0x446   :  { %2555 = vmatpush.bf16.msra.mxu1 %v5099_v49  ;;  %2571 = vmatpush.bf16.msra.mxu2 %v5015_v40 }
 0x448   :  { %2544 = vmatpush.bf16.msra.mxu0 %v5019_v42  ;;  %2584 = vmatpush.bf16.msra.mxu3 %v5079_v35  ;;  %v5205_v35 = vld [vmem:[%s8882_s9 + $0x650] sm:$0xf] }
 0x44a   :  { %2556 = vmatpush.bf16.msra.mxu1 %v5091_v58  ;;  %2572 = vmatpush.bf16.msra.mxu2 %v5007_v28 }
 0x44c   :  { %2545 = vmatpush.bf16.msra.mxu0 %v5011_v4  ;;  %2585 = vmatpush.bf16.msra.mxu3 %v5071_v47 }
 0x44e   :  { %2557 = vmatpush.bf16.msra.mxu1 %v5083_v63  ;;  %2863 = vmatpush.bf16.msrb.mxu2 %v5226_v20  ;;  %v6075_v20 = vld [vmem:[%s8882_s9 + $0x6b4] sm:$0xf] }
 0x450   :  { %2546 = vmatpush.bf16.msra.mxu0 %v5003_v23  ;;  %v6065_v23 = vld [vmem:[%s8882_s9 + $0x664] sm:$0xf] }
 0x452   :  { %2558 = vmatpush.bf16.msra.mxu1 %v5075_v25  ;;  %v5287_v25 = vld [vmem:[%s8882_s9 + $0x6f8] sm:$0xf0] }
 0x453   :  { %v5290_v10 = vor.u32 %v6083_v32, %v5287_v25  ;;  %v6055_v32 = vld [vmem:[%s8882_s9 + $0x614] sm:$0xf] }
 0x455   :  { %2876 = vmatpush.bf16.msrb.mxu3 %v5290_v10 }
 0x456   :  { %2559 = vmatpush.bf16.msra.mxu1 %v5067_v43  ;;  %v6082_v43 = vld [vmem:[%s8882_s9 + $0x6e4] sm:$0xf0] }
 0x4b6   :  { %v2254_v55 = vpop.f32.mrf.mxu0 }
 0x4b7   :  { %v2255_v9 = vadd.f32 %v2254_v55, %v2081_v61 }
 0x4bc   :  { %v2267_v12 = vpop.f32.mrf.mxu1  ;;  %v2280_v14 = vpop.f32.mrf.mxu2 }
 0x4bd   :  { %v2268_v21 = vadd.f32 %v2267_v12, %v2255_v9  ;;  %v2281_v36 = vadd.f32 %v2280_v14, %v2082_v22  ;;  %v5221_v12 = vld [vmem:[%s8882_s9 + $0x670] sm:$0xf]  ;;  %v6068_v14 = vld [vmem:[%s8882_s9 + $0x674] sm:$0xf0]  ;;  %v6066_v22 = vld [vmem:[%s8882_s9 + $0x664] sm:$0xf0] }
 0x4be   :  { %v2256_v27 = vpop.f32.mrf.mxu0  ;;  %v5222_v16 = vor.u32 %v6068_v14, %v5221_v12  ;;  %v5183_v14 = vld [vmem:[%s8882_s9 + $0x628] sm:$0xf0] }
 0x4bf   :  { %v4965_v33 = vmul.f32 -1.442695, %v2268_v21  ;;  %v5215_v27 = vld [vmem:[%s8882_s9 + $0x668] sm:$0xf0] }
 0x4c0   :  { %2837 = vmatpush.bf16.msrb.mxu0 %v5222_v16  ;;  %v5218_v28 = vor.u32 %v6065_v23, %v5215_v27  ;;  %v5253_v16 = vld [vmem:[%s8882_s9 + $0x6b0] sm:$0xf]  ;;  %v5255_v23 = vld [vmem:[%s8882_s9 + $0x6b8] sm:$0xf0] }
 0x4c1   :  { %6250 = vpow2.f32 %v4965_v33  ;;  %v5286_v33 = vor.u32 %v6084_v31, %v5285_v30  ;;  %v5173_v30 = vld [vmem:[%s8882_s9 + $0x610] sm:$0xf]  ;;  %v6056_v31 = vld [vmem:[%s8882_s9 + $0x614] sm:$0xf0] }
 0x4c2   :  { %v2293_v11 = vpop.f32.mrf.mxu3  ;;  %2864 = vmatpush.bf16.msrb.mxu2 %v5218_v28  ;;  %v5258_v28 = vor.u32 %v6075_v20, %v5255_v23  ;;  %v5174_v10 = vor.u32 %v6056_v31, %v5173_v30 }
 0x4c3   :  { %v2294_v19 = vadd.f32 %v2293_v11, %v2281_v36  ;;  %v6064_v36 = vld [vmem:[%s8882_s9 + $0x654] sm:$0xf0]  ;;  %v6063_v11 = vld [vmem:[%s8882_s9 + $0x654] sm:$0xf]  ;;  %2850 = vmatpush.bf16.msrb.mxu1 %v5286_v33 }
 0x4c4   :  { %v2269_v45 = vpop.f32.mrf.mxu1  ;;  %v2282_v46 = vpop.f32.mrf.mxu2  ;;  %v5206_v37 = vor.u32 %v6064_v36, %v5205_v35  ;;  %v5210_v18 = vor.u32 %v6063_v11, %v5207_v38  ;;  %v5175_v35 = vld [vmem:[%s8882_s9 + $0x618] sm:$0xf0]  ;;  %v6074_v38 = vld [vmem:[%s8882_s9 + $0x6a4] sm:$0xf0] }
 0x4c5   :  { %v4966_v48 = vmul.f32 -1.442695, %v2294_v19  ;;  %v5279_v46 = vld [vmem:[%s8882_s9 + $0x6e8] sm:$0xf0]  ;;  %v5178_v11 = vor.u32 %v6055_v32, %v5175_v35 }
 0x4c6   :  { %2865 = vmatpush.bf16.msrb.mxu2 %v5210_v18  ;;  %v5282_v47 = vor.u32 %v6081_v44, %v5279_v46  ;;  %v6073_v18 = vld [vmem:[%s8882_s9 + $0x6a4] sm:$0xf]  ;;  %v5247_v44 = vld [vmem:[%s8882_s9 + $0x6a8] sm:$0xf0]  ;;  %v5165_v46 = vld [vmem:[%s8882_s9 + $0x600] sm:$0xf] }
 0x4c7   :  { %v6251_v49 = vpop.eup %6250  ;;  %6252 = vpow2.f32 %v4966_v48  ;;  %v5197_v48 = vld [vmem:[%s8882_s9 + $0x640] sm:$0xf] }
 0x4c8   :  { %v2303_v50 = vadd.f32 1.0, %v6251_v49  ;;  %v6062_v49 = vld [vmem:[%s8882_s9 + $0x644] sm:$0xf0]  ;;  %2877 = vmatpush.bf16.msrb.mxu3 %v5282_v47 }
 0x4c9   :  { %v6054_v47 = vld [vmem:[%s8882_s9 + $0x604] sm:$0xf0] }
 0x4ca   :  { %6254 = vrcp.f32 %v2303_v50  ;;  %v2295_v51 = vpop.f32.mrf.mxu3  ;;  %v2316_v55 = vand.u32 2147483648, %v2303_v50  ;;  %v2314_v57 = vand.u32 2147483647, %v2303_v50  ;;  %vm2310_vm15 = vweird.f32 %v2303_v50 }
 0x4cb   :  { %v5198_v51 = vor.u32 %v6062_v49, %v5197_v48  ;;  %v6053_v48 = vld [vmem:[%s8882_s9 + $0x604] sm:$0xf] }
 0x4cc   :  { %v2317_v58 = vor.u32 1.1754944e-38, %v2316_v55  ;;  %vm2315_vm1 = vcmp.eq.f32.partialorder %v2314_v57, 8.507059e+37  ;;  %v8082_v55 = vld [vmem:[%s8887_s10 + $0xa] sm:$0x3]  ;;  %v5271_v57 = vld [vmem:[%s8882_s9 + $0x6d8] sm:$0xf0] }
 0x4cd   :  { %v6253_v52 = vpop.eup %6252  ;;  %v2376_v25 = vperm.slane %v8082_v55, 1 }
 0x4ce   :  { %v2304_v53 = vadd.f32 1.0, %v6253_v52  ;;  %v5199_v52 = vld [vmem:[%s8882_s9 + $0x648] sm:$0xf0] }
 0x4d0   :  { %v6255_v39 = vpop.eup %6254  ;;  %6256 = vrcp.f32 %v2304_v53  ;;  %v2331_v3 = vand.u32 2147483648, %v2304_v53  ;;  %v2329_v5 = vand.u32 2147483647, %v2304_v53  ;;  %vm2325_vm3 = vweird.f32 %v2304_v53 }
 0x4d1   :  { %v2306_v42 = vmul.f32 %v6255_v39, %v2303_v50  ;;  %vm2311_vm14 = vweird.f32 %v6255_v39  ;;  %v6061_v50 = vld [vmem:[%s8882_s9 + $0x644] sm:$0xf] }
 0x4d2   :  { %vm2312_vm0 = vmor %vm2310_vm15, %vm2311_vm14  ;;  %v2332_v7 = vor.u32 1.1754944e-38, %v2331_v3  ;;  %vm2330_vm5 = vcmp.eq.f32.partialorder %v2329_v5, 8.507059e+37  ;;  %v6077_v5 = vld [vmem:[%s8882_s9 + $0x6c4] sm:$0xf] }
 0x4d3   :  { %v2307_v54 = vsub.f32 1.0, %v2306_v42  ;;  %v6080_v42 = vld [vmem:[%s8882_s9 + $0x6d4] sm:$0xf0] }
 0x4d5   :  { %v2308_v56 = vmul.f32 %v6255_v39, %v2307_v54  ;;  %v6079_v54 = vld [vmem:[%s8882_s9 + $0x6d4] sm:$0xf] }
 0x4d6   :  { %v6257_v60 = vpop.eup %6256 }
 0x4d7   :  { %v2309_v59 = vadd.f32 %v6255_v39, %v2308_v56  ;;  %v2321_v61 = vmul.f32 %v6257_v60, %v2304_v53  ;;  %vm2326_vm2 = vweird.f32 %v6257_v60  ;;  %v5202_v53 = vor.u32 %v6061_v50, %v5199_v52 }
 0x4d8   :  { %vm2327_vm4 = vmor %vm2325_vm3, %vm2326_vm2  ;;  %v5166_v50 = vor.u32 %v6054_v47, %v5165_v46  ;;  %v5376_v47 = vld [vmem:[%s8882_s9 + $0x760] sm:$0xf] }
 0x4d9   :  { %v2313_v62 = vsel %vm2312_vm0, %v6255_v39, %v2309_v59  ;;  %v2322_v1 = vsub.f32 1.0, %v2321_v61  ;;  %v5269_v39 = vld [vmem:[%s8882_s9 + $0x6d0] sm:$0xf]  ;;  %2866 = vmatpush.bf16.msrb.mxu2 %v5202_v53  ;;  %v6060_v61 = vld [vmem:[%s8882_s9 + $0x634] sm:$0xf0] }
 0x4da   :  { %v2318_v2 = vsel %vm2315_vm1, %v2317_v58, %v2313_v62  ;;  %v5270_v56 = vor.u32 %v6080_v42, %v5269_v39  ;;  %v5189_v59 = vld [vmem:[%s8882_s9 + $0x630] sm:$0xf]  ;;  %v6059_v58 = vld [vmem:[%s8882_s9 + $0x634] sm:$0xf]  ;;  %v6072_v42 = vld [vmem:[%s8882_s9 + $0x694] sm:$0xf0] }
 0x4db   :  { %v2335_v41 = vmul.f32 %v2318_v2, %v2268_v21  ;;  %v2323_v4 = vmul.f32 %v6257_v60, %v2322_v1  ;;  %v5213_v21 = vld [vmem:[%s8882_s9 + $0x660] sm:$0xf]  ;;  %v5190_v62 = vor.u32 %v6060_v61, %v5189_v59  ;;  %v5191_v1 = vld [vmem:[%s8882_s9 + $0x638] sm:$0xf0]  ;;  %v5237_v39 = vld [vmem:[%s8882_s9 + $0x690] sm:$0xf] }
 0x4dc   :  { %v5214_v24 = vor.u32 %v6066_v22, %v5213_v21  ;;  %v5194_v3 = vor.u32 %v6059_v58, %v5191_v1  ;;  %v5254_v22 = vor.u32 %v6076_v17, %v5253_v16  ;;  %v6070_v1 = vld [vmem:[%s8882_s9 + $0x684] sm:$0xf0] }
 0x4dd   :  { %v2337_v40 = vpack.c.bf16 %v2335_v41, %v2335_v41  ;;  %v2324_v26 = vadd.f32 %v6257_v60, %v2323_v4  ;;  %v5261_v41 = vld [vmem:[%s8882_s9 + $0x6c0] sm:$0xf]  ;;  %v6078_v4 = vld [vmem:[%s8882_s9 + $0x6c4] sm:$0xf0] }
 0x4de   :  { %2838 = vmatpush.bf16.msrb.mxu0 %v5214_v24  ;;  %2867 = vmatpush.bf16.msrb.mxu2 %v5194_v3 }
 0x4df   :  { %v2328_v8 = vsel %vm2327_vm4, %v6257_v60, %v2324_v26  ;;  %2547 = vmatmul.bf16.vlgmr.msra.gmra.mxu0 %v2337_v40  ;;  %2573 = vmatmul.bf16.vlgmr.msra.gmra.mxu2 %v2337_v40  ;;  %v5274_v60 = vor.u32 %v6079_v54, %v5271_v57  ;;  %v2375_v40 = vperm.slane %v8082_v55, 0  ;;  %v5262_v26 = vor.u32 %v6078_v4, %v5261_v41  ;;  %v6071_v54 = vld [vmem:[%s8882_s9 + $0x694] sm:$0xf]  ;;  %v5239_v57 = vld [vmem:[%s8882_s9 + $0x698] sm:$0xf0] }
 0x4e0   :  { %v2333_v9 = vsel %vm2330_vm5, %v2332_v7, %v2328_v8  ;;  %v5263_v7 = vld [vmem:[%s8882_s9 + $0x6c8] sm:$0xf0]  ;;  %v5242_v61 = vor.u32 %v6071_v54, %v5239_v57  ;;  %v5368_v57 = vld [vmem:[%s8882_s9 + $0x750] sm:$0xf] }
 0x4e1   :  { %v2336_v63 = vmul.f32 %v2333_v9, %v2294_v19  ;;  %v5277_v19 = vld [vmem:[%s8882_s9 + $0x6e0] sm:$0xf]  ;;  %2878 = vmatpush.bf16.msrb.mxu3 %v5274_v60  ;;  %v5266_v8 = vor.u32 %v6077_v5, %v5263_v7  ;;  %v5231_v4 = vld [vmem:[%s8882_s9 + $0x688] sm:$0xf0] }
 0x4e2   :  { %2839 = vmatpush.bf16.msrb.mxu0 %v5206_v37  ;;  %v5278_v45 = vor.u32 %v6082_v43, %v5277_v19  ;;  %v5181_v9 = vld [vmem:[%s8882_s9 + $0x620] sm:$0xf] }
 0x4e3   :  { %v2338_v6 = vpack.c.bf16 %v2336_v63, %v2336_v63  ;;  %v6058_v63 = vld [vmem:[%s8882_s9 + $0x624] sm:$0xf0]  ;;  %v5245_v37 = vld [vmem:[%s8882_s9 + $0x6a0] sm:$0xf] }
 0x4e4   :  { %2851 = vmatpush.bf16.msrb.mxu1 %v5278_v45  ;;  %v5182_v12 = vor.u32 %v6058_v63, %v5181_v9  ;;  %v5246_v43 = vor.u32 %v6074_v38, %v5245_v37  ;;  %v5250_v45 = vor.u32 %v6073_v18, %v5247_v44 }
 0x4e5   :  { %2560 = vmatmul.bf16.vlgmr.msra.gmra.mxu1 %v2338_v6  ;;  %2586 = vmatmul.bf16.vlgmr.msra.gmra.mxu3 %v2338_v6  ;;  %v6057_v6 = vld [vmem:[%s8882_s9 + $0x624] sm:$0xf] }
 0x4e6   :  { %2840 = vmatpush.bf16.msrb.mxu0 %v5198_v51  ;;  %2879 = vmatpush.bf16.msrb.mxu3 %v5266_v8  ;;  %v5186_v15 = vor.u32 %v6057_v6, %v5183_v14  ;;  %v5167_v51 = vld [vmem:[%s8882_s9 + $0x608] sm:$0xf0] }
 0x4e7   :  { %v5170_v53 = vor.u32 %v6053_v48, %v5167_v51  ;;  %v6098_v48 = vld [vmem:[%s8882_s9 + $0x764] sm:$0xf0]  ;;  %v5378_v51 = vld [vmem:[%s8882_s9 + $0x768] sm:$0xf0] }
 0x4e8   :  { %2852 = vmatpush.bf16.msrb.mxu1 %v5270_v56  ;;  %2868 = vmatpush.bf16.msrb.mxu2 %v5186_v15  ;;  %v5238_v56 = vor.u32 %v6072_v42, %v5237_v39  ;;  %v6116_v39 = vld [vmem:[%s8882_s9 + $0x7f4] sm:$0xf0]  ;;  %v6115_v42 = vld [vmem:[%s8882_s9 + $0x7f4] sm:$0xf] }
 0x4ea   :  { %2841 = vmatpush.bf16.msrb.mxu0 %v5190_v62  ;;  %2880 = vmatpush.bf16.msrb.mxu3 %v5258_v28  ;;  %v5229_v62 = vld [vmem:[%s8882_s9 + $0x680] sm:$0xf] }
 0x4eb   :  { %v5230_v41 = vor.u32 %v6070_v1, %v5229_v62  ;;  %v5440_v1 = vld [vmem:[%s8882_s9 + $0x7e0] sm:$0xf] }
 0x4ec   :  { %2853 = vmatpush.bf16.msrb.mxu1 %v5262_v26  ;;  %2869 = vmatpush.bf16.msrb.mxu2 %v5178_v11 }
 0x4ee   :  { %2842 = vmatpush.bf16.msrb.mxu0 %v5182_v12  ;;  %2881 = vmatpush.bf16.msrb.mxu3 %v5250_v45  ;;  %v5386_v45 = vld [vmem:[%s8882_s9 + $0x778] sm:$0xf0] }
 0x4f0   :  { %2854 = vmatpush.bf16.msrb.mxu1 %v5254_v22  ;;  %2870 = vmatpush.bf16.msrb.mxu2 %v5170_v53  ;;  %v5448_v53 = vld [vmem:[%s8882_s9 + $0x7f0] sm:$0xf] }
 0x4f1   :  { %v5449_v54 = vor.u32 %v6116_v39, %v5448_v53  ;;  %v5338_v39 = vld [vmem:[%s8882_s9 + $0x718] sm:$0xf0] }
 0x4f2   :  { %2843 = vmatpush.bf16.msrb.mxu0 %v5174_v10  ;;  %2882 = vmatpush.bf16.msrb.mxu3 %v5242_v61 }
 0x4f4   :  { %2855 = vmatpush.bf16.msrb.mxu1 %v5246_v43  ;;  %v6100_v43 = vld [vmem:[%s8882_s9 + $0x774] sm:$0xf0] }
 0x4f6   :  { %2844 = vmatpush.bf16.msrb.mxu0 %v5166_v50  ;;  %v5377_v50 = vor.u32 %v6098_v48, %v5376_v47  ;;  %v5418_v48 = vld [vmem:[%s8882_s9 + $0x7b8] sm:$0xf0] }
 0x4f8   :  { %2856 = vmatpush.bf16.msrb.mxu1 %v5238_v56 }
 0x4fc   :  { %2857 = vmatpush.bf16.msrb.mxu1 %v5230_v41 }
 0x500   :  { %3144 = vmatpush.bf16.msra.mxu1 %v5449_v54  ;;  %v5408_v54 = vld [vmem:[%s8882_s9 + $0x7a0] sm:$0xf] }
 0x55c   :  { %v2548_v2 = vpop.f32.mrf.mxu0 }
 0x55d   :  { %v2549_v21 = vadd.f32 %v2548_v2, %v2375_v40  ;;  %v6069_v2 = vld [vmem:[%s8882_s9 + $0x684] sm:$0xf] }
 0x55e   :  { %v5234_v40 = vor.u32 %v6069_v2, %v5231_v4  ;;  %v6114_v2 = vld [vmem:[%s8882_s9 + $0x7e4] sm:$0xf0]  ;;  %v5442_v4 = vld [vmem:[%s8882_s9 + $0x7e8] sm:$0xf0] }
 0x55f   :  { %v5441_v41 = vor.u32 %v6114_v2, %v5440_v1  ;;  %v5328_v1 = vld [vmem:[%s8882_s9 + $0x700] sm:$0xf]  ;;  %v6086_v2 = vld [vmem:[%s8882_s9 + $0x704] sm:$0xf0] }
 0x560   :  { %2883 = vmatpush.bf16.msrb.mxu3 %v5234_v40  ;;  %v5360_v40 = vld [vmem:[%s8882_s9 + $0x740] sm:$0xf] }
 0x561   :  { %3145 = vmatpush.bf16.msra.mxu1 %v5441_v41 }
 0x562   :  { %v2561_v24 = vpop.f32.mrf.mxu1  ;;  %v2574_v27 = vpop.f32.mrf.mxu2 }
 0x563   :  { %v8145_v33 = vadd.f32 %v2561_v24, %v2549_v21  ;;  %v2575_v49 = vadd.f32 %v2574_v27, %v2376_v25 }
 0x564   :  { %v2550_v36 = vpop.f32.mrf.mxu0 }
 0x565   :  { %v5128_v19 = vmul.f32 -1.442695, %v8145_v33 }
 0x567   :  { %6258 = vpow2.f32 %v5128_v19  ;;  %v5384_v19 = vld [vmem:[%s8882_s9 + $0x770] sm:$0xf] }
 0x568   :  { %v2587_v52 = vpop.f32.mrf.mxu3  ;;  %v5385_v44 = vor.u32 %v6100_v43, %v5384_v19 }
 0x569   :  { %v2588_v55 = vadd.f32 %v2587_v52, %v2575_v49  ;;  %v6097_v49 = vld [vmem:[%s8882_s9 + $0x764] sm:$0xf] }
 0x56a   :  { %v2563_v60 = vpop.f32.mrf.mxu1  ;;  %v2576_v59 = vpop.f32.mrf.mxu2  ;;  %3131 = vmatpush.bf16.msra.mxu0 %v5385_v44  ;;  %v5381_v52 = vor.u32 %v6097_v49, %v5378_v51  ;;  %v6108_v44 = vld [vmem:[%s8882_s9 + $0x7b4] sm:$0xf0] }
 0x56b   :  { %v5129_v58 = vmul.f32 -1.442695, %v2588_v55  ;;  %v6096_v60 = vld [vmem:[%s8882_s9 + $0x754] sm:$0xf0]  ;;  %v6095_v59 = vld [vmem:[%s8882_s9 + $0x754] sm:$0xf] }
 0x56c   :  { %v5369_v61 = vor.u32 %v6096_v60, %v5368_v57  ;;  %v6088_v51 = vld [vmem:[%s8882_s9 + $0x714] sm:$0xf0] }
 0x56d   :  { %v6259_v3 = vpop.eup %6258  ;;  %6260 = vpow2.f32 %v5129_v58  ;;  %v5370_v58 = vld [vmem:[%s8882_s9 + $0x758] sm:$0xf0] }
 0x56e   :  { %v2597_v5 = vadd.f32 1.0, %v6259_v3  ;;  %3132 = vmatpush.bf16.msra.mxu0 %v5377_v50  ;;  %v5373_v62 = vor.u32 %v6095_v59, %v5370_v58  ;;  %v6113_v3 = vld [vmem:[%s8882_s9 + $0x7e4] sm:$0xf]  ;;  %v5336_v50 = vld [vmem:[%s8882_s9 + $0x710] sm:$0xf] }
 0x56f   :  { %v5337_v53 = vor.u32 %v6088_v51, %v5336_v50  ;;  %v5410_v59 = vld [vmem:[%s8882_s9 + $0x7a8] sm:$0xf0] }
 0x570   :  { %6262 = vrcp.f32 %v2597_v5  ;;  %v2589_v26 = vpop.f32.mrf.mxu3  ;;  %v2610_v12 = vand.u32 2147483648, %v2597_v5  ;;  %v2608_v15 = vand.u32 2147483647, %v2597_v5  ;;  %vm2604_vm7 = vweird.f32 %v2597_v5 }
 0x571   :  { %v6094_v26 = vld [vmem:[%s8882_s9 + $0x744] sm:$0xf0] }
 0x572   :  { %v2611_v21 = vor.u32 1.1754944e-38, %v2610_v12  ;;  %vm2609_vm9 = vcmp.eq.f32.partialorder %v2608_v15, 8.507059e+37  ;;  %3133 = vmatpush.bf16.msra.mxu0 %v5369_v61  ;;  %v6112_v12 = vld [vmem:[%s8882_s9 + $0x7d4] sm:$0xf0] }
 0x573   :  { %v6261_v7 = vpop.eup %6260 }
 0x574   :  { %v2598_v8 = vadd.f32 1.0, %v6261_v7  ;;  %v6093_v7 = vld [vmem:[%s8882_s9 + $0x744] sm:$0xf] }
 0x576   :  { %v6263_v9 = vpop.eup %6262  ;;  %6264 = vrcp.f32 %v2598_v8  ;;  %v2625_v27 = vand.u32 2147483648, %v2598_v8  ;;  %v2623_v31 = vand.u32 2147483647, %v2598_v8  ;;  %vm2619_vm11 = vweird.f32 %v2598_v8 }
 0x577   :  { %v2600_v63 = vmul.f32 %v6263_v9, %v2597_v5  ;;  %vm2605_vm6 = vweird.f32 %v6263_v9  ;;  %v5445_v5 = vor.u32 %v6113_v3, %v5442_v4  ;;  %v6085_v3 = vld [vmem:[%s8882_s9 + $0x704] sm:$0xf] }
 0x578   :  { %vm2606_vm8 = vmor %vm2604_vm7, %vm2605_vm6  ;;  %v2626_v10 = vor.u32 1.1754944e-38, %v2625_v27  ;;  %vm2624_vm13 = vcmp.eq.f32.partialorder %v2623_v31, 8.507059e+37  ;;  %v6109_v31 = vld [vmem:[%s8882_s9 + $0x7c4] sm:$0xf] }
 0x579   :  { %v2601_v6 = vsub.f32 1.0, %v2600_v63 }
 0x57b   :  { %v2602_v14 = vmul.f32 %v6263_v9, %v2601_v6  ;;  %v5432_v6 = vld [vmem:[%s8882_s9 + $0x7d0] sm:$0xf] }
 0x57c   :  { %v6265_v16 = vpop.eup %6264  ;;  %v5433_v15 = vor.u32 %v6112_v12, %v5432_v6 }
 0x57d   :  { %v2603_v17 = vadd.f32 %v6263_v9, %v2602_v14  ;;  %v2615_v20 = vmul.f32 %v6265_v16, %v2598_v8  ;;  %vm2620_vm10 = vweird.f32 %v6265_v16  ;;  %v5361_v8 = vor.u32 %v6094_v26, %v5360_v40  ;;  %v6111_v14 = vld [vmem:[%s8882_s9 + $0x7d4] sm:$0xf]  ;;  %v5330_v40 = vld [vmem:[%s8882_s9 + $0x708] sm:$0xf0] }
 0x57e   :  { %vm2621_vm12 = vmor %vm2619_vm11, %vm2620_vm10  ;;  %3146 = vmatpush.bf16.msra.mxu1 %v5433_v15 }
 0x57f   :  { %v2607_v22 = vsel %vm2606_vm8, %v6263_v9, %v2603_v17  ;;  %v2616_v23 = vsub.f32 1.0, %v2615_v20  ;;  %v5362_v9 = vld [vmem:[%s8882_s9 + $0x748] sm:$0xf0]  ;;  %3134 = vmatpush.bf16.msra.mxu0 %v5361_v8  ;;  %v5352_v20 = vld [vmem:[%s8882_s9 + $0x730] sm:$0xf] }
 0x580   :  { %v2612_v24 = vsel %vm2609_vm9, %v2611_v21, %v2607_v22  ;;  %v5365_v63 = vor.u32 %v6093_v7, %v5362_v9  ;;  %v6092_v21 = vld [vmem:[%s8882_s9 + $0x734] sm:$0xf0]  ;;  %v6091_v22 = vld [vmem:[%s8882_s9 + $0x734] sm:$0xf]  ;;  %v5333_v7 = vor.u32 %v6085_v3, %v5330_v40  ;;  %v5400_v8 = vld [vmem:[%s8882_s9 + $0x790] sm:$0xf] }
 0x581   :  { %v2629_v28 = vmul.f32 %v2612_v24, %v8145_v33  ;;  %v2617_v30 = vmul.f32 %v6265_v16, %v2616_v23  ;;  %v5353_v23 = vor.u32 %v6092_v21, %v5352_v20  ;;  %v5354_v24 = vld [vmem:[%s8882_s9 + $0x738] sm:$0xf0]  ;;  %v6104_v9 = vld [vmem:[%s8882_s9 + $0x794] sm:$0xf0]  ;;  %v5392_v20 = vld [vmem:[%s8882_s9 + $0x780] sm:$0xf] }
 0x582   :  { %v5357_v27 = vor.u32 %v6091_v22, %v5354_v24  ;;  %v5401_v12 = vor.u32 %v6104_v9, %v5400_v8  ;;  %v6102_v21 = vld [vmem:[%s8882_s9 + $0x784] sm:$0xf0]  ;;  %v6101_v22 = vld [vmem:[%s8882_s9 + $0x784] sm:$0xf]  ;;  %v5611_v8 = vld [vmem:[%s8882_s9 + $0x8f0] sm:$0xf] }
 0x583   :  { %v2631_v32 = vadd.f32 %v2629_v28, %v7591_v29  ;;  %v2618_v25 = vadd.f32 %v6265_v16, %v2617_v30  ;;  %v5424_v28 = vld [vmem:[%s8882_s9 + $0x7c0] sm:$0xf]  ;;  %v6110_v30 = vld [vmem:[%s8882_s9 + $0x7c4] sm:$0xf0]  ;;  %3135 = vmatpush.bf16.msra.mxu0 %v5353_v23  ;;  %v5393_v24 = vor.u32 %v6102_v21, %v5392_v20  ;;  %v6148_v9 = vld [vmem:[%s8882_s9 + $0x8f4] sm:$0xf0] }
 0x584   :  { %v5533_v21 = vld [vmem:[%s8882_s9 + $0x858] sm:$0xf0] }
 0x585   :  { %v8202_v35 = vmul.f32 0.70710677, %v2631_v32  ;;  %v2622_v36 = vsel %vm2621_vm12, %v6265_v16, %v2618_v25  ;;  %v5434_v16 = vld [vmem:[%s8882_s9 + $0x7d8] sm:$0xf0]  ;;  %v8319_v32 = vld [vmem:[%s8887_s10 + $0xc] sm:$0x3]  ;;  %v5425_v25 = vor.u32 %v6110_v30, %v5424_v28 }
 0x586   :  { %v2627_v11 = vsel %vm2624_vm13, %v2626_v10, %v2622_v36  ;;  %v5437_v17 = vor.u32 %v6111_v14, %v5434_v16  ;;  %v5426_v10 = vld [vmem:[%s8882_s9 + $0x7c8] sm:$0xf0]  ;;  %v2674_v4 = vperm.slane %v8319_v32, 1  ;;  %v5402_v14 = vld [vmem:[%s8882_s9 + $0x798] sm:$0xf0] }
 0x587   :  { %v2635_v37 = vpack.c.bf16 %v8202_v35, %v8202_v35  ;;  %v2630_v38 = vmul.f32 %v2627_v11, %v2588_v55  ;;  %v5450_v55 = vld [vmem:[%s8882_s9 + $0x7f8] sm:$0xf0]  ;;  %v5429_v36 = vor.u32 %v6109_v31, %v5426_v10  ;;  %v5344_v11 = vld [vmem:[%s8882_s9 + $0x720] sm:$0xf]  ;;  %3147 = vmatpush.bf16.msra.mxu1 %v5425_v25 }
 0x588   :  { %v5453_v56 = vor.u32 %v6115_v42, %v5450_v55  ;;  %v6106_v55 = vld [vmem:[%s8882_s9 + $0x7a4] sm:$0xf0] }
 0x589   :  { %v2632_v33 = vadd.f32 %v2630_v38, %v7596_v34  ;;  %2845 = vmatmul.bf16.vlgmr.msrb.gmra.mxu0 %v2635_v37  ;;  %2871 = vmatmul.bf16.vlgmr.msrb.gmra.mxu2 %v2635_v37  ;;  %v6099_v34 = vld [vmem:[%s8882_s9 + $0x774] sm:$0xf]  ;;  %v6090_v37 = vld [vmem:[%s8882_s9 + $0x724] sm:$0xf0]  ;;  %v6089_v38 = vld [vmem:[%s8882_s9 + $0x724] sm:$0xf]  ;;  %v5409_v60 = vor.u32 %v6106_v55, %v5408_v54 }
 0x58a   :  { %v5389_v46 = vor.u32 %v6099_v34, %v5386_v45  ;;  %3170 = vmatpush.bf16.msra.mxu3 %v5453_v56  ;;  %v5416_v34 = vld [vmem:[%s8882_s9 + $0x7b0] sm:$0xf]  ;;  %v6107_v45 = vld [vmem:[%s8882_s9 + $0x7b4] sm:$0xf]  ;;  %v6105_v56 = vld [vmem:[%s8882_s9 + $0x7a4] sm:$0xf] }
 0x58b   :  { %v8207_v18 = vmul.f32 0.70710677, %v2632_v33  ;;  %v5345_v33 = vor.u32 %v6090_v37, %v5344_v11  ;;  %v5417_v47 = vor.u32 %v6108_v44, %v5416_v34  ;;  %v5421_v49 = vor.u32 %v6107_v45, %v5418_v48 }
 0x58c   :  { %3157 = vmatpush.bf16.msra.mxu2 %v5389_v46  ;;  %v2673_v46 = vperm.slane %v8319_v32, 0 }
 0x58d   :  { %v2636_v29 = vpack.c.bf16 %v8207_v18, %v8207_v18  ;;  %3136 = vmatpush.bf16.msra.mxu0 %v5345_v33  ;;  %3148 = vmatpush.bf16.msra.mxu1 %v5417_v47 }
 0x58e   :  { %3171 = vmatpush.bf16.msra.mxu3 %v5445_v5  ;;  %v5329_v5 = vor.u32 %v6086_v2, %v5328_v1  ;;  %v5549_v2 = vld [vmem:[%s8882_s9 + $0x878] sm:$0xf0] }
 0x58f   :  { %2858 = vmatmul.bf16.vlgmr.msrb.gmra.mxu1 %v2636_v29  ;;  %2884 = vmatmul.bf16.vlgmr.msrb.gmra.mxu3 %v2636_v29  ;;  %v5346_v29 = vld [vmem:[%s8882_s9 + $0x728] sm:$0xf0] }
 0x590   :  { %3158 = vmatpush.bf16.msra.mxu2 %v5381_v52  ;;  %v5349_v43 = vor.u32 %v6089_v38, %v5346_v29  ;;  %v6087_v52 = vld [vmem:[%s8882_s9 + $0x714] sm:$0xf] }
 0x591   :  { %v5341_v42 = vor.u32 %v6087_v52, %v5338_v39  ;;  %3137 = vmatpush.bf16.msra.mxu0 %v5337_v53  ;;  %3149 = vmatpush.bf16.msra.mxu1 %v5409_v60 }
 0x592   :  { %3172 = vmatpush.bf16.msra.mxu3 %v5437_v17 }
 0x594   :  { %3159 = vmatpush.bf16.msra.mxu2 %v5373_v62  ;;  %v5413_v62 = vor.u32 %v6105_v56, %v5410_v59 }
 0x595   :  { %3138 = vmatpush.bf16.msra.mxu0 %v5329_v5  ;;  %3150 = vmatpush.bf16.msra.mxu1 %v5401_v12  ;;  %v6129_v5 = vld [vmem:[%s8882_s9 + $0x864] sm:$0xf]  ;;  %v5613_v12 = vld [vmem:[%s8882_s9 + $0x8f8] sm:$0xf0] }
 0x596   :  { %3173 = vmatpush.bf16.msra.mxu3 %v5429_v36 }
 0x598   :  { %3160 = vmatpush.bf16.msra.mxu2 %v5365_v63  ;;  %v6103_v63 = vld [vmem:[%s8882_s9 + $0x794] sm:$0xf] }
 0x599   :  { %v5405_v15 = vor.u32 %v6103_v63, %v5402_v14  ;;  %3151 = vmatpush.bf16.msra.mxu1 %v5393_v24  ;;  %v6147_v63 = vld [vmem:[%s8882_s9 + $0x8f4] sm:$0xf]  ;;  %v6146_v24 = vld [vmem:[%s8882_s9 + $0x8e4] sm:$0xf0] }
 0x59a   :  { %3174 = vmatpush.bf16.msra.mxu3 %v5421_v49  ;;  %v5616_v14 = vor.u32 %v6147_v63, %v5613_v12  ;;  %v6138_v12 = vld [vmem:[%s8882_s9 + $0x8a4] sm:$0xf0] }
 0x59c   :  { %3161 = vmatpush.bf16.msra.mxu2 %v5357_v27  ;;  %v5394_v27 = vld [vmem:[%s8882_s9 + $0x788] sm:$0xf0] }
 0x59d   :  { %v5397_v31 = vor.u32 %v6101_v22, %v5394_v27  ;;  %v6145_v27 = vld [vmem:[%s8882_s9 + $0x8e4] sm:$0xf] }
 0x59e   :  { %3175 = vmatpush.bf16.msra.mxu3 %v5413_v62  ;;  %v6131_v62 = vld [vmem:[%s8882_s9 + $0x874] sm:$0xf] }
 0x59f   :  { %v5552_v3 = vor.u32 %v6131_v62, %v5549_v2  ;;  %v5579_v62 = vld [vmem:[%s8882_s9 + $0x8b0] sm:$0xf]  ;;  %v6139_v2 = vld [vmem:[%s8882_s9 + $0x8b4] sm:$0xf] }
 0x5a0   :  { %3162 = vmatpush.bf16.msra.mxu2 %v5349_v43 }
 0x5a2   :  { %3176 = vmatpush.bf16.msra.mxu3 %v5405_v15  ;;  %v5531_v15 = vld [vmem:[%s8882_s9 + $0x850] sm:$0xf] }
 0x5a4   :  { %3163 = vmatpush.bf16.msra.mxu2 %v5341_v42 }
 0x5a6   :  { %3177 = vmatpush.bf16.msra.mxu3 %v5397_v31 }
 0x5a8   :  { %3164 = vmatpush.bf16.msra.mxu2 %v5333_v7 }
 0x5aa   :  { %3464 = vmatpush.bf16.msrb.mxu3 %v5616_v14  ;;  %v6137_v14 = vld [vmem:[%s8882_s9 + $0x8a4] sm:$0xf] }
 0x5ac   :  { %3451 = vmatpush.bf16.msrb.mxu2 %v5552_v3 }
 0x606   :  { %v2846_v19 = vpop.f32.mrf.mxu0 }
 0x607   :  { %v2847_v57 = vadd.f32 %v2846_v19, %v2673_v46 }
 0x60c   :  { %v2859_v61 = vpop.f32.mrf.mxu1  ;;  %v2872_v58 = vpop.f32.mrf.mxu2 }
 0x60d   :  { %v2860_v41 = vadd.f32 %v2859_v61, %v2847_v57  ;;  %v2873_v16 = vadd.f32 %v2872_v58, %v2674_v4  ;;  %v5547_v61 = vld [vmem:[%s8882_s9 + $0x870] sm:$0xf]  ;;  %v6132_v58 = vld [vmem:[%s8882_s9 + $0x874] sm:$0xf0]  ;;  %v6130_v4 = vld [vmem:[%s8882_s9 + $0x864] sm:$0xf0] }
 0x60e   :  { %v2848_v26 = vpop.f32.mrf.mxu0  ;;  %v5548_v1 = vor.u32 %v6132_v58, %v5547_v61 }
 0x60f   :  { %v5291_v6 = vmul.f32 -1.442695, %v2860_v41  ;;  %v5541_v26 = vld [vmem:[%s8882_s9 + $0x868] sm:$0xf0] }
 0x610   :  { %3425 = vmatpush.bf16.msrb.mxu0 %v5548_v1  ;;  %v5544_v7 = vor.u32 %v6129_v5, %v5541_v26  ;;  %v6140_v1 = vld [vmem:[%s8882_s9 + $0x8b4] sm:$0xf0] }
 0x611   :  { %6266 = vpow2.f32 %v5291_v6  ;;  %v5612_v6 = vor.u32 %v6148_v9, %v5611_v8  ;;  %v6120_v26 = vld [vmem:[%s8882_s9 + $0x814] sm:$0xf0]  ;;  %v5501_v9 = vld [vmem:[%s8882_s9 + $0x818] sm:$0xf0] }
 0x612   :  { %v2885_v17 = vpop.f32.mrf.mxu3  ;;  %3452 = vmatpush.bf16.msrb.mxu2 %v5544_v7  ;;  %v6119_v7 = vld [vmem:[%s8882_s9 + $0x814] sm:$0xf] }
 0x613   :  { %v2886_v23 = vadd.f32 %v2885_v17, %v2873_v16  ;;  %v6128_v16 = vld [vmem:[%s8882_s9 + $0x854] sm:$0xf0]  ;;  %v6127_v17 = vld [vmem:[%s8882_s9 + $0x854] sm:$0xf]  ;;  %3438 = vmatpush.bf16.msrb.mxu1 %v5612_v6  ;;  %v5504_v63 = vor.u32 %v6119_v7, %v5501_v9  ;;  %v5571_v6 = vld [vmem:[%s8882_s9 + $0x8a0] sm:$0xf] }
 0x614   :  { %v2861_v28 = vpop.f32.mrf.mxu1  ;;  %v2874_v30 = vpop.f32.mrf.mxu2  ;;  %v5532_v20 = vor.u32 %v6128_v16, %v5531_v15  ;;  %v5536_v22 = vor.u32 %v6127_v17, %v5533_v21  ;;  %v5572_v16 = vor.u32 %v6138_v12, %v5571_v6  ;;  %v5573_v17 = vld [vmem:[%s8882_s9 + $0x8a8] sm:$0xf0] }
 0x615   :  { %v5292_v32 = vmul.f32 -1.442695, %v2886_v23  ;;  %v5605_v30 = vld [vmem:[%s8882_s9 + $0x8e8] sm:$0xf0] }
 0x616   :  { %3453 = vmatpush.bf16.msrb.mxu2 %v5536_v22  ;;  %v5608_v31 = vor.u32 %v6145_v27, %v5605_v30  ;;  %v5576_v22 = vor.u32 %v6137_v14, %v5573_v17  ;;  %v6117_v27 = vld [vmem:[%s8882_s9 + $0x804] sm:$0xf] }
 0x617   :  { %v6267_v25 = vpop.eup %6266  ;;  %6268 = vpow2.f32 %v5292_v32  ;;  %v5523_v32 = vld [vmem:[%s8882_s9 + $0x840] sm:$0xf] }
 0x618   :  { %v2895_v10 = vadd.f32 1.0, %v6267_v25  ;;  %v6126_v25 = vld [vmem:[%s8882_s9 + $0x844] sm:$0xf0]  ;;  %3465 = vmatpush.bf16.msrb.mxu3 %v5608_v31 }
 0x61a   :  { %6270 = vrcp.f32 %v2895_v10  ;;  %v2887_v36 = vpop.f32.mrf.mxu3  ;;  %v2908_v19 = vand.u32 2147483648, %v2895_v10  ;;  %v2906_v34 = vand.u32 2147483647, %v2895_v10  ;;  %vm2902_vm15 = vweird.f32 %v2895_v10 }
 0x61b   :  { %v5524_v36 = vor.u32 %v6126_v25, %v5523_v32  ;;  %v5493_v32 = vld [vmem:[%s8882_s9 + $0x808] sm:$0xf0] }
 0x61c   :  { %v2909_v47 = vor.u32 1.1754944e-38, %v2908_v19  ;;  %vm2907_vm1 = vcmp.eq.f32.partialorder %v2906_v34, 8.507059e+37 }
 0x61d   :  { %v6269_v11 = vpop.eup %6268 }
 0x61e   :  { %v2896_v37 = vadd.f32 1.0, %v6269_v11  ;;  %v5525_v11 = vld [vmem:[%s8882_s9 + $0x848] sm:$0xf0] }
 0x620   :  { %v6271_v38 = vpop.eup %6270  ;;  %6272 = vrcp.f32 %v2896_v37  ;;  %v2923_v51 = vand.u32 2147483648, %v2896_v37  ;;  %v2921_v39 = vand.u32 2147483647, %v2896_v37  ;;  %vm2917_vm3 = vweird.f32 %v2896_v37 }
 0x621   :  { %v2898_v33 = vmul.f32 %v6271_v38, %v2895_v10  ;;  %vm2903_vm14 = vweird.f32 %v6271_v38  ;;  %v6125_v10 = vld [vmem:[%s8882_s9 + $0x844] sm:$0xf] }
 0x622   :  { %vm2904_vm0 = vmor %vm2902_vm15, %vm2903_vm14  ;;  %v2924_v55 = vor.u32 1.1754944e-38, %v2923_v51  ;;  %vm2922_vm5 = vcmp.eq.f32.partialorder %v2921_v39, 8.507059e+37  ;;  %v6142_v51 = vld [vmem:[%s8882_s9 + $0x8c4] sm:$0xf0] }
 0x623   :  { %v2899_v29 = vsub.f32 1.0, %v2898_v33  ;;  %v6144_v33 = vld [vmem:[%s8882_s9 + $0x8d4] sm:$0xf0] }
 0x625   :  { %v2900_v43 = vmul.f32 %v6271_v38, %v2899_v29  ;;  %v6143_v29 = vld [vmem:[%s8882_s9 + $0x8d4] sm:$0xf] }
 0x626   :  { %v6273_v44 = vpop.eup %6272 }
 0x627   :  { %v2901_v45 = vadd.f32 %v6271_v38, %v2900_v43  ;;  %v2913_v46 = vmul.f32 %v6273_v44, %v2896_v37  ;;  %vm2918_vm2 = vweird.f32 %v6273_v44  ;;  %v5528_v37 = vor.u32 %v6125_v10, %v5525_v11  ;;  %v5597_v43 = vld [vmem:[%s8882_s9 + $0x8d8] sm:$0xf0]  ;;  %v6136_v11 = vld [vmem:[%s8882_s9 + $0x894] sm:$0xf0] }
 0x628   :  { %vm2919_vm4 = vmor %vm2917_vm3, %vm2918_vm2  ;;  %v5600_v34 = vor.u32 %v6143_v29, %v5597_v43  ;;  %v5496_v10 = vor.u32 %v6117_v27, %v5493_v32  ;;  %v5565_v29 = vld [vmem:[%s8882_s9 + $0x898] sm:$0xf0] }
 0x629   :  { %v2905_v48 = vsel %vm2904_vm0, %v6271_v38, %v2901_v45  ;;  %v2914_v49 = vsub.f32 1.0, %v2913_v46  ;;  %v5595_v38 = vld [vmem:[%s8882_s9 + $0x8d0] sm:$0xf]  ;;  %3454 = vmatpush.bf16.msrb.mxu2 %v5528_v37  ;;  %v6124_v45 = vld [vmem:[%s8882_s9 + $0x834] sm:$0xf0] }
 0x62a   :  { %v2910_v50 = vsel %vm2907_vm1, %v2909_v47, %v2905_v48  ;;  %v5596_v19 = vor.u32 %v6144_v33, %v5595_v38  ;;  %v6123_v46 = vld [vmem:[%s8882_s9 + $0x834] sm:$0xf]  ;;  %v5517_v48 = vld [vmem:[%s8882_s9 + $0x838] sm:$0xf0]  ;;  %3466 = vmatpush.bf16.msrb.mxu3 %v5600_v34 }
 0x62b   :  { %v2927_v52 = vmul.f32 %v2910_v50, %v2860_v41  ;;  %v2915_v53 = vmul.f32 %v6273_v44, %v2914_v49  ;;  %v5539_v41 = vld [vmem:[%s8882_s9 + $0x860] sm:$0xf]  ;;  %v5520_v49 = vor.u32 %v6123_v46, %v5517_v48  ;;  %v6135_v37 = vld [vmem:[%s8882_s9 + $0x894] sm:$0xf]  ;;  %v6133_v46 = vld [vmem:[%s8882_s9 + $0x884] sm:$0xf] }
 0x62c   :  { %v5540_v40 = vor.u32 %v6130_v4, %v5539_v41  ;;  %v5587_v50 = vld [vmem:[%s8882_s9 + $0x8c0] sm:$0xf]  ;;  %v5580_v41 = vor.u32 %v6140_v1, %v5579_v62  ;;  %v5581_v4 = vld [vmem:[%s8882_s9 + $0x8b8] sm:$0xf0] }
 0x62d   :  { %v2929_v42 = vpack.c.bf16 %v2927_v52, %v2927_v52  ;;  %v2916_v54 = vadd.f32 %v6273_v44, %v2915_v53  ;;  %v6141_v52 = vld [vmem:[%s8882_s9 + $0x8c4] sm:$0xf]  ;;  %v8518_v53 = vld [vmem:[%s8887_s10 + $0xe] sm:$0x3]  ;;  %v5588_v39 = vor.u32 %v6142_v51, %v5587_v50  ;;  %3455 = vmatpush.bf16.msrb.mxu2 %v5520_v49  ;;  %v5584_v5 = vor.u32 %v6139_v2, %v5581_v4 }
 0x62e   :  { %3426 = vmatpush.bf16.msrb.mxu0 %v5540_v40  ;;  %v2967_v3 = vperm.slane %v8518_v53, 0  ;;  %v5499_v40 = vld [vmem:[%s8882_s9 + $0x810] sm:$0xf]  ;;  %v2968_v30 = vperm.slane %v8518_v53, 1  ;;  %v5557_v49 = vld [vmem:[%s8882_s9 + $0x888] sm:$0xf0] }
 0x62f   :  { %v2920_v56 = vsel %vm2919_vm4, %v6273_v44, %v2916_v54  ;;  %3139 = vmatmul.bf16.vlgmr.msra.gmra.mxu0 %v2929_v42  ;;  %3165 = vmatmul.bf16.vlgmr.msra.gmra.mxu2 %v2929_v42  ;;  %v5515_v44 = vld [vmem:[%s8882_s9 + $0x830] sm:$0xf]  ;;  %v5589_v42 = vld [vmem:[%s8882_s9 + $0x8c8] sm:$0xf0]  ;;  %v5500_v8 = vor.u32 %v6120_v26, %v5499_v40 }
 0x630   :  { %v2925_v57 = vsel %vm2922_vm5, %v2924_v55, %v2920_v56  ;;  %v5516_v47 = vor.u32 %v6124_v45, %v5515_v44  ;;  %v5592_v54 = vor.u32 %v6141_v52, %v5589_v42  ;;  %v5507_v55 = vld [vmem:[%s8882_s9 + $0x820] sm:$0xf]  ;;  %v6122_v56 = vld [vmem:[%s8882_s9 + $0x824] sm:$0xf0]  ;;  %v5560_v52 = vor.u32 %v6133_v46, %v5557_v49  ;;  %v6177_v49 = vld [vmem:[%s8888_s11 + $0xe4] sm:$0xf] }
 0x631   :  { %v2928_v60 = vmul.f32 %v2925_v57, %v2886_v23  ;;  %v5603_v23 = vld [vmem:[%s8882_s9 + $0x8e0] sm:$0xf]  ;;  %v6121_v57 = vld [vmem:[%s8882_s9 + $0x824] sm:$0xf]  ;;  %v6134_v45 = vld [vmem:[%s8882_s9 + $0x884] sm:$0xf0] }
 0x632   :  { %3427 = vmatpush.bf16.msrb.mxu0 %v5532_v20  ;;  %v5604_v28 = vor.u32 %v6146_v24, %v5603_v23  ;;  %3467 = vmatpush.bf16.msrb.mxu3 %v5592_v54  ;;  %v5491_v23 = vld [vmem:[%s8882_s9 + $0x800] sm:$0xf]  ;;  %v6118_v24 = vld [vmem:[%s8882_s9 + $0x804] sm:$0xf0] }
 0x633   :  { %v2930_v59 = vpack.c.bf16 %v2928_v60, %v2928_v60  ;;  %v5508_v60 = vor.u32 %v6122_v56, %v5507_v55  ;;  %v5492_v31 = vor.u32 %v6118_v24, %v5491_v23  ;;  %v5555_v44 = vld [vmem:[%s8882_s9 + $0x880] sm:$0xf]  ;;  %v5679_v24 = vld [vmem:[%s8888_s11 + $0x78] sm:$0xf0] }
 0x634   :  { %3439 = vmatpush.bf16.msrb.mxu1 %v5604_v28  ;;  %v5556_v48 = vor.u32 %v6134_v45, %v5555_v44  ;;  %v5663_v45 = vld [vmem:[%s8888_s11 + $0x58] sm:$0xf0] }
 0x635   :  { %3152 = vmatmul.bf16.vlgmr.msra.gmra.mxu1 %v2930_v59  ;;  %3178 = vmatmul.bf16.vlgmr.msra.gmra.mxu3 %v2930_v59  ;;  %v5509_v59 = vld [vmem:[%s8882_s9 + $0x828] sm:$0xf0] }
 0x636   :  { %3428 = vmatpush.bf16.msrb.mxu0 %v5524_v36  ;;  %v5512_v58 = vor.u32 %v6121_v57, %v5509_v59  ;;  %3468 = vmatpush.bf16.msrb.mxu3 %v5584_v5  ;;  %v5563_v36 = vld [vmem:[%s8882_s9 + $0x890] sm:$0xf] }
 0x637   :  { %v5564_v33 = vor.u32 %v6136_v11, %v5563_v36  ;;  %v5741_v36 = vld [vmem:[%s8888_s11 + $0xf0] sm:$0xf]  ;;  %v6180_v11 = vld [vmem:[%s8888_s11 + $0xf4] sm:$0xf0] }
 0x638   :  { %3440 = vmatpush.bf16.msrb.mxu1 %v5596_v19  ;;  %3456 = vmatpush.bf16.msrb.mxu2 %v5512_v58  ;;  %v5568_v19 = vor.u32 %v6135_v37, %v5565_v29  ;;  %v6179_v37 = vld [vmem:[%s8888_s11 + $0xf4] sm:$0xf] }
 0x63a   :  { %3429 = vmatpush.bf16.msrb.mxu0 %v5516_v47  ;;  %3469 = vmatpush.bf16.msrb.mxu3 %v5576_v22  ;;  %v6163_v22 = vld [vmem:[%s8888_s11 + $0x74] sm:$0xf] }
 0x63b   :  { %v5682_v27 = vor.u32 %v6163_v22, %v5679_v24  ;;  %v5639_v22 = vld [vmem:[%s8888_s11 + $0x28] sm:$0xf0] }
 0x63c   :  { %3441 = vmatpush.bf16.msrb.mxu1 %v5588_v39  ;;  %3457 = vmatpush.bf16.msrb.mxu2 %v5504_v63 }
 0x63e   :  { %3430 = vmatpush.bf16.msrb.mxu0 %v5508_v60  ;;  %3470 = vmatpush.bf16.msrb.mxu3 %v5568_v19  ;;  %v5661_v19 = vld [vmem:[%s8888_s11 + $0x50] sm:$0xf] }
 0x640   :  { %3442 = vmatpush.bf16.msrb.mxu1 %v5580_v41  ;;  %3458 = vmatpush.bf16.msrb.mxu2 %v5496_v10 }
 0x642   :  { %3431 = vmatpush.bf16.msrb.mxu0 %v5500_v8  ;;  %3471 = vmatpush.bf16.msrb.mxu3 %v5560_v52 }
 0x644   :  { %3443 = vmatpush.bf16.msrb.mxu1 %v5572_v16  ;;  %3749 = vmatpush.bf16.msra.mxu2 %v5682_v27 }
 0x646   :  { %3432 = vmatpush.bf16.msrb.mxu0 %v5492_v31  ;;  %v6161_v31 = vld [vmem:[%s8888_s11 + $0x64] sm:$0xf] }
 0x648   :  { %3444 = vmatpush.bf16.msrb.mxu1 %v5564_v33  ;;  %v5743_v33 = vld [vmem:[%s8888_s11 + $0xf8] sm:$0xf0] }
 0x649   :  { %v5746_v29 = vor.u32 %v6179_v37, %v5743_v33  ;;  %v6152_v33 = vld [vmem:[%s8888_s11 + $0x14] sm:$0xf0] }
 0x64b   :  { %3762 = vmatpush.bf16.msra.mxu3 %v5746_v29  ;;  %v6151_v29 = vld [vmem:[%s8888_s11 + $0x14] sm:$0xf] }
 0x64c   :  { %3445 = vmatpush.bf16.msrb.mxu1 %v5556_v48  ;;  %v6178_v48 = vld [vmem:[%s8888_s11 + $0xe4] sm:$0xf0] }
 0x6ac   :  { %v3140_v61 = vpop.f32.mrf.mxu0 }
 0x6ad   :  { %v3141_v15 = vadd.f32 %v3140_v61, %v2967_v3 }
 0x6b2   :  { %v3153_v20 = vpop.f32.mrf.mxu1  ;;  %v3166_v21 = vpop.f32.mrf.mxu2 }
 0x6b3   :  { %v3154_v28 = vadd.f32 %v3153_v20, %v3141_v15  ;;  %v3167_v43 = vadd.f32 %v3166_v21, %v2968_v30  ;;  %v5677_v20 = vld [vmem:[%s8888_s11 + $0x70] sm:$0xf]  ;;  %v6164_v21 = vld [vmem:[%s8888_s11 + $0x74] sm:$0xf0]  ;;  %v6162_v30 = vld [vmem:[%s8888_s11 + $0x64] sm:$0xf0] }
 0x6b4   :  { %v3142_v25 = vpop.f32.mrf.mxu0  ;;  %v5678_v23 = vor.u32 %v6164_v21, %v5677_v20 }
 0x6b5   :  { %v5454_v38 = vmul.f32 -1.442695, %v3154_v28  ;;  %v5671_v25 = vld [vmem:[%s8888_s11 + $0x68] sm:$0xf0] }
 0x6b6   :  { %3723 = vmatpush.bf16.msra.mxu0 %v5678_v23  ;;  %v5674_v10 = vor.u32 %v6161_v31, %v5671_v25  ;;  %v6171_v31 = vld [vmem:[%s8888_s11 + $0xb4] sm:$0xf] }
 0x6b7   :  { %6274 = vpow2.f32 %v5454_v38  ;;  %v5742_v38 = vor.u32 %v6180_v11, %v5741_v36  ;;  %v5711_v36 = vld [vmem:[%s8888_s11 + $0xb8] sm:$0xf0] }
 0x6b8   :  { %v3179_v34 = vpop.f32.mrf.mxu3  ;;  %3750 = vmatpush.bf16.msra.mxu2 %v5674_v10  ;;  %v5714_v37 = vor.u32 %v6171_v31, %v5711_v36 }
 0x6b9   :  { %v3180_v47 = vadd.f32 %v3179_v34, %v3167_v43  ;;  %v6160_v43 = vld [vmem:[%s8888_s11 + $0x54] sm:$0xf0]  ;;  %v6159_v34 = vld [vmem:[%s8888_s11 + $0x54] sm:$0xf]  ;;  %3736 = vmatpush.bf16.msra.mxu1 %v5742_v38  ;;  %v5629_v38 = vld [vmem:[%s8888_s11 + $0x10] sm:$0xf] }
 0x6ba   :  { %v3155_v50 = vpop.f32.mrf.mxu1  ;;  %v3168_v51 = vpop.f32.mrf.mxu2  ;;  %v5662_v44 = vor.u32 %v6160_v43, %v5661_v19  ;;  %v5666_v46 = vor.u32 %v6159_v34, %v5663_v45  ;;  %v5630_v43 = vor.u32 %v6152_v33, %v5629_v38  ;;  %v5631_v34 = vld [vmem:[%s8888_s11 + $0x18] sm:$0xf0]  ;;  %v5701_v45 = vld [vmem:[%s8888_s11 + $0xa0] sm:$0xf] }
 0x6bb   :  { %v5455_v53 = vmul.f32 -1.442695, %v3180_v47  ;;  %v5735_v51 = vld [vmem:[%s8888_s11 + $0xe8] sm:$0xf0] }
 0x6bc   :  { %3751 = vmatpush.bf16.msra.mxu2 %v5666_v46  ;;  %v5738_v52 = vor.u32 %v6177_v49, %v5735_v51  ;;  %v6170_v46 = vld [vmem:[%s8888_s11 + $0xa4] sm:$0xf0] }
 0x6bd   :  { %v6275_v39 = vpop.eup %6274  ;;  %6276 = vpow2.f32 %v5455_v53  ;;  %v5653_v53 = vld [vmem:[%s8888_s11 + $0x40] sm:$0xf]  ;;  %v5702_v49 = vor.u32 %v6170_v46, %v5701_v45 }
 0x6be   :  { %v3189_v42 = vadd.f32 1.0, %v6275_v39  ;;  %v6158_v39 = vld [vmem:[%s8888_s11 + $0x44] sm:$0xf0]  ;;  %3763 = vmatpush.bf16.msra.mxu3 %v5738_v52 }
 0x6c0   :  { %6278 = vrcp.f32 %v3189_v42  ;;  %v3181_v54 = vpop.f32.mrf.mxu3  ;;  %v3202_v61 = vand.u32 2147483648, %v3189_v42  ;;  %v3200_v62 = vand.u32 2147483647, %v3189_v42  ;;  %vm3196_vm7 = vweird.f32 %v3189_v42 }
 0x6c1   :  { %v8681_v54 = vld [vmem:[%s8887_s10 + $0x10] sm:$0x3] }
 0x6c2   :  { %v3203_v41 = vor.u32 1.1754944e-38, %v3202_v61  ;;  %vm3201_vm9 = vcmp.eq.f32.partialorder %v3200_v62, 8.507059e+37  ;;  %v6175_v61 = vld [vmem:[%s8888_s11 + $0xd4] sm:$0xf]  ;;  %v5727_v62 = vld [vmem:[%s8888_s11 + $0xd8] sm:$0xf0] }
 0x6c3   :  { %v6277_v55 = vpop.eup %6276  ;;  %v3262_v25 = vperm.slane %v8681_v54, 1 }
 0x6c4   :  { %v3190_v56 = vadd.f32 1.0, %v6277_v55  ;;  %v5654_v55 = vor.u32 %v6158_v39, %v5653_v53  ;;  %v5621_v53 = vld [vmem:[%s8888_s11] sm:$0xf]  ;;  %v6150_v39 = vld [vmem:[%s8888_s11 + $0x4] sm:$0xf0] }
 0x6c6   :  { %v6279_v57 = vpop.eup %6278  ;;  %6280 = vrcp.f32 %v3190_v56  ;;  %v3217_v26 = vand.u32 2147483648, %v3190_v56  ;;  %v3215_v9 = vand.u32 2147483647, %v3190_v56  ;;  %vm3211_vm11 = vweird.f32 %v3190_v56 }
 0x6c7   :  { %v3192_v60 = vmul.f32 %v6279_v57, %v3189_v42  ;;  %vm3197_vm6 = vweird.f32 %v6279_v57  ;;  %v6157_v42 = vld [vmem:[%s8888_s11 + $0x44] sm:$0xf] }
 0x6c8   :  { %vm3198_vm8 = vmor %vm3196_vm7, %vm3197_vm6  ;;  %v3218_v12 = vor.u32 1.1754944e-38, %v3217_v26  ;;  %vm3216_vm13 = vcmp.eq.f32.partialorder %v3215_v9, 8.507059e+37  ;;  %v5647_v26 = vld [vmem:[%s8888_s11 + $0x38] sm:$0xf0]  ;;  %v6174_v9 = vld [vmem:[%s8888_s11 + $0xc4] sm:$0xf0] }
 0x6c9   :  { %v3193_v59 = vsub.f32 1.0, %v3192_v60  ;;  %v5725_v60 = vld [vmem:[%s8888_s11 + $0xd0] sm:$0xf] }
 0x6cb   :  { %v3194_v58 = vmul.f32 %v6279_v57, %v3193_v59  ;;  %v6176_v59 = vld [vmem:[%s8888_s11 + $0xd4] sm:$0xf0] }
 0x6cc   :  { %v6281_v1 = vpop.eup %6280 }
 0x6cd   :  { %v3195_v2 = vadd.f32 %v6279_v57, %v3194_v58  ;;  %v3207_v3 = vmul.f32 %v6281_v1, %v3190_v56  ;;  %vm3212_vm10 = vweird.f32 %v6281_v1  ;;  %v5655_v56 = vld [vmem:[%s8888_s11 + $0x48] sm:$0xf0]  ;;  %v5726_v58 = vor.u32 %v6176_v59, %v5725_v60 }
 0x6ce   :  { %vm3213_vm12 = vmor %vm3211_vm11, %vm3212_vm10 }
 0x6cf   :  { %v3199_v4 = vsel %vm3198_vm8, %v6279_v57, %v3195_v2  ;;  %v3208_v5 = vsub.f32 1.0, %v3207_v3  ;;  %v5658_v57 = vor.u32 %v6157_v42, %v5655_v56  ;;  %v5730_v2 = vor.u32 %v6175_v61, %v5727_v62  ;;  %v5645_v3 = vld [vmem:[%s8888_s11 + $0x30] sm:$0xf]  ;;  %v6149_v42 = vld [vmem:[%s8888_s11 + $0x4] sm:$0xf] }
 0x6d0   :  { %v3204_v40 = vsel %vm3201_vm9, %v3203_v41, %v3199_v4  ;;  %v6156_v41 = vld [vmem:[%s8888_s11 + $0x34] sm:$0xf0]  ;;  %v6155_v4 = vld [vmem:[%s8888_s11 + $0x34] sm:$0xf]  ;;  %v5623_v56 = vld [vmem:[%s8888_s11 + $0x8] sm:$0xf0] }
 0x6d1   :  { %v3221_v7 = vmul.f32 %v3204_v40, %v3154_v28  ;;  %v3209_v8 = vmul.f32 %v6281_v1, %v3208_v5  ;;  %v5669_v28 = vld [vmem:[%s8888_s11 + $0x60] sm:$0xf]  ;;  %3752 = vmatpush.bf16.msra.mxu2 %v5658_v57  ;;  %v3261_v5 = vperm.slane %v8681_v54, 0  ;;  %v5646_v40 = vor.u32 %v6156_v41, %v5645_v3  ;;  %3764 = vmatpush.bf16.msra.mxu3 %v5730_v2  ;;  %v5693_v61 = vld [vmem:[%s8888_s11 + $0x90] sm:$0xf] }
 0x6d2   :  { %v5670_v32 = vor.u32 %v6162_v30, %v5669_v28  ;;  %v5709_v28 = vld [vmem:[%s8888_s11 + $0xb0] sm:$0xf]  ;;  %v6172_v30 = vld [vmem:[%s8888_s11 + $0xb4] sm:$0xf0]  ;;  %v5626_v59 = vor.u32 %v6149_v42, %v5623_v56  ;;  %v6167_v62 = vld [vmem:[%s8888_s11 + $0x94] sm:$0xf] }
 0x6d3   :  { %v3223_v63 = vpack.c.bf16 %v3221_v7, %v3221_v7  ;;  %v3210_v6 = vadd.f32 %v6281_v1, %v3209_v8  ;;  %v5650_v7 = vor.u32 %v6155_v4, %v5647_v26  ;;  %v5717_v8 = vld [vmem:[%s8888_s11 + $0xc0] sm:$0xf]  ;;  %v5710_v10 = vor.u32 %v6172_v30, %v5709_v28  ;;  %v5695_v3 = vld [vmem:[%s8888_s11 + $0x98] sm:$0xf0]  ;;  %v6165_v26 = vld [vmem:[%s8888_s11 + $0x84] sm:$0xf] }
 0x6d4   :  { %3724 = vmatpush.bf16.msra.mxu0 %v5670_v32  ;;  %v5698_v41 = vor.u32 %v6167_v62, %v5695_v3  ;;  %v3557_v42 = vld [vmem:[%s8891_s12] sm:$0x3] }
 0x6d5   :  { %v3214_v14 = vsel %vm3213_vm12, %v6281_v1, %v3210_v6  ;;  %3433 = vmatmul.bf16.vlgmr.msrb.gmra.mxu0 %v3223_v63  ;;  %3459 = vmatmul.bf16.vlgmr.msrb.gmra.mxu2 %v3223_v63  ;;  %v6173_v63 = vld [vmem:[%s8888_s11 + $0xc4] sm:$0xf]  ;;  %v5718_v6 = vor.u32 %v6174_v9, %v5717_v8  ;;  %v5687_v9 = vld [vmem:[%s8888_s11 + $0x88] sm:$0xf0]  ;;  %v3559_v56 = vperm.slane %v3557_v42, 0 }
 0x6d6   :  { %v3219_v15 = vsel %vm3216_vm13, %v3218_v12, %v3214_v14  ;;  %v5719_v12 = vld [vmem:[%s8888_s11 + $0xc8] sm:$0xf0]  ;;  %3753 = vmatpush.bf16.msra.mxu2 %v5650_v7  ;;  %v6181_v3 = vld [vmem:[%s8890_s13] sm:$0xff] }
 0x6d7   :  { %v3222_v16 = vmul.f32 %v3219_v15, %v3180_v47  ;;  %v5733_v47 = vld [vmem:[%s8888_s11 + $0xe0] sm:$0xf]  ;;  %v5722_v14 = vor.u32 %v6173_v63, %v5719_v12  ;;  %v5690_v63 = vor.u32 %v6165_v26, %v5687_v9 }
 0x6d8   :  { %3725 = vmatpush.bf16.msra.mxu0 %v5662_v44  ;;  %v5734_v50 = vor.u32 %v6178_v48, %v5733_v47  ;;  %v5637_v15 = vld [vmem:[%s8888_s11 + $0x20] sm:$0xf]  ;;  %v5634_v44 = vor.u32 %v6151_v29, %v5631_v34  ;;  %v6169_v47 = vld [vmem:[%s8888_s11 + $0xa4] sm:$0xf] }
 0x6d9   :  { %v3224_v17 = vpack.c.bf16 %v3222_v16, %v3222_v16  ;;  %v6154_v16 = vld [vmem:[%s8888_s11 + $0x24] sm:$0xf0]  ;;  %3765 = vmatpush.bf16.msra.mxu3 %v5722_v14 }
 0x6da   :  { %3737 = vmatpush.bf16.msra.mxu1 %v5734_v50  ;;  %v5638_v21 = vor.u32 %v6154_v16, %v5637_v15  ;;  %v5703_v50 = vld [vmem:[%s8888_s11 + $0xa8] sm:$0xf0] }
 0x6db   :  { %3446 = vmatmul.bf16.vlgmr.msrb.gmra.mxu1 %v3224_v17  ;;  %3472 = vmatmul.bf16.vlgmr.msrb.gmra.mxu3 %v3224_v17  ;;  %v6153_v17 = vld [vmem:[%s8888_s11 + $0x24] sm:$0xf]  ;;  %v5706_v52 = vor.u32 %v6169_v47, %v5703_v50  ;;  %v6195_v50 = vld [vmem:[%s8890_s13 + $0x70] sm:$0xff] }
 0x6dc   :  { %3726 = vmatpush.bf16.msra.mxu0 %v5654_v55  ;;  %v5642_v27 = vor.u32 %v6153_v17, %v5639_v22  ;;  %v5622_v55 = vor.u32 %v6150_v39, %v5621_v53  ;;  %v6184_v53 = vld [vmem:[%s8890_s13 + $0x18] sm:$0xff]  ;;  %v6193_v39 = vld [vmem:[%s8890_s13 + $0x60] sm:$0xff] }
 0x6dd   :  { %3766 = vmatpush.bf16.msra.mxu3 %v5714_v37 }
 0x6de   :  { %3738 = vmatpush.bf16.msra.mxu1 %v5726_v58  ;;  %3754 = vmatpush.bf16.msra.mxu2 %v5642_v27  ;;  %v6168_v58 = vld [vmem:[%s8888_s11 + $0x94] sm:$0xf0] }
 0x6df   :  { %v5694_v2 = vor.u32 %v6168_v58, %v5693_v61  ;;  %v6191_v61 = vld [vmem:[%s8890_s13 + $0x50] sm:$0xff] }
 0x6e0   :  { %3727 = vmatpush.bf16.msra.mxu0 %v5646_v40  ;;  %v6166_v40 = vld [vmem:[%s8888_s11 + $0x84] sm:$0xf0] }
 0x6e1   :  { %3767 = vmatpush.bf16.msra.mxu3 %v5706_v52  ;;  %v6194_v52 = vld [vmem:[%s8890_s13 + $0x68] sm:$0xff] }
 0x6e2   :  { %3739 = vmatpush.bf16.msra.mxu1 %v5718_v6  ;;  %3755 = vmatpush.bf16.msra.mxu2 %v5634_v44 }
 0x6e4   :  { %3728 = vmatpush.bf16.msra.mxu0 %v5638_v21 }
 0x6e5   :  { %3768 = vmatpush.bf16.msra.mxu3 %v5698_v41 }
 0x6e6   :  { %3740 = vmatpush.bf16.msra.mxu1 %v5710_v10  ;;  %3756 = vmatpush.bf16.msra.mxu2 %v5626_v59 }
 0x6e8   :  { %3729 = vmatpush.bf16.msra.mxu0 %v5630_v43 }
 0x6e9   :  { %3769 = vmatpush.bf16.msra.mxu3 %v5690_v63 }
 0x6ea   :  { %3741 = vmatpush.bf16.msra.mxu1 %v5702_v49  ;;  %v6188_v49 = vld [vmem:[%s8890_s13 + $0x38] sm:$0xff] }
 0x6ec   :  { %3730 = vmatpush.bf16.msra.mxu0 %v5622_v55 }
 0x6ee   :  { %3742 = vmatpush.bf16.msra.mxu1 %v5694_v2  ;;  %v3560_v2 = vperm.slane %v3557_v42, 1 }
 0x6f0   :  { %3949 = vmatpush.bf16.msrb.mxu0 %v6188_v49 }
 0x752   :  { %v3434_v1 = vpop.f32.mrf.mxu0 }
 0x753   :  { %v3435_v20 = vadd.f32 %v3434_v1, %v3261_v5  ;;  %v5685_v5 = vld [vmem:[%s8888_s11 + $0x80] sm:$0xf] }
 0x754   :  { %v5686_v8 = vor.u32 %v6166_v40, %v5685_v5  ;;  %v6190_v5 = vld [vmem:[%s8890_s13 + $0x48] sm:$0xff] }
 0x756   :  { %3743 = vmatpush.bf16.msra.mxu1 %v5686_v8  ;;  %v6189_v8 = vld [vmem:[%s8890_s13 + $0x40] sm:$0xff] }
 0x758   :  { %v3447_v23 = vpop.f32.mrf.mxu1  ;;  %v3460_v24 = vpop.f32.mrf.mxu2 }
 0x759   :  { %v8744_v32 = vadd.f32 %v3447_v23, %v3435_v20  ;;  %v3461_v48 = vadd.f32 %v3460_v24, %v3262_v25 }
 0x75a   :  { %v3436_v11 = vpop.f32.mrf.mxu0 }
 0x75b   :  { %v5617_v19 = vmul.f32 -1.442695, %v8744_v32 }
 0x75d   :  { %6282 = vpow2.f32 %v5617_v19 }
 0x75e   :  { %v3473_v51 = vpop.f32.mrf.mxu3 }
 0x75f   :  { %v8784_v54 = vadd.f32 %v3473_v51, %v3461_v48  ;;  %v6185_v51 = vld [vmem:[%s8890_s13 + $0x20] sm:$0xff] }
 0x760   :  { %v3449_v57 = vpop.f32.mrf.mxu1  ;;  %v3462_v60 = vpop.f32.mrf.mxu2 }
 0x761   :  { %v5618_v1 = vmul.f32 -1.442695, %v8784_v54  ;;  %v6192_v57 = vld [vmem:[%s8890_s13 + $0x58] sm:$0xff]  ;;  %v6182_v60 = vld [vmem:[%s8890_s13 + $0x8] sm:$0xff] }
 0x763   :  { %v6283_v4 = vpop.eup %6282  ;;  %6284 = vpow2.f32 %v5618_v1 }
 0x764   :  { %v3483_v7 = vadd.f32 1.0, %v6283_v4 }
 0x766   :  { %6286 = vrcp.f32 %v3483_v7  ;;  %v3475_v6 = vpop.f32.mrf.mxu3  ;;  %v3496_v20 = vand.u32 2147483648, %v3483_v7  ;;  %v3494_v22 = vand.u32 2147483647, %v3483_v7  ;;  %vm3490_vm15 = vweird.f32 %v3483_v7 }
 0x768   :  { %v3497_v28 = vor.u32 1.1754944e-38, %v3496_v20  ;;  %vm3495_vm1 = vcmp.eq.f32.partialorder %v3494_v22, 8.507059e+37 }
 0x769   :  { %v6285_v12 = vpop.eup %6284 }
 0x76a   :  { %v3484_v14 = vadd.f32 1.0, %v6285_v12 }
 0x76c   :  { %v6287_v15 = vpop.eup %6286  ;;  %6288 = vrcp.f32 %v3484_v14  ;;  %v3511_v10 = vand.u32 2147483648, %v3484_v14  ;;  %v3509_v37 = vand.u32 2147483647, %v3484_v14  ;;  %vm3505_vm3 = vweird.f32 %v3484_v14 }
 0x76d   :  { %v3486_v16 = vmul.f32 %v6287_v15, %v3483_v7  ;;  %vm3491_vm14 = vweird.f32 %v6287_v15 }
 0x76e   :  { %vm3492_vm0 = vmor %vm3490_vm15, %vm3491_vm14  ;;  %v3512_v29 = vor.u32 1.1754944e-38, %v3511_v10  ;;  %vm3510_vm5 = vcmp.eq.f32.partialorder %v3509_v37, 8.507059e+37 }
 0x76f   :  { %v3487_v17 = vsub.f32 1.0, %v3486_v16 }
 0x771   :  { %v3488_v21 = vmul.f32 %v6287_v15, %v3487_v17 }
 0x772   :  { %v6289_v23 = vpop.eup %6288 }
 0x773   :  { %v3489_v24 = vadd.f32 %v6287_v15, %v3488_v21  ;;  %v3501_v27 = vmul.f32 %v6289_v23, %v3484_v14  ;;  %vm3506_vm2 = vweird.f32 %v6289_v23 }
 0x774   :  { %vm3507_vm4 = vmor %vm3505_vm3, %vm3506_vm2 }
 0x775   :  { %v3493_v30 = vsel %vm3492_vm0, %v6287_v15, %v3489_v24  ;;  %v3502_v31 = vsub.f32 1.0, %v3501_v27 }
 0x776   :  { %v3498_v25 = vsel %vm3495_vm1, %v3497_v28, %v3493_v30 }
 0x777   :  { %v3515_v36 = vmul.f32 %v3498_v25, %v8744_v32  ;;  %v3503_v11 = vmul.f32 %v6289_v23, %v3502_v31 }
 0x779   :  { %v3517_v38 = vadd.f32 %v3515_v36, %v8202_v35  ;;  %v3504_v33 = vadd.f32 %v6289_v23, %v3503_v11 }
 0x77b   :  { %v3519_v19 = vmul.f32 0.70710677, %v3517_v38  ;;  %v3508_v43 = vsel %vm3507_vm4, %v6289_v23, %v3504_v33 }
 0x77c   :  { %v3513_v34 = vsel %vm3510_vm5, %v3512_v29, %v3508_v43 }
 0x77d   :  { %v3521_v44 = vadd.f32 %v3519_v19, %v7054_v0  ;;  %v3516_v45 = vmul.f32 %v3513_v34, %v8784_v54  ;;  %v6187_v0 = vld [vmem:[%s8890_s13 + $0x30] sm:$0xff] }
 0x77e   :  { %3950 = vmatpush.bf16.msrb.mxu0 %v6187_v0  ;;  %v6183_v54 = vld [vmem:[%s8890_s13 + $0x10] sm:$0xff] }
 0x77f   :  { %v3518_v46 = vadd.f32 %v3516_v45, %v8207_v18  ;;  %v3523_v32 = vpack.c.bf16 %v3521_v44, %v3521_v44  ;;  %v6196_v18 = vld [vmem:[%s8890_s13 + $0x78] sm:$0xff] }
 0x780   :  { %3962 = vmatpush.bf16.msrb.mxu1 %v6196_v18 }
 0x781   :  { %v3520_v47 = vmul.f32 0.70710677, %v3518_v46  ;;  %3731 = vmatmul.bf16.vlgmr.msra.gmra.mxu0 %v3523_v32  ;;  %3757 = vmatmul.bf16.vlgmr.msra.gmra.mxu2 %v3523_v32 }
 0x783   :  { %v3522_v35 = vadd.f32 %v3520_v47, %v7092_v13  ;;  %v6186_v13 = vld [vmem:[%s8890_s13 + $0x28] sm:$0xff] }
 0x784   :  { %3951 = vmatpush.bf16.msrb.mxu0 %v6186_v13  ;;  %3963 = vmatpush.bf16.msrb.mxu1 %v6195_v50 }
 0x785   :  { %v3524_v48 = vpack.c.bf16 %v3522_v35, %v3522_v35  ;;  %v6209_v35 = vld [vmem:[%s8889_s14] ss:$0 sm:$0xff] }
 0x787   :  { %3744 = vmatmul.bf16.vlgmr.msra.gmra.mxu1 %v3524_v48  ;;  %3770 = vmatmul.bf16.vlgmr.msra.gmra.mxu3 %v3524_v48 }
 0x788   :  { %3952 = vmatpush.bf16.msrb.mxu0 %v6185_v51  ;;  %3964 = vmatpush.bf16.msrb.mxu1 %v6194_v52 }
 0x78c   :  { %3953 = vmatpush.bf16.msrb.mxu0 %v6184_v53  ;;  %3965 = vmatpush.bf16.msrb.mxu1 %v6193_v39 }
 0x790   :  { %3954 = vmatpush.bf16.msrb.mxu0 %v6183_v54  ;;  %3966 = vmatpush.bf16.msrb.mxu1 %v6192_v57 }
 0x794   :  { %3955 = vmatpush.bf16.msrb.mxu0 %v6182_v60  ;;  %3967 = vmatpush.bf16.msrb.mxu1 %v6191_v61 }
 0x798   :  { %3956 = vmatpush.bf16.msrb.mxu0 %v6181_v3  ;;  %3968 = vmatpush.bf16.msrb.mxu1 %v6190_v5 }
 0x79c   :  { %3969 = vmatpush.bf16.msrb.mxu1 %v6189_v8 }
 0x7fe   :  { %v3732_v55 = vpop.f32.mrf.mxu0 }
 0x7ff   :  { %v3733_v59 = vadd.f32 %v3732_v55, %v3559_v56 }
 0x804   :  { %v3745_v58 = vpop.f32.mrf.mxu1  ;;  %v3758_v62 = vpop.f32.mrf.mxu2 }
 0x805   :  { %v3746_v1 = vadd.f32 %v3745_v58, %v3733_v59  ;;  %v3759_v40 = vadd.f32 %v3758_v62, %v3560_v2 }
 0x806   :  { %v3734_v41 = vpop.f32.mrf.mxu0 }
 0x807   :  { %v5747_v4 = vmul.f32 -1.442695, %v3746_v1 }
 0x809   :  { %6290 = vpow2.f32 %v5747_v4 }
 0x80a   :  { %v3771_v26 = vpop.f32.mrf.mxu3 }
 0x80b   :  { %v3772_v7 = vadd.f32 %v3771_v26, %v3759_v40 }
 0x80c   :  { %v3747_v9 = vpop.f32.mrf.mxu1  ;;  %v3760_v63 = vpop.f32.mrf.mxu2 }
 0x80d   :  { %v5748_v6 = vmul.f32 -1.442695, %v3772_v7 }
 0x80f   :  { %v6291_v12 = vpop.eup %6290  ;;  %6292 = vpow2.f32 %v5748_v6 }
 0x810   :  { %v3781_v14 = vadd.f32 1.0, %v6291_v12 }
 0x812   :  { %6294 = vrcp.f32 %v3781_v14  ;;  %v3773_v15 = vpop.f32.mrf.mxu3  ;;  %v3794_v23 = vand.u32 2147483648, %v3781_v14  ;;  %v3792_v27 = vand.u32 2147483647, %v3781_v14  ;;  %vm3788_vm7 = vweird.f32 %v3781_v14 }
 0x814   :  { %v3795_v25 = vor.u32 1.1754944e-38, %v3794_v23  ;;  %vm3793_vm9 = vcmp.eq.f32.partialorder %v3792_v27, 8.507059e+37 }
 0x815   :  { %v6293_v16 = vpop.eup %6292 }
 0x816   :  { %v3782_v17 = vadd.f32 1.0, %v6293_v16 }
 0x818   :  { %v6295_v20 = vpop.eup %6294  ;;  %6296 = vrcp.f32 %v3782_v17  ;;  %v3809_v37 = vand.u32 2147483648, %v3782_v17  ;;  %v3807_v29 = vand.u32 2147483647, %v3782_v17  ;;  %vm3803_vm11 = vweird.f32 %v3782_v17 }
 0x819   :  { %v3784_v21 = vmul.f32 %v6295_v20, %v3781_v14  ;;  %vm3789_vm6 = vweird.f32 %v6295_v20 }
 0x81a   :  { %vm3790_vm8 = vmor %vm3788_vm7, %vm3789_vm6  ;;  %v3810_v34 = vor.u32 1.1754944e-38, %v3809_v37  ;;  %vm3808_vm13 = vcmp.eq.f32.partialorder %v3807_v29, 8.507059e+37 }
 0x81b   :  { %v3785_v22 = vsub.f32 1.0, %v3784_v21 }
 0x81d   :  { %v3786_v24 = vmul.f32 %v6295_v20, %v3785_v22 }
 0x81e   :  { %v6297_v28 = vpop.eup %6296 }
 0x81f   :  { %v3787_v30 = vadd.f32 %v6295_v20, %v3786_v24  ;;  %v3799_v31 = vmul.f32 %v6297_v28, %v3782_v17  ;;  %vm3804_vm10 = vweird.f32 %v6297_v28 }
 0x820   :  { %vm3805_vm12 = vmor %vm3803_vm11, %vm3804_vm10 }
 0x821   :  { %v3791_v10 = vsel %vm3790_vm8, %v6295_v20, %v3787_v30  ;;  %v3800_v36 = vsub.f32 1.0, %v3799_v31 }
 0x822   :  { %v3796_v11 = vsel %vm3793_vm9, %v3795_v25, %v3791_v10 }
 0x823   :  { %v3813_v38 = vmul.f32 %v3796_v11, %v3746_v1  ;;  %v3801_v33 = vmul.f32 %v6297_v28, %v3800_v36 }
 0x825   :  { %v3815_v19 = vpack.c.bf16 %v3813_v38, %v3813_v38  ;;  %v3802_v43 = vadd.f32 %v6297_v28, %v3801_v33 }
 0x827   :  { %v3806_v44 = vsel %vm3805_vm12, %v6297_v28, %v3802_v43  ;;  %3957 = vmatmul.bf16.vlgmr.msrb.gmra.mxu0 %v3815_v19 }
 0x828   :  { %v3811_v45 = vsel %vm3808_vm13, %v3810_v34, %v3806_v44 }
 0x829   :  { %v3814_v46 = vmul.f32 %v3811_v45, %v3772_v7 }
 0x82b   :  { %v3816_v32 = vpack.c.bf16 %v3814_v46, %v3814_v46 }
 0x82d   :  { %3970 = vmatmul.bf16.vlgmr.msrb.gmra.mxu1 %v3816_v32 }
 0x8a4   :  { %v3958_v47 = vpop.f32.mrf.mxu0 }
 0x8a5   :  { %v3959_v48 = vadd.f32 %v6209_v35, %v3958_v47 }
 0x8aa   :  { %v3971_v49 = vpop.f32.mrf.mxu1 }
 0x8ab   :  { %v3972_v0 = vadd.f32 %v3971_v49, %v3959_v48 }
 0x8ac   :  { %v3960_v18 = vpop.f32.mrf.mxu0 }
 0x8ad   :  { %3975 = vst [vmem:[%s8892_s15] sm:$0xff] %v3972_v0 }
 0x8b2   :  { %v3973_v13 = vpop.f32.mrf.mxu1 }

</bundles_post_ra>
